<compile_context>
chip_gen: v6e
topology: v6e:2x2x1
jax: 0.10.0
libtpu: 0.0.40
codegen_flags: <defaults>
</compile_context>

<pallas_src>
import numpy as np
import jax
import jax.numpy as jnp
from jax import lax
from jax.experimental import pallas as pl
from jax.experimental.pallas import tpu as pltpu


def _round_up(x, m):
    return (x + m - 1) // m * m


def _make_aux_head_kernel(W, n_pool_h, n_pool_w):
    """Kernel closure over static pool geometry (W columns, 2x2 pooled output)."""

    def kernel(x_ref, w1_ref, shift_ref, w2_ref, w3_ref, b3_ref, out_ref, h_ref):
        # x_ref: (TILE_N, H*W, C) bf16, channels on the lane axis.
        # ReLU once, upcast once; pool accumulation happens in f32 on the VPU.
        xr = jnp.maximum(x_ref[...].astype(jnp.float32), 0.0)
        w1 = w1_ref[...]        # (C, 128) bf16, BN scale folded in  (hoisted)
        shift = shift_ref[...]  # (1, 128) f32                        (hoisted)

        for oh in range(n_pool_h):
            for ow in range(n_pool_w):
                q = oh * n_pool_w + ow
                # --- ReLU + 5x5 / stride-2 average pool for output position q ---
                acc = None
                for dr in range(5):
                    base = (2 * oh + dr) * W + 2 * ow
                    for dc in range(5):
                        v = xr[:, base + dc, :]          # (TILE_N, C) lane-dense
                        acc = v if acc is None else acc + v
                pooled = acc * (1.0 / 25.0)              # (TILE_N, C) f32
                # --- 1x1 conv (BN scale folded) -> BN shift -> ReLU ---
                hq = jnp.dot(pooled.astype(jnp.bfloat16), w1,
                             preferred_element_type=jnp.float32)   # (TILE_N, 128)
                hq = jnp.maximum(hq + shift, 0.0)
                # write straight into the q-major / c-minor (TILE_N, 512) layout
                h_ref[:, q * 128:(q + 1) * 128] = hq.astype(jnp.bfloat16)

        # Conv2d(128, 768, 2) on the 2x2 map == one (TILE_N,512)x(512,768) matmul.
        z = jnp.dot(h_ref[...], w2_ref[...], preferred_element_type=jnp.float32)
        z = jnp.maximum(z, 0.0).astype(jnp.bfloat16)
        # Classifier; num_classes is padded to a multiple of 128 -> lane-dense store.
        out_ref[...] = (jnp.dot(z, w3_ref[...], preferred_element_type=jnp.float32)
                        + b3_ref[...])

    return kernel


def aux_head_forward(x, params, num_classes, *, tile_n=128):
    N, C, H, W = x.shape
    OH = (H - 5) // 2 + 1
    OW = (W - 5) // 2 + 1
    assert OH == 2 and OW == 2, \
        "aux head expects a 7x7 (or 8x8) feature map so Linear(768) type-checks"

    eps = 1e-5
    scale = params['bn_gamma'] / jnp.sqrt(params['bn_var'] + eps)             # (128,)
    shift = (params['bn_beta'] - params['bn_mean'] * scale)                   # (128,)
    shift = shift.reshape(1, 128).astype(jnp.float32)
    # conv1 (128, C, 1, 1) -> (C, 128), BN scale folded in; bf16 for the MXU.
    w1 = (params['conv1_w'].reshape(128, C).T * scale[None, :]).astype(jnp.bfloat16)
    # conv2 (768, 128, 2, 2) -> ((kh*2+kw)*128 + c, 768): q-major, c-minor.
    w2 = params['conv2_w'].transpose(2, 3, 1, 0).reshape(4 * 128, 768)
    w2 = w2.astype(jnp.bfloat16)
    # classifier, zero-padded to a lane-dense multiple of 128 classes.
    ncls_pad = _round_up(num_classes, 128)
    w3 = jnp.zeros((768, ncls_pad), jnp.bfloat16)
    w3 = w3.at[:, :num_classes].set(params['fc_w'].T.astype(jnp.bfloat16))
    b3 = jnp.zeros((1, ncls_pad), jnp.float32)
    b3 = b3.at[0, :num_classes].set(params['fc_b'].astype(jnp.float32))

    # NCHW -> (N, H*W, C): channels on the lane axis; bf16 halves the HBM stream.
    x_npc = jnp.transpose(x, (0, 2, 3, 1)).reshape(N, H * W, C).astype(jnp.bfloat16)

    # Batch tiling (multiple of 8 sublanes); pad the batch, slice it back off after.
    tile_n = max(8, min(_round_up(tile_n, 8), _round_up(N, 8)))
    n_pad = _round_up(N, tile_n)
    if n_pad != N:
        x_npc = jnp.pad(x_npc, ((0, n_pad - N), (0, 0), (0, 0)))
    grid = (n_pad // tile_n,)

    kernel = _make_aux_head_kernel(W, OH, OW)
    out = pl.pallas_call(
        kernel,
        out_shape=jax.ShapeDtypeStruct((n_pad, ncls_pad), jnp.float32),
        grid_spec=pltpu.PrefetchScalarGridSpec(
            num_scalar_prefetch=0,
            grid=grid,
            in_specs=[
                pl.BlockSpec((tile_n, H * W, C), lambda i: (i, 0, 0)),  # streamed
                pl.BlockSpec((C, 128), lambda i: (0, 0)),               # resident
                pl.BlockSpec((1, 128), lambda i: (0, 0)),
                pl.BlockSpec((4 * 128, 768), lambda i: (0, 0)),
                pl.BlockSpec((768, ncls_pad), lambda i: (0, 0)),
                pl.BlockSpec((1, ncls_pad), lambda i: (0, 0)),
            ],
            out_specs=pl.BlockSpec((tile_n, ncls_pad), lambda i: (i, 0)),
            scratch_shapes=[pltpu.VMEM((tile_n, 4 * 128), jnp.bfloat16)],
        ),
        compiler_params=pltpu.CompilerParams(
            dimension_semantics=("parallel",)),
    )(x_npc, w1, shift, w2, w3, b3)
    return out[:N, :num_classes]


def reference_forward(x, params):
    """Pure-JAX f32 mirror of the PyTorch forward (BN in eval mode)."""
    eps = 1e-5
    h = jnp.maximum(x, 0.0)
    s = lax.reduce_window(h, 0.0, lax.add, (1, 1, 5, 5), (1, 1, 2, 2), 'VALID')
    h = s / 25.0
    h = lax.conv_general_dilated(h, params['conv1_w'], (1, 1), 'VALID',
                                 dimension_numbers=('NCHW', 'OIHW', 'NCHW'))
    g = params['bn_gamma'][None, :, None, None]
    b = params['bn_beta'][None, :, None, None]
    m = params['bn_mean'][None, :, None, None]
    v = params['bn_var'][None, :, None, None]
    h = (h - m) / jnp.sqrt(v + eps) * g + b
    h = jnp.maximum(h, 0.0)
    h = lax.conv_general_dilated(h, params['conv2_w'], (1, 1), 'VALID',
                                 dimension_numbers=('NCHW', 'OIHW', 'NCHW'))
    h = jnp.maximum(h, 0.0)
    h = h.reshape(h.shape[0], -1)
    return h @ params['fc_w'].T + params['fc_b']


if __name__ == "__main__":
    # Small demo shapes: N=30 (not a tile multiple -> exercises batch padding),
    # tile_n=8 -> 4 grid steps; num_classes=10 -> exercises the 128-lane padding.
    N, C, H, W = 30, 16, 7, 7
    num_classes = 10

    key = jax.random.PRNGKey(0)
    ks = jax.random.split(key, 8)
    x = jax.random.normal(ks[0], (N, C, H, W), jnp.float32)
    params = {
        'conv1_w': jax.random.normal(ks[1], (128, C, 1, 1), jnp.float32) * 0.1,
        'bn_gamma': 1.0 + 0.1 * jax.random.normal(ks[2], (128,), jnp.float32),
        'bn_beta': 0.1 * jax.random.normal(ks[3], (128,), jnp.float32),
        'bn_mean': 0.1 * jax.random.normal(ks[4], (128,), jnp.float32),
        'bn_var': 1.0 + 0.1 * jnp.abs(jax.random.normal(ks[5], (128,), jnp.float32)),
        'conv2_w': jax.random.normal(ks[6], (768, 128, 2, 2), jnp.float32) * 0.05,
        'fc_w': jax.random.normal(ks[7], (num_classes, 768), jnp.float32) * 0.05,
        'fc_b': jnp.linspace(-0.1, 0.1, num_classes).astype(jnp.float32),
    }

    out = aux_head_forward(x, params, num_classes, tile_n=8)
    out = jax.block_until_ready(out)
    assert out.shape == (N, num_classes)

    ref = reference_forward(x, params)
    # bf16 inputs/weights with f32 accumulation -> compare at mixed-precision tolerance.
    np.testing.assert_allclose(np.asarray(out), np.asarray(ref), rtol=2e-2, atol=2e-2)
    print("KERNEL_OK")
</pallas_src>

<mosaic_0001>
module attributes {stable_mosaic.version = 11 : i64} {
  func.func @kernel(%arg0: i32, %arg1: memref<8x49x16xbf16, #tpu.memory_space<vmem>>, %arg2: memref<16x128xbf16, #tpu.memory_space<vmem>>, %arg3: memref<1x128xf32, #tpu.memory_space<vmem>>, %arg4: memref<512x768xbf16, #tpu.memory_space<vmem>>, %arg5: memref<768x128xbf16, #tpu.memory_space<vmem>>, %arg6: memref<1x128xf32, #tpu.memory_space<vmem>>, %arg7: memref<8x128xf32, #tpu.memory_space<vmem>>, %arg8: memref<8x512xbf16, #tpu.memory_space<vmem>>) attributes {dimension_semantics = [#tpu.dimension_semantics<parallel>], iteration_bounds = array<i64: 4>, scalar_prefetch = 0 : i64, scratch_operands = 1 : i64, tpu.core_type = #tpu.core_type<tc>, window_params = [{transform_indices = @transform_0, window_bounds = array<i64: 8, 49, 16>}, {pipeline_mode = #tpu.pipeline_mode<synchronous>, transform_indices = @transform_1, window_bounds = array<i64: 16, 128>}, {pipeline_mode = #tpu.pipeline_mode<synchronous>, transform_indices = @transform_2, window_bounds = array<i64: 1, 128>}, {pipeline_mode = #tpu.pipeline_mode<synchronous>, transform_indices = @transform_3, window_bounds = array<i64: 512, 768>}, {pipeline_mode = #tpu.pipeline_mode<synchronous>, transform_indices = @transform_4, window_bounds = array<i64: 768, 128>}, {pipeline_mode = #tpu.pipeline_mode<synchronous>, transform_indices = @transform_5, window_bounds = array<i64: 1, 128>}, {transform_indices = @transform_6, window_bounds = array<i64: 8, 128>}]} {
    %c0 = arith.constant 0 : index
    %c0_0 = arith.constant 0 : index
    %c0_1 = arith.constant 0 : index
    %0 = vector.load %arg1[%c0, %c0_0, %c0_1] : memref<8x49x16xbf16, #tpu.memory_space<vmem>>, vector<8x49x16xbf16>
    %1 = arith.extf %0 : vector<8x49x16xbf16> to vector<8x49x16xf32>
    %cst = arith.constant 0.000000e+00 : f32
    %2 = vector.broadcast %cst : f32 to vector<8x49x16xf32>
    %3 = arith.maximumf %1, %2 : vector<8x49x16xf32>
    %c0_2 = arith.constant 0 : index
    %c0_3 = arith.constant 0 : index
    %4 = vector.load %arg2[%c0_2, %c0_3] : memref<16x128xbf16, #tpu.memory_space<vmem>>, vector<16x128xbf16>
    %c0_4 = arith.constant 0 : index
    %c0_5 = arith.constant 0 : index
    %5 = vector.load %arg3[%c0_4, %c0_5] : memref<1x128xf32, #tpu.memory_space<vmem>>, vector<1x128xf32>
    %6 = vector.extract_strided_slice %3 {offsets = [0, 0, 0], sizes = [8, 1, 16], strides = [1, 1, 1]} : vector<8x49x16xf32> to vector<8x1x16xf32>
    %7 = vector.shape_cast %6 : vector<8x1x16xf32> to vector<8x16xf32>
    %8 = vector.extract_strided_slice %3 {offsets = [0, 1, 0], sizes = [8, 1, 16], strides = [1, 1, 1]} : vector<8x49x16xf32> to vector<8x1x16xf32>
    %9 = vector.shape_cast %8 : vector<8x1x16xf32> to vector<8x16xf32>
    %10 = arith.addf %7, %9 : vector<8x16xf32>
    %11 = vector.extract_strided_slice %3 {offsets = [0, 2, 0], sizes = [8, 1, 16], strides = [1, 1, 1]} : vector<8x49x16xf32> to vector<8x1x16xf32>
    %12 = vector.shape_cast %11 : vector<8x1x16xf32> to vector<8x16xf32>
    %13 = arith.addf %10, %12 : vector<8x16xf32>
    %14 = vector.extract_strided_slice %3 {offsets = [0, 3, 0], sizes = [8, 1, 16], strides = [1, 1, 1]} : vector<8x49x16xf32> to vector<8x1x16xf32>
    %15 = vector.shape_cast %14 : vector<8x1x16xf32> to vector<8x16xf32>
    %16 = arith.addf %13, %15 : vector<8x16xf32>
    %17 = vector.extract_strided_slice %3 {offsets = [0, 4, 0], sizes = [8, 1, 16], strides = [1, 1, 1]} : vector<8x49x16xf32> to vector<8x1x16xf32>
    %18 = vector.shape_cast %17 : vector<8x1x16xf32> to vector<8x16xf32>
    %19 = arith.addf %16, %18 : vector<8x16xf32>
    %20 = vector.extract_strided_slice %3 {offsets = [0, 7, 0], sizes = [8, 1, 16], strides = [1, 1, 1]} : vector<8x49x16xf32> to vector<8x1x16xf32>
    %21 = vector.shape_cast %20 : vector<8x1x16xf32> to vector<8x16xf32>
    %22 = arith.addf %19, %21 : vector<8x16xf32>
    %23 = vector.extract_strided_slice %3 {offsets = [0, 8, 0], sizes = [8, 1, 16], strides = [1, 1, 1]} : vector<8x49x16xf32> to vector<8x1x16xf32>
    %24 = vector.shape_cast %23 : vector<8x1x16xf32> to vector<8x16xf32>
    %25 = arith.addf %22, %24 : vector<8x16xf32>
    %26 = vector.extract_strided_slice %3 {offsets = [0, 9, 0], sizes = [8, 1, 16], strides = [1, 1, 1]} : vector<8x49x16xf32> to vector<8x1x16xf32>
    %27 = vector.shape_cast %26 : vector<8x1x16xf32> to vector<8x16xf32>
    %28 = arith.addf %25, %27 : vector<8x16xf32>
    %29 = vector.extract_strided_slice %3 {offsets = [0, 10, 0], sizes = [8, 1, 16], strides = [1, 1, 1]} : vector<8x49x16xf32> to vector<8x1x16xf32>
    %30 = vector.shape_cast %29 : vector<8x1x16xf32> to vector<8x16xf32>
    %31 = arith.addf %28, %30 : vector<8x16xf32>
    %32 = vector.extract_strided_slice %3 {offsets = [0, 11, 0], sizes = [8, 1, 16], strides = [1, 1, 1]} : vector<8x49x16xf32> to vector<8x1x16xf32>
    %33 = vector.shape_cast %32 : vector<8x1x16xf32> to vector<8x16xf32>
    %34 = arith.addf %31, %33 : vector<8x16xf32>
    %35 = vector.extract_strided_slice %3 {offsets = [0, 14, 0], sizes = [8, 1, 16], strides = [1, 1, 1]} : vector<8x49x16xf32> to vector<8x1x16xf32>
    %36 = vector.shape_cast %35 : vector<8x1x16xf32> to vector<8x16xf32>
    %37 = arith.addf %34, %36 : vector<8x16xf32>
    %38 = vector.extract_strided_slice %3 {offsets = [0, 15, 0], sizes = [8, 1, 16], strides = [1, 1, 1]} : vector<8x49x16xf32> to vector<8x1x16xf32>
    %39 = vector.shape_cast %38 : vector<8x1x16xf32> to vector<8x16xf32>
    %40 = arith.addf %37, %39 : vector<8x16xf32>
    %41 = vector.extract_strided_slice %3 {offsets = [0, 16, 0], sizes = [8, 1, 16], strides = [1, 1, 1]} : vector<8x49x16xf32> to vector<8x1x16xf32>
    %42 = vector.shape_cast %41 : vector<8x1x16xf32> to vector<8x16xf32>
    %43 = arith.addf %40, %42 : vector<8x16xf32>
    %44 = vector.extract_strided_slice %3 {offsets = [0, 17, 0], sizes = [8, 1, 16], strides = [1, 1, 1]} : vector<8x49x16xf32> to vector<8x1x16xf32>
    %45 = vector.shape_cast %44 : vector<8x1x16xf32> to vector<8x16xf32>
    %46 = arith.addf %43, %45 : vector<8x16xf32>
    %47 = vector.extract_strided_slice %3 {offsets = [0, 18, 0], sizes = [8, 1, 16], strides = [1, 1, 1]} : vector<8x49x16xf32> to vector<8x1x16xf32>
    %48 = vector.shape_cast %47 : vector<8x1x16xf32> to vector<8x16xf32>
    %49 = arith.addf %46, %48 : vector<8x16xf32>
    %50 = vector.extract_strided_slice %3 {offsets = [0, 21, 0], sizes = [8, 1, 16], strides = [1, 1, 1]} : vector<8x49x16xf32> to vector<8x1x16xf32>
    %51 = vector.shape_cast %50 : vector<8x1x16xf32> to vector<8x16xf32>
    %52 = arith.addf %49, %51 : vector<8x16xf32>
    %53 = vector.extract_strided_slice %3 {offsets = [0, 22, 0], sizes = [8, 1, 16], strides = [1, 1, 1]} : vector<8x49x16xf32> to vector<8x1x16xf32>
    %54 = vector.shape_cast %53 : vector<8x1x16xf32> to vector<8x16xf32>
    %55 = arith.addf %52, %54 : vector<8x16xf32>
    %56 = vector.extract_strided_slice %3 {offsets = [0, 23, 0], sizes = [8, 1, 16], strides = [1, 1, 1]} : vector<8x49x16xf32> to vector<8x1x16xf32>
    %57 = vector.shape_cast %56 : vector<8x1x16xf32> to vector<8x16xf32>
    %58 = arith.addf %55, %57 : vector<8x16xf32>
    %59 = vector.extract_strided_slice %3 {offsets = [0, 24, 0], sizes = [8, 1, 16], strides = [1, 1, 1]} : vector<8x49x16xf32> to vector<8x1x16xf32>
    %60 = vector.shape_cast %59 : vector<8x1x16xf32> to vector<8x16xf32>
    %61 = arith.addf %58, %60 : vector<8x16xf32>
    %62 = vector.extract_strided_slice %3 {offsets = [0, 25, 0], sizes = [8, 1, 16], strides = [1, 1, 1]} : vector<8x49x16xf32> to vector<8x1x16xf32>
    %63 = vector.shape_cast %62 : vector<8x1x16xf32> to vector<8x16xf32>
    %64 = arith.addf %61, %63 : vector<8x16xf32>
    %65 = vector.extract_strided_slice %3 {offsets = [0, 28, 0], sizes = [8, 1, 16], strides = [1, 1, 1]} : vector<8x49x16xf32> to vector<8x1x16xf32>
    %66 = vector.shape_cast %65 : vector<8x1x16xf32> to vector<8x16xf32>
    %67 = arith.addf %64, %66 : vector<8x16xf32>
    %68 = vector.extract_strided_slice %3 {offsets = [0, 29, 0], sizes = [8, 1, 16], strides = [1, 1, 1]} : vector<8x49x16xf32> to vector<8x1x16xf32>
    %69 = vector.shape_cast %68 : vector<8x1x16xf32> to vector<8x16xf32>
    %70 = arith.addf %67, %69 : vector<8x16xf32>
    %71 = vector.extract_strided_slice %3 {offsets = [0, 30, 0], sizes = [8, 1, 16], strides = [1, 1, 1]} : vector<8x49x16xf32> to vector<8x1x16xf32>
    %72 = vector.shape_cast %71 : vector<8x1x16xf32> to vector<8x16xf32>
    %73 = arith.addf %70, %72 : vector<8x16xf32>
    %74 = vector.extract_strided_slice %3 {offsets = [0, 31, 0], sizes = [8, 1, 16], strides = [1, 1, 1]} : vector<8x49x16xf32> to vector<8x1x16xf32>
    %75 = vector.shape_cast %74 : vector<8x1x16xf32> to vector<8x16xf32>
    %76 = arith.addf %73, %75 : vector<8x16xf32>
    %77 = vector.extract_strided_slice %3 {offsets = [0, 32, 0], sizes = [8, 1, 16], strides = [1, 1, 1]} : vector<8x49x16xf32> to vector<8x1x16xf32>
    %78 = vector.shape_cast %77 : vector<8x1x16xf32> to vector<8x16xf32>
    %79 = arith.addf %76, %78 : vector<8x16xf32>
    %cst_6 = arith.constant 4.000000e-02 : f32
    %80 = vector.broadcast %cst_6 : f32 to vector<8x16xf32>
    %81 = arith.mulf %79, %80 : vector<8x16xf32>
    %82 = arith.truncf %81 : vector<8x16xf32> to vector<8x16xbf16>
    %cst_7 = arith.constant dense<0.000000e+00> : vector<8x128xf32>
    %83 = tpu.matmul %82, %4, %cst_7 {dimension_numbers = #tpu.dot_dimension_numbers<[1], [0], [0], [1], [0, 0, 1, 1], [], []>} : vector<8x16xbf16>, vector<16x128xbf16>, vector<8x128xf32> -> vector<8x128xf32>
    %84 = vector.broadcast %5 : vector<1x128xf32> to vector<8x128xf32>
    %85 = arith.addf %83, %84 : vector<8x128xf32>
    %cst_8 = arith.constant 0.000000e+00 : f32
    %86 = vector.broadcast %cst_8 : f32 to vector<8x128xf32>
    %87 = arith.maximumf %85, %86 : vector<8x128xf32>
    %88 = arith.truncf %87 : vector<8x128xf32> to vector<8x128xbf16>
    %c0_9 = arith.constant 0 : index
    %c0_10 = arith.constant 0 : index
    %89 = vector.load %arg8[%c0_9, %c0_10] : memref<8x512xbf16, #tpu.memory_space<vmem>>, vector<8x128xbf16>
    tpu.vector_store %arg8[%c0_9, %c0_10], %88 {strides = array<i32>} : memref<8x512xbf16, #tpu.memory_space<vmem>>, vector<8x128xbf16>,
    %90 = vector.extract_strided_slice %3 {offsets = [0, 2, 0], sizes = [8, 1, 16], strides = [1, 1, 1]} : vector<8x49x16xf32> to vector<8x1x16xf32>
    %91 = vector.shape_cast %90 : vector<8x1x16xf32> to vector<8x16xf32>
    %92 = vector.extract_strided_slice %3 {offsets = [0, 3, 0], sizes = [8, 1, 16], strides = [1, 1, 1]} : vector<8x49x16xf32> to vector<8x1x16xf32>
    %93 = vector.shape_cast %92 : vector<8x1x16xf32> to vector<8x16xf32>
    %94 = arith.addf %91, %93 : vector<8x16xf32>
    %95 = vector.extract_strided_slice %3 {offsets = [0, 4, 0], sizes = [8, 1, 16], strides = [1, 1, 1]} : vector<8x49x16xf32> to vector<8x1x16xf32>
    %96 = vector.shape_cast %95 : vector<8x1x16xf32> to vector<8x16xf32>
    %97 = arith.addf %94, %96 : vector<8x16xf32>
    %98 = vector.extract_strided_slice %3 {offsets = [0, 5, 0], sizes = [8, 1, 16], strides = [1, 1, 1]} : vector<8x49x16xf32> to vector<8x1x16xf32>
    %99 = vector.shape_cast %98 : vector<8x1x16xf32> to vector<8x16xf32>
    %100 = arith.addf %97, %99 : vector<8x16xf32>
    %101 = vector.extract_strided_slice %3 {offsets = [0, 6, 0], sizes = [8, 1, 16], strides = [1, 1, 1]} : vector<8x49x16xf32> to vector<8x1x16xf32>
    %102 = vector.shape_cast %101 : vector<8x1x16xf32> to vector<8x16xf32>
    %103 = arith.addf %100, %102 : vector<8x16xf32>
    %104 = vector.extract_strided_slice %3 {offsets = [0, 9, 0], sizes = [8, 1, 16], strides = [1, 1, 1]} : vector<8x49x16xf32> to vector<8x1x16xf32>
    %105 = vector.shape_cast %104 : vector<8x1x16xf32> to vector<8x16xf32>
    %106 = arith.addf %103, %105 : vector<8x16xf32>
    %107 = vector.extract_strided_slice %3 {offsets = [0, 10, 0], sizes = [8, 1, 16], strides = [1, 1, 1]} : vector<8x49x16xf32> to vector<8x1x16xf32>
    %108 = vector.shape_cast %107 : vector<8x1x16xf32> to vector<8x16xf32>
    %109 = arith.addf %106, %108 : vector<8x16xf32>
    %110 = vector.extract_strided_slice %3 {offsets = [0, 11, 0], sizes = [8, 1, 16], strides = [1, 1, 1]} : vector<8x49x16xf32> to vector<8x1x16xf32>
    %111 = vector.shape_cast %110 : vector<8x1x16xf32> to vector<8x16xf32>
    %112 = arith.addf %109, %111 : vector<8x16xf32>
    %113 = vector.extract_strided_slice %3 {offsets = [0, 12, 0], sizes = [8, 1, 16], strides = [1, 1, 1]} : vector<8x49x16xf32> to vector<8x1x16xf32>
    %114 = vector.shape_cast %113 : vector<8x1x16xf32> to vector<8x16xf32>
    %115 = arith.addf %112, %114 : vector<8x16xf32>
    %116 = vector.extract_strided_slice %3 {offsets = [0, 13, 0], sizes = [8, 1, 16], strides = [1, 1, 1]} : vector<8x49x16xf32> to vector<8x1x16xf32>
    %117 = vector.shape_cast %116 : vector<8x1x16xf32> to vector<8x16xf32>
    %118 = arith.addf %115, %117 : vector<8x16xf32>
    %119 = vector.extract_strided_slice %3 {offsets = [0, 16, 0], sizes = [8, 1, 16], strides = [1, 1, 1]} : vector<8x49x16xf32> to vector<8x1x16xf32>
    %120 = vector.shape_cast %119 : vector<8x1x16xf32> to vector<8x16xf32>
    %121 = arith.addf %118, %120 : vector<8x16xf32>
    %122 = vector.extract_strided_slice %3 {offsets = [0, 17, 0], sizes = [8, 1, 16], strides = [1, 1, 1]} : vector<8x49x16xf32> to vector<8x1x16xf32>
    %123 = vector.shape_cast %122 : vector<8x1x16xf32> to vector<8x16xf32>
    %124 = arith.addf %121, %123 : vector<8x16xf32>
    %125 = vector.extract_strided_slice %3 {offsets = [0, 18, 0], sizes = [8, 1, 16], strides = [1, 1, 1]} : vector<8x49x16xf32> to vector<8x1x16xf32>
    %126 = vector.shape_cast %125 : vector<8x1x16xf32> to vector<8x16xf32>
    %127 = arith.addf %124, %126 : vector<8x16xf32>
    %128 = vector.extract_strided_slice %3 {offsets = [0, 19, 0], sizes = [8, 1, 16], strides = [1, 1, 1]} : vector<8x49x16xf32> to vector<8x1x16xf32>
    %129 = vector.shape_cast %128 : vector<8x1x16xf32> to vector<8x16xf32>
    %130 = arith.addf %127, %129 : vector<8x16xf32>
    %131 = vector.extract_strided_slice %3 {offsets = [0, 20, 0], sizes = [8, 1, 16], strides = [1, 1, 1]} : vector<8x49x16xf32> to vector<8x1x16xf32>
    %132 = vector.shape_cast %131 : vector<8x1x16xf32> to vector<8x16xf32>
    %133 = arith.addf %130, %132 : vector<8x16xf32>
    %134 = vector.extract_strided_slice %3 {offsets = [0, 23, 0], sizes = [8, 1, 16], strides = [1, 1, 1]} : vector<8x49x16xf32> to vector<8x1x16xf32>
    %135 = vector.shape_cast %134 : vector<8x1x16xf32> to vector<8x16xf32>
    %136 = arith.addf %133, %135 : vector<8x16xf32>
    %137 = vector.extract_strided_slice %3 {offsets = [0, 24, 0], sizes = [8, 1, 16], strides = [1, 1, 1]} : vector<8x49x16xf32> to vector<8x1x16xf32>
    %138 = vector.shape_cast %137 : vector<8x1x16xf32> to vector<8x16xf32>
    %139 = arith.addf %136, %138 : vector<8x16xf32>
    %140 = vector.extract_strided_slice %3 {offsets = [0, 25, 0], sizes = [8, 1, 16], strides = [1, 1, 1]} : vector<8x49x16xf32> to vector<8x1x16xf32>
    %141 = vector.shape_cast %140 : vector<8x1x16xf32> to vector<8x16xf32>
    %142 = arith.addf %139, %141 : vector<8x16xf32>
    %143 = vector.extract_strided_slice %3 {offsets = [0, 26, 0], sizes = [8, 1, 16], strides = [1, 1, 1]} : vector<8x49x16xf32> to vector<8x1x16xf32>
    %144 = vector.shape_cast %143 : vector<8x1x16xf32> to vector<8x16xf32>
    %145 = arith.addf %142, %144 : vector<8x16xf32>
    %146 = vector.extract_strided_slice %3 {offsets = [0, 27, 0], sizes = [8, 1, 16], strides = [1, 1, 1]} : vector<8x49x16xf32> to vector<8x1x16xf32>
    %147 = vector.shape_cast %146 : vector<8x1x16xf32> to vector<8x16xf32>
    %148 = arith.addf %145, %147 : vector<8x16xf32>
    %149 = vector.extract_strided_slice %3 {offsets = [0, 30, 0], sizes = [8, 1, 16], strides = [1, 1, 1]} : vector<8x49x16xf32> to vector<8x1x16xf32>
    %150 = vector.shape_cast %149 : vector<8x1x16xf32> to vector<8x16xf32>
    %151 = arith.addf %148, %150 : vector<8x16xf32>
    %152 = vector.extract_strided_slice %3 {offsets = [0, 31, 0], sizes = [8, 1, 16], strides = [1, 1, 1]} : vector<8x49x16xf32> to vector<8x1x16xf32>
    %153 = vector.shape_cast %152 : vector<8x1x16xf32> to vector<8x16xf32>
    %154 = arith.addf %151, %153 : vector<8x16xf32>
    %155 = vector.extract_strided_slice %3 {offsets = [0, 32, 0], sizes = [8, 1, 16], strides = [1, 1, 1]} : vector<8x49x16xf32> to vector<8x1x16xf32>
    %156 = vector.shape_cast %155 : vector<8x1x16xf32> to vector<8x16xf32>
    %157 = arith.addf %154, %156 : vector<8x16xf32>
    %158 = vector.extract_strided_slice %3 {offsets = [0, 33, 0], sizes = [8, 1, 16], strides = [1, 1, 1]} : vector<8x49x16xf32> to vector<8x1x16xf32>
    %159 = vector.shape_cast %158 : vector<8x1x16xf32> to vector<8x16xf32>
    %160 = arith.addf %157, %159 : vector<8x16xf32>
    %161 = vector.extract_strided_slice %3 {offsets = [0, 34, 0], sizes = [8, 1, 16], strides = [1, 1, 1]} : vector<8x49x16xf32> to vector<8x1x16xf32>
    %162 = vector.shape_cast %161 : vector<8x1x16xf32> to vector<8x16xf32>
    %163 = arith.addf %160, %162 : vector<8x16xf32>
    %cst_11 = arith.constant 4.000000e-02 : f32
    %164 = vector.broadcast %cst_11 : f32 to vector<8x16xf32>
    %165 = arith.mulf %163, %164 : vector<8x16xf32>
    %166 = arith.truncf %165 : vector<8x16xf32> to vector<8x16xbf16>
    %cst_12 = arith.constant dense<0.000000e+00> : vector<8x128xf32>
    %167 = tpu.matmul %166, %4, %cst_12 {dimension_numbers = #tpu.dot_dimension_numbers<[1], [0], [0], [1], [0, 0, 1, 1], [], []>} : vector<8x16xbf16>, vector<16x128xbf16>, vector<8x128xf32> -> vector<8x128xf32>
    %168 = vector.broadcast %5 : vector<1x128xf32> to vector<8x128xf32>
    %169 = arith.addf %167, %168 : vector<8x128xf32>
    %cst_13 = arith.constant 0.000000e+00 : f32
    %170 = vector.broadcast %cst_13 : f32 to vector<8x128xf32>
    %171 = arith.maximumf %169, %170 : vector<8x128xf32>
    %172 = arith.truncf %171 : vector<8x128xf32> to vector<8x128xbf16>
    %c0_14 = arith.constant 0 : index
    %c128 = arith.constant 128 : index
    %173 = vector.load %arg8[%c0_14, %c128] : memref<8x512xbf16, #tpu.memory_space<vmem>>, vector<8x128xbf16>
    tpu.vector_store %arg8[%c0_14, %c128], %172 {strides = array<i32>} : memref<8x512xbf16, #tpu.memory_space<vmem>>, vector<8x128xbf16>,
    %174 = vector.extract_strided_slice %3 {offsets = [0, 14, 0], sizes = [8, 1, 16], strides = [1, 1, 1]} : vector<8x49x16xf32> to vector<8x1x16xf32>
    %175 = vector.shape_cast %174 : vector<8x1x16xf32> to vector<8x16xf32>
    %176 = vector.extract_strided_slice %3 {offsets = [0, 15, 0], sizes = [8, 1, 16], strides = [1, 1, 1]} : vector<8x49x16xf32> to vector<8x1x16xf32>
    %177 = vector.shape_cast %176 : vector<8x1x16xf32> to vector<8x16xf32>
    %178 = arith.addf %175, %177 : vector<8x16xf32>
    %179 = vector.extract_strided_slice %3 {offsets = [0, 16, 0], sizes = [8, 1, 16], strides = [1, 1, 1]} : vector<8x49x16xf32> to vector<8x1x16xf32>
    %180 = vector.shape_cast %179 : vector<8x1x16xf32> to vector<8x16xf32>
    %181 = arith.addf %178, %180 : vector<8x16xf32>
    %182 = vector.extract_strided_slice %3 {offsets = [0, 17, 0], sizes = [8, 1, 16], strides = [1, 1, 1]} : vector<8x49x16xf32> to vector<8x1x16xf32>
    %183 = vector.shape_cast %182 : vector<8x1x16xf32> to vector<8x16xf32>
    %184 = arith.addf %181, %183 : vector<8x16xf32>
    %185 = vector.extract_strided_slice %3 {offsets = [0, 18, 0], sizes = [8, 1, 16], strides = [1, 1, 1]} : vector<8x49x16xf32> to vector<8x1x16xf32>
    %186 = vector.shape_cast %185 : vector<8x1x16xf32> to vector<8x16xf32>
    %187 = arith.addf %184, %186 : vector<8x16xf32>
    %188 = vector.extract_strided_slice %3 {offsets = [0, 21, 0], sizes = [8, 1, 16], strides = [1, 1, 1]} : vector<8x49x16xf32> to vector<8x1x16xf32>
    %189 = vector.shape_cast %188 : vector<8x1x16xf32> to vector<8x16xf32>
    %190 = arith.addf %187, %189 : vector<8x16xf32>
    %191 = vector.extract_strided_slice %3 {offsets = [0, 22, 0], sizes = [8, 1, 16], strides = [1, 1, 1]} : vector<8x49x16xf32> to vector<8x1x16xf32>
    %192 = vector.shape_cast %191 : vector<8x1x16xf32> to vector<8x16xf32>
    %193 = arith.addf %190, %192 : vector<8x16xf32>
    %194 = vector.extract_strided_slice %3 {offsets = [0, 23, 0], sizes = [8, 1, 16], strides = [1, 1, 1]} : vector<8x49x16xf32> to vector<8x1x16xf32>
    %195 = vector.shape_cast %194 : vector<8x1x16xf32> to vector<8x16xf32>
    %196 = arith.addf %193, %195 : vector<8x16xf32>
    %197 = vector.extract_strided_slice %3 {offsets = [0, 24, 0], sizes = [8, 1, 16], strides = [1, 1, 1]} : vector<8x49x16xf32> to vector<8x1x16xf32>
    %198 = vector.shape_cast %197 : vector<8x1x16xf32> to vector<8x16xf32>
    %199 = arith.addf %196, %198 : vector<8x16xf32>
    %200 = vector.extract_strided_slice %3 {offsets = [0, 25, 0], sizes = [8, 1, 16], strides = [1, 1, 1]} : vector<8x49x16xf32> to vector<8x1x16xf32>
    %201 = vector.shape_cast %200 : vector<8x1x16xf32> to vector<8x16xf32>
    %202 = arith.addf %199, %201 : vector<8x16xf32>
    %203 = vector.extract_strided_slice %3 {offsets = [0, 28, 0], sizes = [8, 1, 16], strides = [1, 1, 1]} : vector<8x49x16xf32> to vector<8x1x16xf32>
    %204 = vector.shape_cast %203 : vector<8x1x16xf32> to vector<8x16xf32>
    %205 = arith.addf %202, %204 : vector<8x16xf32>
    %206 = vector.extract_strided_slice %3 {offsets = [0, 29, 0], sizes = [8, 1, 16], strides = [1, 1, 1]} : vector<8x49x16xf32> to vector<8x1x16xf32>
    %207 = vector.shape_cast %206 : vector<8x1x16xf32> to vector<8x16xf32>
    %208 = arith.addf %205, %207 : vector<8x16xf32>
    %209 = vector.extract_strided_slice %3 {offsets = [0, 30, 0], sizes = [8, 1, 16], strides = [1, 1, 1]} : vector<8x49x16xf32> to vector<8x1x16xf32>
    %210 = vector.shape_cast %209 : vector<8x1x16xf32> to vector<8x16xf32>
    %211 = arith.addf %208, %210 : vector<8x16xf32>
    %212 = vector.extract_strided_slice %3 {offsets = [0, 31, 0], sizes = [8, 1, 16], strides = [1, 1, 1]} : vector<8x49x16xf32> to vector<8x1x16xf32>
    %213 = vector.shape_cast %212 : vector<8x1x16xf32> to vector<8x16xf32>
    %214 = arith.addf %211, %213 : vector<8x16xf32>
    %215 = vector.extract_strided_slice %3 {offsets = [0, 32, 0], sizes = [8, 1, 16], strides = [1, 1, 1]} : vector<8x49x16xf32> to vector<8x1x16xf32>
    %216 = vector.shape_cast %215 : vector<8x1x16xf32> to vector<8x16xf32>
    %217 = arith.addf %214, %216 : vector<8x16xf32>
    %218 = vector.extract_strided_slice %3 {offsets = [0, 35, 0], sizes = [8, 1, 16], strides = [1, 1, 1]} : vector<8x49x16xf32> to vector<8x1x16xf32>
    %219 = vector.shape_cast %218 : vector<8x1x16xf32> to vector<8x16xf32>
    %220 = arith.addf %217, %219 : vector<8x16xf32>
    %221 = vector.extract_strided_slice %3 {offsets = [0, 36, 0], sizes = [8, 1, 16], strides = [1, 1, 1]} : vector<8x49x16xf32> to vector<8x1x16xf32>
    %222 = vector.shape_cast %221 : vector<8x1x16xf32> to vector<8x16xf32>
    %223 = arith.addf %220, %222 : vector<8x16xf32>
    %224 = vector.extract_strided_slice %3 {offsets = [0, 37, 0], sizes = [8, 1, 16], strides = [1, 1, 1]} : vector<8x49x16xf32> to vector<8x1x16xf32>
    %225 = vector.shape_cast %224 : vector<8x1x16xf32> to vector<8x16xf32>
    %226 = arith.addf %223, %225 : vector<8x16xf32>
    %227 = vector.extract_strided_slice %3 {offsets = [0, 38, 0], sizes = [8, 1, 16], strides = [1, 1, 1]} : vector<8x49x16xf32> to vector<8x1x16xf32>
    %228 = vector.shape_cast %227 : vector<8x1x16xf32> to vector<8x16xf32>
    %229 = arith.addf %226, %228 : vector<8x16xf32>
    %230 = vector.extract_strided_slice %3 {offsets = [0, 39, 0], sizes = [8, 1, 16], strides = [1, 1, 1]} : vector<8x49x16xf32> to vector<8x1x16xf32>
    %231 = vector.shape_cast %230 : vector<8x1x16xf32> to vector<8x16xf32>
    %232 = arith.addf %229, %231 : vector<8x16xf32>
    %233 = vector.extract_strided_slice %3 {offsets = [0, 42, 0], sizes = [8, 1, 16], strides = [1, 1, 1]} : vector<8x49x16xf32> to vector<8x1x16xf32>
    %234 = vector.shape_cast %233 : vector<8x1x16xf32> to vector<8x16xf32>
    %235 = arith.addf %232, %234 : vector<8x16xf32>
    %236 = vector.extract_strided_slice %3 {offsets = [0, 43, 0], sizes = [8, 1, 16], strides = [1, 1, 1]} : vector<8x49x16xf32> to vector<8x1x16xf32>
    %237 = vector.shape_cast %236 : vector<8x1x16xf32> to vector<8x16xf32>
    %238 = arith.addf %235, %237 : vector<8x16xf32>
    %239 = vector.extract_strided_slice %3 {offsets = [0, 44, 0], sizes = [8, 1, 16], strides = [1, 1, 1]} : vector<8x49x16xf32> to vector<8x1x16xf32>
    %240 = vector.shape_cast %239 : vector<8x1x16xf32> to vector<8x16xf32>
    %241 = arith.addf %238, %240 : vector<8x16xf32>
    %242 = vector.extract_strided_slice %3 {offsets = [0, 45, 0], sizes = [8, 1, 16], strides = [1, 1, 1]} : vector<8x49x16xf32> to vector<8x1x16xf32>
    %243 = vector.shape_cast %242 : vector<8x1x16xf32> to vector<8x16xf32>
    %244 = arith.addf %241, %243 : vector<8x16xf32>
    %245 = vector.extract_strided_slice %3 {offsets = [0, 46, 0], sizes = [8, 1, 16], strides = [1, 1, 1]} : vector<8x49x16xf32> to vector<8x1x16xf32>
    %246 = vector.shape_cast %245 : vector<8x1x16xf32> to vector<8x16xf32>
    %247 = arith.addf %244, %246 : vector<8x16xf32>
    %cst_15 = arith.constant 4.000000e-02 : f32
    %248 = vector.broadcast %cst_15 : f32 to vector<8x16xf32>
    %249 = arith.mulf %247, %248 : vector<8x16xf32>
    %250 = arith.truncf %249 : vector<8x16xf32> to vector<8x16xbf16>
    %cst_16 = arith.constant dense<0.000000e+00> : vector<8x128xf32>
    %251 = tpu.matmul %250, %4, %cst_16 {dimension_numbers = #tpu.dot_dimension_numbers<[1], [0], [0], [1], [0, 0, 1, 1], [], []>} : vector<8x16xbf16>, vector<16x128xbf16>, vector<8x128xf32> -> vector<8x128xf32>
    %252 = vector.broadcast %5 : vector<1x128xf32> to vector<8x128xf32>
    %253 = arith.addf %251, %252 : vector<8x128xf32>
    %cst_17 = arith.constant 0.000000e+00 : f32
    %254 = vector.broadcast %cst_17 : f32 to vector<8x128xf32>
    %255 = arith.maximumf %253, %254 : vector<8x128xf32>
    %256 = arith.truncf %255 : vector<8x128xf32> to vector<8x128xbf16>
    %c0_18 = arith.constant 0 : index
    %c256 = arith.constant 256 : index
    %257 = vector.load %arg8[%c0_18, %c256] : memref<8x512xbf16, #tpu.memory_space<vmem>>, vector<8x128xbf16>
    tpu.vector_store %arg8[%c0_18, %c256], %256 {strides = array<i32>} : memref<8x512xbf16, #tpu.memory_space<vmem>>, vector<8x128xbf16>,
    %258 = vector.extract_strided_slice %3 {offsets = [0, 16, 0], sizes = [8, 1, 16], strides = [1, 1, 1]} : vector<8x49x16xf32> to vector<8x1x16xf32>
    %259 = vector.shape_cast %258 : vector<8x1x16xf32> to vector<8x16xf32>
    %260 = vector.extract_strided_slice %3 {offsets = [0, 17, 0], sizes = [8, 1, 16], strides = [1, 1, 1]} : vector<8x49x16xf32> to vector<8x1x16xf32>
    %261 = vector.shape_cast %260 : vector<8x1x16xf32> to vector<8x16xf32>
    %262 = arith.addf %259, %261 : vector<8x16xf32>
    %263 = vector.extract_strided_slice %3 {offsets = [0, 18, 0], sizes = [8, 1, 16], strides = [1, 1, 1]} : vector<8x49x16xf32> to vector<8x1x16xf32>
    %264 = vector.shape_cast %263 : vector<8x1x16xf32> to vector<8x16xf32>
    %265 = arith.addf %262, %264 : vector<8x16xf32>
    %266 = vector.extract_strided_slice %3 {offsets = [0, 19, 0], sizes = [8, 1, 16], strides = [1, 1, 1]} : vector<8x49x16xf32> to vector<8x1x16xf32>
    %267 = vector.shape_cast %266 : vector<8x1x16xf32> to vector<8x16xf32>
    %268 = arith.addf %265, %267 : vector<8x16xf32>
    %269 = vector.extract_strided_slice %3 {offsets = [0, 20, 0], sizes = [8, 1, 16], strides = [1, 1, 1]} : vector<8x49x16xf32> to vector<8x1x16xf32>
    %270 = vector.shape_cast %269 : vector<8x1x16xf32> to vector<8x16xf32>
    %271 = arith.addf %268, %270 : vector<8x16xf32>
    %272 = vector.extract_strided_slice %3 {offsets = [0, 23, 0], sizes = [8, 1, 16], strides = [1, 1, 1]} : vector<8x49x16xf32> to vector<8x1x16xf32>
    %273 = vector.shape_cast %272 : vector<8x1x16xf32> to vector<8x16xf32>
    %274 = arith.addf %271, %273 : vector<8x16xf32>
    %275 = vector.extract_strided_slice %3 {offsets = [0, 24, 0], sizes = [8, 1, 16], strides = [1, 1, 1]} : vector<8x49x16xf32> to vector<8x1x16xf32>
    %276 = vector.shape_cast %275 : vector<8x1x16xf32> to vector<8x16xf32>
    %277 = arith.addf %274, %276 : vector<8x16xf32>
    %278 = vector.extract_strided_slice %3 {offsets = [0, 25, 0], sizes = [8, 1, 16], strides = [1, 1, 1]} : vector<8x49x16xf32> to vector<8x1x16xf32>
    %279 = vector.shape_cast %278 : vector<8x1x16xf32> to vector<8x16xf32>
    %280 = arith.addf %277, %279 : vector<8x16xf32>
    %281 = vector.extract_strided_slice %3 {offsets = [0, 26, 0], sizes = [8, 1, 16], strides = [1, 1, 1]} : vector<8x49x16xf32> to vector<8x1x16xf32>
    %282 = vector.shape_cast %281 : vector<8x1x16xf32> to vector<8x16xf32>
    %283 = arith.addf %280, %282 : vector<8x16xf32>
    %284 = vector.extract_strided_slice %3 {offsets = [0, 27, 0], sizes = [8, 1, 16], strides = [1, 1, 1]} : vector<8x49x16xf32> to vector<8x1x16xf32>
    %285 = vector.shape_cast %284 : vector<8x1x16xf32> to vector<8x16xf32>
    %286 = arith.addf %283, %285 : vector<8x16xf32>
    %287 = vector.extract_strided_slice %3 {offsets = [0, 30, 0], sizes = [8, 1, 16], strides = [1, 1, 1]} : vector<8x49x16xf32> to vector<8x1x16xf32>
    %288 = vector.shape_cast %287 : vector<8x1x16xf32> to vector<8x16xf32>
    %289 = arith.addf %286, %288 : vector<8x16xf32>
    %290 = vector.extract_strided_slice %3 {offsets = [0, 31, 0], sizes = [8, 1, 16], strides = [1, 1, 1]} : vector<8x49x16xf32> to vector<8x1x16xf32>
    %291 = vector.shape_cast %290 : vector<8x1x16xf32> to vector<8x16xf32>
    %292 = arith.addf %289, %291 : vector<8x16xf32>
    %293 = vector.extract_strided_slice %3 {offsets = [0, 32, 0], sizes = [8, 1, 16], strides = [1, 1, 1]} : vector<8x49x16xf32> to vector<8x1x16xf32>
    %294 = vector.shape_cast %293 : vector<8x1x16xf32> to vector<8x16xf32>
    %295 = arith.addf %292, %294 : vector<8x16xf32>
    %296 = vector.extract_strided_slice %3 {offsets = [0, 33, 0], sizes = [8, 1, 16], strides = [1, 1, 1]} : vector<8x49x16xf32> to vector<8x1x16xf32>
    %297 = vector.shape_cast %296 : vector<8x1x16xf32> to vector<8x16xf32>
    %298 = arith.addf %295, %297 : vector<8x16xf32>
    %299 = vector.extract_strided_slice %3 {offsets = [0, 34, 0], sizes = [8, 1, 16], strides = [1, 1, 1]} : vector<8x49x16xf32> to vector<8x1x16xf32>
    %300 = vector.shape_cast %299 : vector<8x1x16xf32> to vector<8x16xf32>
    %301 = arith.addf %298, %300 : vector<8x16xf32>
    %302 = vector.extract_strided_slice %3 {offsets = [0, 37, 0], sizes = [8, 1, 16], strides = [1, 1, 1]} : vector<8x49x16xf32> to vector<8x1x16xf32>
    %303 = vector.shape_cast %302 : vector<8x1x16xf32> to vector<8x16xf32>
    %304 = arith.addf %301, %303 : vector<8x16xf32>
    %305 = vector.extract_strided_slice %3 {offsets = [0, 38, 0], sizes = [8, 1, 16], strides = [1, 1, 1]} : vector<8x49x16xf32> to vector<8x1x16xf32>
    %306 = vector.shape_cast %305 : vector<8x1x16xf32> to vector<8x16xf32>
    %307 = arith.addf %304, %306 : vector<8x16xf32>
    %308 = vector.extract_strided_slice %3 {offsets = [0, 39, 0], sizes = [8, 1, 16], strides = [1, 1, 1]} : vector<8x49x16xf32> to vector<8x1x16xf32>
    %309 = vector.shape_cast %308 : vector<8x1x16xf32> to vector<8x16xf32>
    %310 = arith.addf %307, %309 : vector<8x16xf32>
    %311 = vector.extract_strided_slice %3 {offsets = [0, 40, 0], sizes = [8, 1, 16], strides = [1, 1, 1]} : vector<8x49x16xf32> to vector<8x1x16xf32>
    %312 = vector.shape_cast %311 : vector<8x1x16xf32> to vector<8x16xf32>
    %313 = arith.addf %310, %312 : vector<8x16xf32>
    %314 = vector.extract_strided_slice %3 {offsets = [0, 41, 0], sizes = [8, 1, 16], strides = [1, 1, 1]} : vector<8x49x16xf32> to vector<8x1x16xf32>
    %315 = vector.shape_cast %314 : vector<8x1x16xf32> to vector<8x16xf32>
    %316 = arith.addf %313, %315 : vector<8x16xf32>
    %317 = vector.extract_strided_slice %3 {offsets = [0, 44, 0], sizes = [8, 1, 16], strides = [1, 1, 1]} : vector<8x49x16xf32> to vector<8x1x16xf32>
    %318 = vector.shape_cast %317 : vector<8x1x16xf32> to vector<8x16xf32>
    %319 = arith.addf %316, %318 : vector<8x16xf32>
    %320 = vector.extract_strided_slice %3 {offsets = [0, 45, 0], sizes = [8, 1, 16], strides = [1, 1, 1]} : vector<8x49x16xf32> to vector<8x1x16xf32>
    %321 = vector.shape_cast %320 : vector<8x1x16xf32> to vector<8x16xf32>
    %322 = arith.addf %319, %321 : vector<8x16xf32>
    %323 = vector.extract_strided_slice %3 {offsets = [0, 46, 0], sizes = [8, 1, 16], strides = [1, 1, 1]} : vector<8x49x16xf32> to vector<8x1x16xf32>
    %324 = vector.shape_cast %323 : vector<8x1x16xf32> to vector<8x16xf32>
    %325 = arith.addf %322, %324 : vector<8x16xf32>
    %326 = vector.extract_strided_slice %3 {offsets = [0, 47, 0], sizes = [8, 1, 16], strides = [1, 1, 1]} : vector<8x49x16xf32> to vector<8x1x16xf32>
    %327 = vector.shape_cast %326 : vector<8x1x16xf32> to vector<8x16xf32>
    %328 = arith.addf %325, %327 : vector<8x16xf32>
    %329 = vector.extract_strided_slice %3 {offsets = [0, 48, 0], sizes = [8, 1, 16], strides = [1, 1, 1]} : vector<8x49x16xf32> to vector<8x1x16xf32>
    %330 = vector.shape_cast %329 : vector<8x1x16xf32> to vector<8x16xf32>
    %331 = arith.addf %328, %330 : vector<8x16xf32>
    %cst_19 = arith.constant 4.000000e-02 : f32
    %332 = vector.broadcast %cst_19 : f32 to vector<8x16xf32>
    %333 = arith.mulf %331, %332 : vector<8x16xf32>
    %334 = arith.truncf %333 : vector<8x16xf32> to vector<8x16xbf16>
    %cst_20 = arith.constant dense<0.000000e+00> : vector<8x128xf32>
    %335 = tpu.matmul %334, %4, %cst_20 {dimension_numbers = #tpu.dot_dimension_numbers<[1], [0], [0], [1], [0, 0, 1, 1], [], []>} : vector<8x16xbf16>, vector<16x128xbf16>, vector<8x128xf32> -> vector<8x128xf32>
    %336 = vector.broadcast %5 : vector<1x128xf32> to vector<8x128xf32>
    %337 = arith.addf %335, %336 : vector<8x128xf32>
    %cst_21 = arith.constant 0.000000e+00 : f32
    %338 = vector.broadcast %cst_21 : f32 to vector<8x128xf32>
    %339 = arith.maximumf %337, %338 : vector<8x128xf32>
    %340 = arith.truncf %339 : vector<8x128xf32> to vector<8x128xbf16>
    %c0_22 = arith.constant 0 : index
    %c384 = arith.constant 384 : index
    %341 = vector.load %arg8[%c0_22, %c384] : memref<8x512xbf16, #tpu.memory_space<vmem>>, vector<8x128xbf16>
    tpu.vector_store %arg8[%c0_22, %c384], %340 {strides = array<i32>} : memref<8x512xbf16, #tpu.memory_space<vmem>>, vector<8x128xbf16>,
    %c0_23 = arith.constant 0 : index
    %c0_24 = arith.constant 0 : index
    %342 = vector.load %arg8[%c0_23, %c0_24] : memref<8x512xbf16, #tpu.memory_space<vmem>>, vector<8x512xbf16>
    %c0_25 = arith.constant 0 : index
    %c0_26 = arith.constant 0 : index
    %343 = vector.load %arg4[%c0_25, %c0_26] : memref<512x768xbf16, #tpu.memory_space<vmem>>, vector<512x768xbf16>
    %cst_27 = arith.constant dense<0.000000e+00> : vector<8x768xf32>
    %344 = tpu.matmul %342, %343, %cst_27 {dimension_numbers = #tpu.dot_dimension_numbers<[1], [0], [0], [1], [0, 0, 1, 1], [], []>} : vector<8x512xbf16>, vector<512x768xbf16>, vector<8x768xf32> -> vector<8x768xf32>
    %cst_28 = arith.constant 0.000000e+00 : f32
    %345 = vector.broadcast %cst_28 : f32 to vector<8x768xf32>
    %346 = arith.maximumf %344, %345 : vector<8x768xf32>
    %347 = arith.truncf %346 : vector<8x768xf32> to vector<8x768xbf16>
    %c0_29 = arith.constant 0 : index
    %c0_30 = arith.constant 0 : index
    %348 = vector.load %arg5[%c0_29, %c0_30] : memref<768x128xbf16, #tpu.memory_space<vmem>>, vector<768x128xbf16>
    %cst_31 = arith.constant dense<0.000000e+00> : vector<8x128xf32>
    %349 = tpu.matmul %347, %348, %cst_31 {dimension_numbers = #tpu.dot_dimension_numbers<[1], [0], [0], [1], [0, 0, 1, 1], [], []>} : vector<8x768xbf16>, vector<768x128xbf16>, vector<8x128xf32> -> vector<8x128xf32>
    %c0_32 = arith.constant 0 : index
    %c0_33 = arith.constant 0 : index
    %350 = vector.load %arg6[%c0_32, %c0_33] : memref<1x128xf32, #tpu.memory_space<vmem>>, vector<1x128xf32>
    %351 = vector.broadcast %350 : vector<1x128xf32> to vector<8x128xf32>
    %352 = arith.addf %349, %351 : vector<8x128xf32>
    %c0_34 = arith.constant 0 : index
    %c0_35 = arith.constant 0 : index
    %353 = vector.load %arg7[%c0_34, %c0_35] : memref<8x128xf32, #tpu.memory_space<vmem>>, vector<8x128xf32>
    tpu.vector_store %arg7[%c0_34, %c0_35], %352 {strides = array<i32>} : memref<8x128xf32, #tpu.memory_space<vmem>>, vector<8x128xf32>,
    return
  }
  func.func @transform_0(%arg0: i32) -> (i32, i32, i32) {
    %c0_i32 = arith.constant 0 : i32
    %c0_i32_0 = arith.constant 0 : i32
    %c0_i32_1 = arith.constant 0 : i32
    return %arg0, %c0_i32, %c0_i32_0 : i32, i32, i32
  }
  func.func @transform_1(%arg0: i32) -> (i32, i32) {
    %c0_i32 = arith.constant 0 : i32
    %c0_i32_0 = arith.constant 0 : i32
    %c0_i32_1 = arith.constant 0 : i32
    return %c0_i32, %c0_i32_0 : i32, i32
  }
  func.func @transform_2(%arg0: i32) -> (i32, i32) {
    %c0_i32 = arith.constant 0 : i32
    %c0_i32_0 = arith.constant 0 : i32
    %c0_i32_1 = arith.constant 0 : i32
    return %c0_i32, %c0_i32_0 : i32, i32
  }
  func.func @transform_3(%arg0: i32) -> (i32, i32) {
    %c0_i32 = arith.constant 0 : i32
    %c0_i32_0 = arith.constant 0 : i32
    %c0_i32_1 = arith.constant 0 : i32
    return %c0_i32, %c0_i32_0 : i32, i32
  }
  func.func @transform_4(%arg0: i32) -> (i32, i32) {
    %c0_i32 = arith.constant 0 : i32
    %c0_i32_0 = arith.constant 0 : i32
    %c0_i32_1 = arith.constant 0 : i32
    return %c0_i32, %c0_i32_0 : i32, i32
  }
  func.func @transform_5(%arg0: i32) -> (i32, i32) {
    %c0_i32 = arith.constant 0 : i32
    %c0_i32_0 = arith.constant 0 : i32
    %c0_i32_1 = arith.constant 0 : i32
    return %c0_i32, %c0_i32_0 : i32, i32
  }
  func.func @transform_6(%arg0: i32) -> (i32, i32) {
    %c0_i32 = arith.constant 0 : i32
    %c0_i32_0 = arith.constant 0 : i32
    return %arg0, %c0_i32 : i32, i32
  }
}

</mosaic_0001>

<bundles_post_ra>
// kernel: tpu_custom_call.1
= control target key start
LH: loop header
LB: loop body
LE: loop exit
PB: predicated region body
PF: predicated region fallthrough
CT: control target
= control target key end

     0   :  { %11 = vsyncpa [#allocation4], 0  ;;  %s7282_s0 = inlined_call_operand.vmem [shape: bf16[32,49,16], index: 0, kind: input, shape index: {}]   ;;  %s7283_s1 = inlined_call_operand.vmem [shape: bf16[16,128], index: 1, kind: input, shape index: {}]   ;;  %s7284_s2 = inlined_call_operand.vmem [shape: f32[1,128], index: 2, kind: input, shape index: {}]   ;;  %s7285_s3 = inlined_call_operand.hbm [shape: bf16[512,768], index: 3, kind: input, shape index: {}]   ;;  %s7286_s4 = inlined_call_operand.vmem [shape: bf16[768,128], index: 4, kind: input, shape index: {}]   ;;  %s7287_s5 = inlined_call_operand.vmem [shape: f32[1,128], index: 5, kind: input, shape index: {}]   ;;  %s7288_s6 = inlined_call_operand.hbm [shape: f32[32,128], index: 6, kind: output, shape index: {}]  }
   0x1   :  { %12 = vsyncpa [#allocation5], 0 }
   0x2   :  { %14 = vsyncpa [#allocation5 + $0x1], 0  ;;  %s5181_s21 = smov 0   ;;  %s5183_s22 = smov 0  }
   0x3   :  { %s5185_s23 = smov 0   ;;  %s5187_s24 = smov 0  }
   0x4 LB: > { %s5202_s25 = sadd.s32 4294967295, %s5138_s24   ;;  %s4185_s26 = sadd.s32 4294967294, %s5138_s24   ;;  %s5138_s24 = sphi %s5187_s24, %s7888_s24   ;;  %s5134_s23 = sphi %s5185_s23, %s7887_s23   ;;  %s5130_s22 = sphi %s5183_s22, %s7886_s22   ;;  %s5126_s21 = sphi %s5181_s21, %s7885_s21  }
   0x5   : > { %s5206_s27 = sadd.s32 1, %s5138_s24   ;;  %s158_s28 = sadd.s32 1, %s5134_s23 }
   0x6   : > { %s155_s29 = ssub.s32 %s5138_s24, %s5206_s27  ;;  %p168_p0 = scmp.ne.s32.totalorder %s5134_s23, %s5130_s22 }
   0x7   : > { %p156_p1 = scmp.eq.s32.totalorder %s155_s29, 0  ;;  %p169_p2 = scmp.eq.s32.totalorder %s5202_s25, 3 }
   0x8   : > { %p174_p3 = scmp.ne.s32.totalorder %s5130_s22, %s5126_s21  ;;  %p175_p4 = scmp.eq.s32.totalorder %s4185_s26, 3 }
   0x9   : > { %s5217_s30 = scalar_select %p156_p1, %s5134_s23, %s158_s28  }
   0xa   : > { %p5219_p5 = por %p169_p2, %p168_p0  ;;  %p5223_p6 = por %p175_p4, %p174_p3 }
   0xb   : > { %p4186_p7 = scmp.ge.s32.totalorder %s5138_s24, 1  ;;  %p182_p8 = scmp.lt.s32.totalorder %s5138_s24, 5 }
   0xc   : > { %s7535_s8 = scalar_select %p5223_p6, 1, 0 }
   0xd   : > { %p4661_p9 = scmp.eq.s32.totalorder %s5202_s25, 0  ;;  %p5230_p10 = pnand %p4186_p7, %p182_p8 }
   0xe   : > { %s5140_s10 = smov [#allocation3]  }
   0xf   : > { %s200_s11 = sshll.u32 %s5140_s10, 4  ;;  %p4653_p11 = pneg %p5230_p10  ;;  %s201_s11 = int_to_ptr.vmem [resolvable:$true] %s200_s11 }
  0x10   : > { %s5059_s12 = scalar_lea.vmem %s201_s11, 24576  ;;  %p5067_p3 = scmp.lt.s32.totalorder %s201_s11, %s201_s11 }
  0x11   : > { %p4654_p12 = pnand %p4661_p9, %p4653_p11  ;;  %p5060_p0 = scmp.ne.s32.totalorder %s201_s11, %s5059_s12 }
  0x12   : > { %p5068_p4 = scmp.lt.s32.totalorder %s5059_s12, %s5059_s12 }
  0x13   : > { %p5050_p13 = pneg %p4654_p12 }
  0x14   : > { %p5069_p6 = por %p5068_p4, %p5067_p3 }
  0x15   : > { %p5062_p1 = pnand %p5060_p0, %p5050_p13 }
  0x17   : > { %p5063_p2 = pneg %p5062_p1 }
  0x19   : > { %p5070_p7 = pnand %p5069_p6, %p5063_p2 }
  0x1b   : > { %5073 = shalt.err (!%p5070_p7)
}
  0x1c   : > { %s5141_s13 = smov 384   ;;  %s5142_s14 = smov 24  }
  0x1d   : > { %4656 = dma.hbm_to_vmem [thread:$0]  (!%p4654_p12), %s7285_s3, 24576, %s201_s11, [#allocation4], %s5141_s13, %s5141_s13, %s5142_s14  }
  0x1e   : > { %232 = sbr.rel (%p5230_p10) target bundleno = 1154 (0x482), region = 44 }
  0x23   : > { %5117 = dma.done.wait (%p4661_p9), [#allocation4], 24576  }
  0x24   : > { %5119 = vsyncadd (%p4661_p9), [#allocation4], 4294942720  ;;  %s4192_s17 = sshll.u32 %s5202_s25, 3  ;;  %v7289_v0 = vmov 0.0   ;;  %vm5144_vm0 = vmmov 0   ;;  %v4701_v1 = vld [vmem:[%s7283_s1] sm:$0xff]  }
  0x25   : > { %4622 = vmatprep.subr.bf16.mxu1 %v7289_v0  ;;  %4624 = vmatprep.mubr.msk.bf16.mxu1 %vm5144_vm0, %v7289_v0  ;;  %p264_p6 = scmp.lt.s32.totalorder %s4192_s17, 31  ;;  %vm1025_vm1 = vcmask 1041409   ;;  %vm1028_vm2 = vcmask 1042434   ;;  %vm1031_vm3 = vcmask 1043459   ;;  %vm1034_vm4 = vcmask 1044484   ;;  %s4446_s10 = sshll.u32 %s5202_s25, 7 }
  0x26   : > { %4623 = vmatpush3.bf16.msra.mxu1 %v4701_v1  ;;  %vm1037_vm5 = vcmask 1045509   ;;  %vm1040_vm6 = vcmask 1046534   ;;  %vm1043_vm7 = vcmask 1047559   ;;  %vm1052_vm8 = vcmask 130048   ;;  %s7247_s15 = scalar_lea.hbm %s7288_s6, %s4446_s10  ;;  %s5145_s25 = smov [#allocation6]  }
  0x27   : > { %s7890_s17 = smov (!%p264_p6, %s4192_s17), 31  ;;  %4628 = vmatprep.subr.bf16.mxu1 %v7289_v0 }
  0x28   : > { %s4646_s18 = smul.u32 28, %s7890_s17 }
  0x2a   : > { %s5257_s29 = scalar_lea.vmem %s7282_s0, %s4646_s18  ;;  %s5078_s18 = sshll.u32 %s5145_s25, 4  ;;  %s5079_s18 = int_to_ptr.vmem [resolvable:$false] %s5078_s18 }
  0x2b   : > { %v5260_v2 = vld [vmem:[%s5257_s29] sm:$0xff]   ;;  %v5263_v3 = vld [vmem:[%s5257_s29 + $0x8] sm:$0xff]   ;;  %v5266_v4 = vld [vmem:[%s5257_s29 + $0x10] sm:$0xff]   ;;  %s5080_s19 = scalar_lea.vmem %s5079_s18, 256 }
  0x2c   : > { %v4451_v5 = vunpack.c.l.bf16 %v5260_v2  ;;  %v4452_v6 = vunpack.c.h.bf16 %v5260_v2  ;;  %v4455_v7 = vunpack.c.l.bf16 %v5263_v3  ;;  %v4456_v8 = vunpack.c.h.bf16 %v5263_v3  ;;  %v5273_v9 = vld [vmem:[%s5257_s29 + $0x20] sm:$0xff]   ;;  %v5276_v10 = vld [vmem:[%s5257_s29 + $0x28] sm:$0xff]   ;;  %v4533_v15 = vld [vmem:[%s5257_s29 + $0x38] sm:$0xff]  }
  0x2d   : > { %v4459_v11 = vunpack.c.l.bf16 %v5266_v4  ;;  %v4463_v12 = vunpack.c.l.bf16 %v5273_v9  ;;  %v4464_v13 = vunpack.c.h.bf16 %v5273_v9  ;;  %v4467_v14 = vunpack.c.l.bf16 %v5276_v10  ;;  %v4534_v16 = vld [vmem:[%s5257_s29 + $0x40] sm:$0xff]   ;;  %v4535_v17 = vld [vmem:[%s5257_s29 + $0x48] sm:$0xff]   ;;  %v4536_v22 = vld [vmem:[%s5257_s29 + $0x58] sm:$0xff]  }
  0x2e   : > { %v4468_v18 = vunpack.c.h.bf16 %v5276_v10  ;;  %v4471_v19 = vunpack.c.l.bf16 %v4533_v15  ;;  %v4472_v20 = vunpack.c.h.bf16 %v4533_v15  ;;  %v4475_v21 = vunpack.c.l.bf16 %v4534_v16  ;;  %v4537_v23 = vld [vmem:[%s5257_s29 + $0x60] sm:$0xff]   ;;  %v4538_v24 = vld [vmem:[%s5257_s29 + $0x70] sm:$0xff]   ;;  %v4539_v29 = vld [vmem:[%s5257_s29 + $0x78] sm:$0xff]  }
  0x2f   : > { %v4476_v25 = vunpack.c.h.bf16 %v4534_v16  ;;  %v4479_v26 = vunpack.c.l.bf16 %v4535_v17  ;;  %v4483_v27 = vunpack.c.l.bf16 %v4536_v22  ;;  %v4484_v28 = vunpack.c.h.bf16 %v4536_v22  ;;  %v4540_v30 = vld [vmem:[%s5257_s29 + $0x80] sm:$0xff]   ;;  %v278_v31 = vld [vmem:[%s5257_s29 + $0x1c] ss:$56 sps:$4 sm:$0xff]   ;;  %v4543_v39 = vld [vmem:[%s5257_s29 + $0xa8] sm:$0xff]  }
  0x30   : > { %v4487_v32 = vunpack.c.l.bf16 %v4537_v23  ;;  %v4488_v33 = vunpack.c.h.bf16 %v4537_v23  ;;  %v4491_v34 = vunpack.c.l.bf16 %v4538_v24  ;;  %v4492_v35 = vunpack.c.h.bf16 %v4538_v24  ;;  %v5294_v36 = vld [vmem:[%s5257_s29 + $0x8c] ss:$56 sps:$4 sm:$0xff]   ;;  %v4541_v37 = vld [vmem:[%s5257_s29 + $0x90] sm:$0xff]   ;;  %v4542_v38 = vld [vmem:[%s5257_s29 + $0x98] sm:$0xff]  }
  0x31   : > { %v4495_v40 = vunpack.c.l.bf16 %v4539_v29  ;;  %v4496_v41 = vunpack.c.h.bf16 %v4539_v29  ;;  %v4499_v42 = vunpack.c.l.bf16 %v4540_v30  ;;  %v4503_v43 = vunpack.c.l.bf16 %v4541_v37  ;;  %v4544_v44 = vld [vmem:[%s5257_s29 + $0xb0] sm:$0xff]   ;;  %v4545_v45 = vld [vmem:[%s5257_s29 + $0xb8] sm:$0xff]   ;;  %v4546_v46 = vld [vmem:[%s5257_s29 + $0xc8] sm:$0xff]  }
  0x32   : > { %v4504_v47 = vunpack.c.h.bf16 %v4541_v37  ;;  %v4507_v48 = vunpack.c.l.bf16 %v4542_v38  ;;  %v4508_v49 = vunpack.c.h.bf16 %v4542_v38  ;;  %v4511_v50 = vunpack.c.l.bf16 %v4543_v39  ;;  %v4547_v51 = vld [vmem:[%s5257_s29 + $0xd0] sm:$0xff]  }
  0x33   : > { %v4512_v52 = vunpack.c.h.bf16 %v4543_v39  ;;  %v4515_v53 = vunpack.c.l.bf16 %v4544_v44  ;;  %v4516_v54 = vunpack.c.h.bf16 %v4544_v44  ;;  %v4519_v55 = vunpack.c.l.bf16 %v4545_v45 }
  0x34   : > { %v4523_v56 = vunpack.c.l.bf16 %v4546_v46  ;;  %v4524_v57 = vunpack.c.h.bf16 %v4546_v46  ;;  %v4527_v58 = vunpack.c.l.bf16 %v4547_v51  ;;  %v4528_v59 = vunpack.c.h.bf16 %v4547_v51 }
  0x35   : > { %v334_v60 = vunpack.c.l.bf16 %v278_v31  ;;  %v348_v61 = vunpack.c.h.bf16 %v278_v31  ;;  %v362_v62 = vunpack.c.l.bf16 %v5294_v36  ;;  %v376_v63 = vunpack.c.h.bf16 %v5294_v36 }
  0x36   : > { %v5305_v1 = vmax.f32 %v4451_v5, 0.0  ;;  %v5307_v2 = vmax.f32 %v4452_v6, 0.0  ;;  %v5309_v3 = vmax.f32 %v4455_v7, 0.0  ;;  %v5311_v4 = vmax.f32 %v4456_v8, 0.0 }
  0x37   : > { %v5313_v9 = vmax.f32 %v4459_v11, 0.0  ;;  %v5315_v10 = vmax.f32 %v334_v60, 0.0  ;;  %v5317_v15 = vmax.f32 %v4463_v12, 0.0  ;;  %v5319_v16 = vmax.f32 %v4464_v13, 0.0 }
  0x38   : > { %7537 = vst [vmem:[#allocation9_spill] sm:$0xff] %v5311_v4  ;;  %v5321_v17 = vmax.f32 %v4467_v14, 0.0  ;;  %v5323_v22 = vmax.f32 %v4468_v18, 0.0  ;;  %v5325_v5 = vmax.f32 %v4471_v19, 0.0  ;;  %v5327_v6 = vmax.f32 %v4472_v20, 0.0 }
  0x39   : > { %7538 = vst [vmem:[#allocation10_spill] sm:$0xff] %v5313_v9  ;;  %v5329_v7 = vmax.f32 %v4475_v21, 0.0  ;;  %v5331_v8 = vmax.f32 %v4476_v25, 0.0  ;;  %v5333_v11 = vmax.f32 %v4479_v26, 0.0  ;;  %v5335_v23 = vmax.f32 %v348_v61, 0.0 }
  0x3a   : > { %7539 = vst [vmem:[#allocation11_spill] sm:$0xff] %v5321_v17  ;;  %7540 = vst [vmem:[#allocation12_spill] sm:$0xff] %v5323_v22  ;;  %v5337_v12 = vmax.f32 %v4483_v27, 0.0  ;;  %v5339_v13 = vmax.f32 %v4484_v28, 0.0  ;;  %v5341_v14 = vmax.f32 %v4487_v32, 0.0  ;;  %v5343_v18 = vmax.f32 %v4488_v33, 0.0 }
  0x3b   : > { %7541 = vst [vmem:[#allocation13_spill] sm:$0xff] %v5331_v8  ;;  %7542 = vst [vmem:[#allocation14_spill] sm:$0xff] %v5333_v11  ;;  %v5345_v19 = vmax.f32 %v4491_v34, 0.0  ;;  %v5347_v20 = vmax.f32 %v4492_v35, 0.0  ;;  %v5349_v21 = vmax.f32 %v4495_v40, 0.0  ;;  %v5351_v24 = vmax.f32 %v4496_v41, 0.0 }
  0x3c   : > { %7543 = vst [vmem:[#allocation15_spill] sm:$0xff] %v5341_v14  ;;  %7544 = vst [vmem:[#allocation16_spill] sm:$0xff] %v5343_v18  ;;  %v5353_v25 = vmax.f32 %v4499_v42, 0.0  ;;  %v5355_v26 = vmax.f32 %v362_v62, 0.0  ;;  %v5357_v27 = vmax.f32 %v4503_v43, 0.0  ;;  %v5359_v28 = vmax.f32 %v4504_v47, 0.0 }
  0x3d   : > { %7545 = vst [vmem:[#allocation17_spill] sm:$0xff] %v5351_v24  ;;  %v5361_v29 = vmax.f32 %v4507_v48, 0.0  ;;  %v5363_v30 = vmax.f32 %v4508_v49, 0.0  ;;  %v5365_v31 = vmax.f32 %v4511_v50, 0.0  ;;  %v5367_v32 = vmax.f32 %v4512_v52, 0.0 }
  0x3e   : > { %7546 = vst [vmem:[#allocation18_spill] sm:$0xff] %v5353_v25  ;;  %v5369_v33 = vmax.f32 %v4515_v53, 0.0  ;;  %v5371_v34 = vmax.f32 %v4516_v54, 0.0  ;;  %v5373_v35 = vmax.f32 %v4519_v55, 0.0  ;;  %v5375_v36 = vmax.f32 %v376_v63, 0.0 }
  0x3f   : > { %7547 = vst [vmem:[#allocation19_spill] sm:$0xff] %v5361_v29  ;;  %7548 = vst [vmem:[#allocation20_spill] sm:$0xff] %v5363_v30  ;;  %v5377_v37 = vmax.f32 %v4523_v56, 0.0  ;;  %v5379_v38 = vmax.f32 %v4524_v57, 0.0  ;;  %v5381_v39 = vmax.f32 %v4527_v58, 0.0  ;;  %v5383_v40 = vmax.f32 %v4528_v59, 0.0 }
  0x40   : > { %7549 = vst [vmem:[#allocation21_spill] sm:$0xff] %v5371_v34  ;;  %7550 = vst [vmem:[#allocation22_spill] sm:$0xff] %v5373_v35  ;;  %v450_v41 = vrot.slane %v5305_v1, 1  ;;  %v451_v42 = vrot.slane %v5315_v10, 1  ;;  %v452_v43 = vrot.slane %v5325_v5, 1  ;;  %v453_v44 = vrot.slane %v5335_v23, 1 }
  0x41   : > { %7551 = vst [vmem:[#allocation23_spill] sm:$0xff] %v5381_v39  ;;  %7552 = vst [vmem:[#allocation24_spill] sm:$0xff] %v5383_v40  ;;  %v454_v45 = vrot.slane %v5345_v19, 1  ;;  %v455_v46 = vrot.slane %v5355_v26, 1  ;;  %v456_v47 = vrot.slane %v5365_v31, 1  ;;  %v457_v48 = vrot.slane %v5375_v36, 1 }
  0x42   : > { %v466_v49 = vadd.f32 %v450_v41, %v5305_v1  ;;  %v467_v50 = vadd.f32 %v451_v42, %v5315_v10  ;;  %v468_v51 = vadd.f32 %v452_v43, %v5325_v5  ;;  %v469_v52 = vadd.f32 %v453_v44, %v5335_v23 }
  0x43   : > { %v470_v53 = vadd.f32 %v454_v45, %v5345_v19  ;;  %v471_v54 = vadd.f32 %v455_v46, %v5355_v26  ;;  %v472_v55 = vadd.f32 %v456_v47, %v5365_v31  ;;  %v473_v56 = vadd.f32 %v457_v48, %v5375_v36 }
  0x44   : > { %v474_v57 = vrot.slane %v5305_v1, 2  ;;  %v475_v58 = vrot.slane %v5315_v10, 2  ;;  %v476_v59 = vrot.slane %v5325_v5, 2  ;;  %v477_v60 = vrot.slane %v5335_v23, 2 }
  0x45   : > { %v478_v61 = vrot.slane %v5345_v19, 2  ;;  %v479_v62 = vrot.slane %v5355_v26, 2  ;;  %v480_v63 = vrot.slane %v5365_v31, 2  ;;  %v481_v41 = vrot.slane %v5375_v36, 2 }
  0x46   : > { %v490_v42 = vadd.f32 %v474_v57, %v466_v49  ;;  %v491_v43 = vadd.f32 %v475_v58, %v467_v50  ;;  %v492_v44 = vadd.f32 %v476_v59, %v468_v51  ;;  %v493_v45 = vadd.f32 %v477_v60, %v469_v52 }
  0x47   : > { %v494_v46 = vadd.f32 %v478_v61, %v470_v53  ;;  %v495_v47 = vadd.f32 %v479_v62, %v471_v54  ;;  %v496_v48 = vadd.f32 %v480_v63, %v472_v55  ;;  %v497_v0 = vadd.f32 %v481_v41, %v473_v56 }
  0x48   : > { %v498_v40 = vrot.slane %v5305_v1, 3  ;;  %v499_v35 = vrot.slane %v5315_v10, 3  ;;  %v500_v30 = vrot.slane %v5325_v5, 3  ;;  %v501_v25 = vrot.slane %v5335_v23, 3 }
  0x49   : > { %v502_v18 = vrot.slane %v5345_v19, 3  ;;  %v503_v11 = vrot.slane %v5355_v26, 3  ;;  %v504_v49 = vrot.slane %v5365_v31, 3  ;;  %v505_v50 = vrot.slane %v5375_v36, 3 }
  0x4a   : > { %v514_v51 = vadd.f32 %v498_v40, %v490_v42  ;;  %v515_v52 = vadd.f32 %v499_v35, %v491_v43  ;;  %v516_v53 = vadd.f32 %v500_v30, %v492_v44  ;;  %v517_v54 = vadd.f32 %v501_v25, %v493_v45 }
  0x4b   : > { %v518_v55 = vadd.f32 %v502_v18, %v494_v46  ;;  %v519_v56 = vadd.f32 %v503_v11, %v495_v47  ;;  %v520_v57 = vadd.f32 %v504_v49, %v496_v48  ;;  %v521_v58 = vadd.f32 %v505_v50, %v497_v0 }
  0x4c   : > { %v522_v59 = vrot.slane %v5305_v1, 4  ;;  %v523_v60 = vrot.slane %v5315_v10, 4  ;;  %v524_v61 = vrot.slane %v5325_v5, 4  ;;  %v525_v62 = vrot.slane %v5335_v23, 4 }
  0x4d   : > { %v526_v63 = vrot.slane %v5345_v19, 4  ;;  %v527_v41 = vrot.slane %v5355_v26, 4  ;;  %v528_v35 = vrot.slane %v5365_v31, 4  ;;  %v529_v25 = vrot.slane %v5375_v36, 4 }
  0x4e   : > { %v5425_v18 = vadd.f32 %v522_v59, %v514_v51  ;;  %v5427_v11 = vadd.f32 %v523_v60, %v515_v52  ;;  %v5429_v0 = vadd.f32 %v524_v61, %v516_v53  ;;  %v5431_v30 = vadd.f32 %v525_v62, %v517_v54 }
  0x4f   : > { %v5433_v40 = vadd.f32 %v526_v63, %v518_v55  ;;  %v5435_v42 = vadd.f32 %v527_v41, %v519_v56  ;;  %v5437_v43 = vadd.f32 %v528_v35, %v520_v57  ;;  %v5439_v44 = vadd.f32 %v529_v25, %v521_v58 }
  0x50   : > { %v546_v45 = vrot.slane %v5305_v1, 7  ;;  %v547_v46 = vrot.slane %v5315_v10, 7  ;;  %v548_v47 = vrot.slane %v5325_v5, 7  ;;  %v549_v48 = vrot.slane %v5335_v23, 7 }
  0x51   : > { %v550_v49 = vrot.slane %v5345_v19, 7  ;;  %v551_v50 = vrot.slane %v5355_v26, 7  ;;  %v552_v51 = vrot.slane %v5365_v31, 7  ;;  %v553_v52 = vrot.slane %v5375_v36, 7 }
  0x52   : > { %v562_v53 = vadd.f32 %v546_v45, %v5425_v18  ;;  %v563_v54 = vadd.f32 %v547_v46, %v5427_v11  ;;  %v564_v1 = vadd.f32 %v548_v47, %v5429_v0  ;;  %v565_v10 = vadd.f32 %v549_v48, %v5431_v30 }
  0x53   : > { %v566_v5 = vadd.f32 %v550_v49, %v5433_v40  ;;  %v567_v23 = vadd.f32 %v551_v50, %v5435_v42  ;;  %v568_v19 = vadd.f32 %v552_v51, %v5437_v43  ;;  %v569_v26 = vadd.f32 %v553_v52, %v5439_v44 }
  0x54   : > { %v570_v31 = vadd.f32 %v562_v53, %v5307_v2  ;;  %v571_v36 = vadd.f32 %v563_v54, %v5317_v15  ;;  %v572_v55 = vadd.f32 %v564_v1, %v5327_v6  ;;  %v573_v56 = vadd.f32 %v565_v10, %v5337_v12 }
  0x55   : > { %v574_v57 = vadd.f32 %v566_v5, %v5347_v20  ;;  %v575_v58 = vadd.f32 %v567_v23, %v5357_v27  ;;  %v576_v59 = vadd.f32 %v568_v19, %v5367_v32  ;;  %v577_v60 = vadd.f32 %v569_v26, %v5377_v37 }
  0x56   : > { %v5466_v61 = vrot.slane %v5307_v2, 1  ;;  %v5469_v62 = vrot.slane %v5317_v15, 1  ;;  %v5472_v63 = vrot.slane %v5327_v6, 1  ;;  %v5475_v41 = vrot.slane %v5337_v12, 1 }
  0x57   : > { %v5478_v35 = vrot.slane %v5347_v20, 1  ;;  %v5481_v25 = vrot.slane %v5357_v27, 1  ;;  %v5484_v45 = vrot.slane %v5367_v32, 1  ;;  %v5487_v46 = vrot.slane %v5377_v37, 1 }
  0x58   : > { %7553 = vst [vmem:[#allocation25_spill] sm:$0xff] %v5466_v61  ;;  %7554 = vst [vmem:[#allocation26_spill] sm:$0xff] %v5469_v62  ;;  %v602_v47 = vadd.f32 %v5466_v61, %v570_v31  ;;  %v603_v48 = vadd.f32 %v5469_v62, %v571_v36  ;;  %v604_v49 = vadd.f32 %v5472_v63, %v572_v55  ;;  %v7297_v1 = vrot.slane %v5307_v2, 2 }
  0x59   : > { %7555 = vst [vmem:[#allocation27_spill] sm:$0xff] %v5472_v63  ;;  %7556 = vst [vmem:[#allocation28_spill] sm:$0xff] %v5475_v41  ;;  %v605_v50 = vadd.f32 %v5475_v41, %v573_v56  ;;  %v606_v51 = vadd.f32 %v5478_v35, %v574_v57  ;;  %v607_v52 = vadd.f32 %v5481_v25, %v575_v58  ;;  %v7298_v10 = vrot.slane %v5317_v15, 2 }
  0x5a   : > { %7557 = vst [vmem:[#allocation29_spill] sm:$0xff] %v5478_v35  ;;  %7558 = vst [vmem:[#allocation30_spill] sm:$0xff] %v5481_v25  ;;  %v608_v53 = vadd.f32 %v5484_v45, %v576_v59  ;;  %v609_v54 = vadd.f32 %v5487_v46, %v577_v60  ;;  %v7303_v5 = vrot.slane %v5327_v6, 2  ;;  %v7299_v23 = vrot.slane %v5337_v12, 2 }
  0x5b   : > { %7559 = vst [vmem:[#allocation31_spill] sm:$0xff] %v5484_v45  ;;  %7560 = vst [vmem:[#allocation32_spill] sm:$0xff] %v5487_v46  ;;  %v7302_v19 = vrot.slane %v5347_v20, 2  ;;  %v7300_v26 = vrot.slane %v5357_v27, 2  ;;  %v7301_v31 = vrot.slane %v5367_v32, 2  ;;  %v626_v55 = vadd.f32 %v7297_v1, %v602_v47 }
  0x5c   : > { %v627_v56 = vadd.f32 %v7298_v10, %v603_v48  ;;  %v628_v57 = vadd.f32 %v7303_v5, %v604_v49  ;;  %v629_v58 = vadd.f32 %v7299_v23, %v605_v50  ;;  %v7561_v47 = vrot.slane %v5377_v37, 2 }
  0x5d   : > { %v630_v59 = vadd.f32 %v7302_v19, %v606_v51  ;;  %v631_v60 = vadd.f32 %v7300_v26, %v607_v52  ;;  %v632_v36 = vadd.f32 %v7301_v31, %v608_v53  ;;  %v7304_v48 = vrot.slane %v5307_v2, 3 }
  0x5e   : > { %v633_v1 = vadd.f32 %v7561_v47, %v609_v54  ;;  %v7305_v10 = vrot.slane %v5317_v15, 3  ;;  %v7310_v49 = vrot.slane %v5327_v6, 3  ;;  %v7306_v50 = vrot.slane %v5337_v12, 3 }
  0x5f   : > { %v7309_v23 = vrot.slane %v5347_v20, 3  ;;  %v7307_v51 = vrot.slane %v5357_v27, 3  ;;  %v7308_v52 = vrot.slane %v5367_v32, 3  ;;  %v650_v53 = vadd.f32 %v7304_v48, %v626_v55 }
  0x60   : > { %v651_v54 = vadd.f32 %v7305_v10, %v627_v56  ;;  %v652_v47 = vadd.f32 %v7310_v49, %v628_v57  ;;  %v653_v31 = vadd.f32 %v7306_v50, %v629_v58  ;;  %v7562_v55 = vrot.slane %v5377_v37, 3 }
  0x61   : > { %v654_v19 = vadd.f32 %v7309_v23, %v630_v59  ;;  %v655_v5 = vadd.f32 %v7307_v51, %v631_v60  ;;  %v656_v26 = vadd.f32 %v7308_v52, %v632_v36  ;;  %v658_v56 = vrot.slane %v5307_v2, 6 }
  0x62   : > { %v657_v48 = vadd.f32 %v7562_v55, %v633_v1  ;;  %v659_v10 = vrot.slane %v5317_v15, 6  ;;  %v660_v57 = vrot.slane %v5327_v6, 6  ;;  %v661_v58 = vrot.slane %v5337_v12, 6 }
  0x63   : > { %v662_v50 = vrot.slane %v5347_v20, 6  ;;  %v663_v59 = vrot.slane %v5357_v27, 6  ;;  %v664_v60 = vrot.slane %v5367_v32, 6  ;;  %v665_v51 = vrot.slane %v5377_v37, 6 }
  0x64   : > { %v674_v36 = vadd.f32 %v658_v56, %v650_v53  ;;  %v675_v52 = vadd.f32 %v659_v10, %v651_v54  ;;  %v676_v23 = vadd.f32 %v660_v57, %v652_v47  ;;  %v677_v1 = vadd.f32 %v661_v58, %v653_v31 }
  0x65   : > { %v678_v55 = vadd.f32 %v662_v50, %v654_v19  ;;  %v679_v49 = vadd.f32 %v663_v59, %v655_v5  ;;  %v680_v46 = vadd.f32 %v664_v60, %v656_v26  ;;  %v681_v45 = vadd.f32 %v665_v51, %v657_v48 }
  0x66   : > { %v7334_v25 = vrot.slane %v5307_v2, 7  ;;  %v7333_v35 = vrot.slane %v5317_v15, 7  ;;  %v7332_v41 = vrot.slane %v5327_v6, 7  ;;  %v7331_v63 = vrot.slane %v5337_v12, 7 }
  0x67   : > { %v7330_v62 = vrot.slane %v5347_v20, 7  ;;  %v7329_v61 = vrot.slane %v5357_v27, 7  ;;  %v7328_v10 = vrot.slane %v5367_v32, 7  ;;  %v7327_v31 = vrot.slane %v5377_v37, 7 }
  0x68   : > { %v698_v5 = vadd.f32 %v7334_v25, %v674_v36  ;;  %v699_v19 = vadd.f32 %v7333_v35, %v675_v52  ;;  %v700_v26 = vadd.f32 %v7332_v41, %v676_v23  ;;  %v701_v48 = vadd.f32 %v7331_v63, %v677_v1 }
  0x69   : > { %v702_v50 = vadd.f32 %v7330_v62, %v678_v55  ;;  %v703_v51 = vadd.f32 %v7329_v61, %v679_v49  ;;  %v704_v53 = vadd.f32 %v7328_v10, %v680_v46  ;;  %v705_v54 = vadd.f32 %v7327_v31, %v681_v45 }
  0x6a   : > { %v706_v52 = vadd.f32 %v698_v5, %v5309_v3  ;;  %v707_v47 = vadd.f32 %v699_v19, %v5319_v16  ;;  %v708_v23 = vadd.f32 %v700_v26, %v5329_v7  ;;  %v709_v56 = vadd.f32 %v701_v48, %v5339_v13 }
  0x6b   : > { %v710_v57 = vadd.f32 %v702_v50, %v5349_v21  ;;  %v711_v58 = vadd.f32 %v703_v51, %v5359_v28  ;;  %v712_v49 = vadd.f32 %v704_v53, %v5369_v33  ;;  %v713_v59 = vadd.f32 %v705_v54, %v5379_v38 }
  0x6c   : > { %v5586_v46 = vrot.slane %v5309_v3, 1  ;;  %v5589_v45 = vrot.slane %v5319_v16, 1  ;;  %v5592_v60 = vrot.slane %v5329_v7, 1  ;;  %v5595_v36 = vrot.slane %v5339_v13, 1 }
  0x6d   : > { %v5598_v1 = vrot.slane %v5349_v21, 1  ;;  %v5601_v55 = vrot.slane %v5359_v28, 1  ;;  %v5604_v5 = vrot.slane %v5369_v33, 1  ;;  %v5607_v19 = vrot.slane %v5379_v38, 1 }
  0x6e   : > { %7563 = vst [vmem:[#allocation33_spill] sm:$0xff] %v5586_v46  ;;  %7564 = vst [vmem:[#allocation34_spill] sm:$0xff] %v5589_v45  ;;  %v738_v26 = vadd.f32 %v5586_v46, %v706_v52  ;;  %v739_v48 = vadd.f32 %v5589_v45, %v707_v47  ;;  %v740_v50 = vadd.f32 %v5592_v60, %v708_v23  ;;  %v5618_v61 = vrot.slane %v5309_v3, 2 }
  0x6f   : > { %7565 = vst [vmem:[#allocation35_spill] sm:$0xff] %v5592_v60  ;;  %7566 = vst [vmem:[#allocation36_spill] sm:$0xff] %v5595_v36  ;;  %v741_v51 = vadd.f32 %v5595_v36, %v709_v56  ;;  %v742_v53 = vadd.f32 %v5598_v1, %v710_v57  ;;  %v743_v54 = vadd.f32 %v5601_v55, %v711_v58  ;;  %v5621_v62 = vrot.slane %v5319_v16, 2 }
  0x70   : > { %7567 = vst [vmem:[#allocation37_spill] sm:$0xff] %v5598_v1  ;;  %7568 = vst [vmem:[#allocation38_spill] sm:$0xff] %v5601_v55  ;;  %v744_v31 = vadd.f32 %v5604_v5, %v712_v49  ;;  %v745_v10 = vadd.f32 %v5607_v19, %v713_v59  ;;  %v5624_v52 = vrot.slane %v5329_v7, 2  ;;  %v5627_v47 = vrot.slane %v5339_v13, 2 }
  0x71   : > { %7569 = vst [vmem:[#allocation39_spill] sm:$0xff] %v5604_v5  ;;  %7570 = vst [vmem:[#allocation40_spill] sm:$0xff] %v5607_v19  ;;  %v5630_v23 = vrot.slane %v5349_v21, 2  ;;  %v5633_v56 = vrot.slane %v5359_v28, 2  ;;  %v5636_v57 = vrot.slane %v5369_v33, 2  ;;  %v5639_v58 = vrot.slane %v5379_v38, 2 }
  0x72   : > { %7571 = vst [vmem:[#allocation41_spill] sm:$0xff] %v5618_v61  ;;  %7572 = vst [vmem:[#allocation42_spill] sm:$0xff] %v5621_v62  ;;  %v762_v49 = vadd.f32 %v5618_v61, %v738_v26  ;;  %v763_v59 = vadd.f32 %v5621_v62, %v739_v48  ;;  %v764_v63 = vadd.f32 %v5624_v52, %v740_v50  ;;  %v7351_v5 = vrot.slane %v5309_v3, 5 }
  0x73   : > { %7573 = vst [vmem:[#allocation43_spill] sm:$0xff] %v5624_v52  ;;  %7574 = vst [vmem:[#allocation44_spill] sm:$0xff] %v5627_v47  ;;  %v765_v41 = vadd.f32 %v5627_v47, %v741_v51  ;;  %v766_v35 = vadd.f32 %v5630_v23, %v742_v53  ;;  %v767_v25 = vadd.f32 %v5633_v56, %v743_v54  ;;  %v7352_v55 = vrot.slane %v5319_v16, 5 }
  0x74   : > { %7575 = vst [vmem:[#allocation45_spill] sm:$0xff] %v5630_v23  ;;  %7576 = vst [vmem:[#allocation46_spill] sm:$0xff] %v5633_v56  ;;  %v768_v60 = vadd.f32 %v5636_v57, %v744_v31  ;;  %v769_v19 = vadd.f32 %v5639_v58, %v745_v10  ;;  %v7353_v26 = vrot.slane %v5329_v7, 5  ;;  %v7356_v48 = vrot.slane %v5339_v13, 5 }
  0x75   : > { %7577 = vst [vmem:[#allocation47_spill] sm:$0xff] %v5636_v57  ;;  %7578 = vst [vmem:[#allocation48_spill] sm:$0xff] %v5639_v58  ;;  %v7355_v50 = vrot.slane %v5349_v21, 5  ;;  %v7354_v51 = vrot.slane %v5359_v28, 5  ;;  %v786_v31 = vadd.f32 %v7351_v5, %v762_v49  ;;  %v787_v10 = vadd.f32 %v7352_v55, %v763_v59 }
  0x76   : > { %v788_v52 = vadd.f32 %v7353_v26, %v764_v63  ;;  %v789_v58 = vadd.f32 %v7356_v48, %v765_v41  ;;  %v7579_v54 = vrot.slane %v5369_v33, 5  ;;  %v7580_v49 = vrot.slane %v5379_v38, 5 }
  0x77   : > { %v790_v57 = vadd.f32 %v7355_v50, %v766_v35  ;;  %v791_v53 = vadd.f32 %v7354_v51, %v767_v25  ;;  %v7357_v59 = vrot.slane %v5309_v3, 6  ;;  %v7363_v55 = vrot.slane %v5319_v16, 6 }
  0x78   : > { %v792_v56 = vadd.f32 %v7579_v54, %v768_v60  ;;  %v793_v5 = vadd.f32 %v7580_v49, %v769_v19  ;;  %v7362_v63 = vrot.slane %v5329_v7, 6  ;;  %v7361_v41 = vrot.slane %v5339_v13, 6 }
  0x79   : > { %v7360_v26 = vrot.slane %v5349_v21, 6  ;;  %v7359_v35 = vrot.slane %v5359_v28, 6  ;;  %v7358_v25 = vrot.slane %v5369_v33, 6  ;;  %v810_v60 = vadd.f32 %v7357_v59, %v786_v31 }
  0x7a   : > { %v811_v19 = vadd.f32 %v7363_v55, %v787_v10  ;;  %v812_v54 = vadd.f32 %v7362_v63, %v788_v52  ;;  %v813_v49 = vadd.f32 %v7361_v41, %v789_v58  ;;  %v7581_v31 = vrot.slane %v5379_v38, 6 }
  0x7b   : > { %v814_v50 = vadd.f32 %v7360_v26, %v790_v57  ;;  %v815_v48 = vadd.f32 %v7359_v35, %v791_v53  ;;  %v816_v51 = vadd.f32 %v7358_v25, %v792_v56  ;;  %v5698_v10 = vrot.slane %v5309_v3, 7 }
  0x7c   : > { %v817_v59 = vadd.f32 %v7581_v31, %v793_v5  ;;  %v5701_v52 = vrot.slane %v5319_v16, 7  ;;  %v5704_v58 = vrot.slane %v5329_v7, 7  ;;  %v5707_v57 = vrot.slane %v5339_v13, 7 }
  0x7d   : > { %7582 = vst [vmem:[#allocation49_spill] sm:$0xff] %v5698_v10  ;;  %v5710_v53 = vrot.slane %v5349_v21, 7  ;;  %v5713_v56 = vrot.slane %v5359_v28, 7  ;;  %v5716_v5 = vrot.slane %v5369_v33, 7  ;;  %v5719_v31 = vrot.slane %v5379_v38, 7 }
  0x7e   : > { %7583 = vst [vmem:[#allocation50_spill] sm:$0xff] %v5701_v52  ;;  %7584 = vst [vmem:[#allocation51_spill] sm:$0xff] %v5704_v58  ;;  %v834_v25 = vadd.f32 %v5698_v10, %v810_v60  ;;  %v835_v35 = vadd.f32 %v5701_v52, %v811_v19  ;;  %v836_v26 = vadd.f32 %v5704_v58, %v812_v54 }
  0x7f   : > { %7585 = vst [vmem:[#allocation52_spill] sm:$0xff] %v5707_v57  ;;  %7586 = vst [vmem:[#allocation53_spill] sm:$0xff] %v5710_v53  ;;  %v837_v41 = vadd.f32 %v5707_v57, %v813_v49  ;;  %v838_v63 = vadd.f32 %v5710_v53, %v814_v50  ;;  %v839_v55 = vadd.f32 %v5713_v56, %v815_v48  ;;  %v7397_v53 = vrot.slane %v5321_v17, 4 }
  0x80   : > { %7587 = vst [vmem:[#allocation54_spill] sm:$0xff] %v5713_v56  ;;  %7588 = vst [vmem:[#allocation55_spill] sm:$0xff] %v5716_v5  ;;  %v840_v23 = vadd.f32 %v5716_v5, %v816_v51  ;;  %v841_v47 = vadd.f32 %v5719_v31, %v817_v59  ;;  %v842_v62 = vadd.f32 %v834_v25, %v5311_v4  ;;  %v5738_v51 = vrot.slane %v5311_v4, 1 }
  0x81   : > { %7589 = vst [vmem:[#allocation56_spill] sm:$0xff] %v5719_v31  ;;  %v843_v61 = vadd.f32 %v835_v35, %v5321_v17  ;;  %v844_v60 = vadd.f32 %v836_v26, %v5331_v8  ;;  %v845_v19 = vadd.f32 %v837_v41, %v5341_v14  ;;  %v846_v54 = vadd.f32 %v838_v63, %v5351_v24 }
  0x82   : > { %v847_v49 = vadd.f32 %v839_v55, %v5361_v29  ;;  %v848_v50 = vadd.f32 %v840_v23, %v5371_v34  ;;  %v849_v48 = vadd.f32 %v841_v47, %v5381_v39  ;;  %7590 = vst [vmem:[#allocation57_spill] sm:$0xff] %v5738_v51  ;;  %v5741_v59 = vrot.slane %v5321_v17, 1 }
  0x83   : > { %v5744_v35 = vrot.slane %v5331_v8, 1  ;;  %v5747_v26 = vrot.slane %v5341_v14, 1  ;;  %v5750_v63 = vrot.slane %v5351_v24, 1  ;;  %v5753_v55 = vrot.slane %v5361_v29, 1 }
  0x84   : > { %7591 = vst [vmem:[#allocation58_spill] sm:$0xff] %v5741_v59  ;;  %v5756_v47 = vrot.slane %v5371_v34, 1  ;;  %v5759_v23 = vrot.slane %v5381_v39, 1  ;;  %v874_v41 = vadd.f32 %v5738_v51, %v842_v62  ;;  %v875_v25 = vadd.f32 %v5741_v59, %v843_v61 }
  0x85   : > { %7592 = vst [vmem:[#allocation59_spill] sm:$0xff] %v5744_v35  ;;  %7593 = vst [vmem:[#allocation60_spill] sm:$0xff] %v5747_v26  ;;  %v876_v1 = vadd.f32 %v5744_v35, %v844_v60  ;;  %v877_v36 = vadd.f32 %v5747_v26, %v845_v19  ;;  %v878_v45 = vadd.f32 %v5750_v63, %v846_v54  ;;  %v7396_v56 = vrot.slane %v5311_v4, 4 }
  0x86   : > { %7594 = vst [vmem:[#allocation61_spill] sm:$0xff] %v5750_v63  ;;  %7595 = vst [vmem:[#allocation62_spill] sm:$0xff] %v5753_v55  ;;  %v879_v46 = vadd.f32 %v5753_v55, %v847_v49  ;;  %v880_v31 = vadd.f32 %v5756_v47, %v848_v50  ;;  %v881_v5 = vadd.f32 %v5759_v23, %v849_v48  ;;  %v7398_v62 = vrot.slane %v5331_v8, 4 }
  0x87   : > { %7596 = vst [vmem:[#allocation63_spill] sm:$0xff] %v5756_v47  ;;  %7597 = vst [vmem:[#allocation64_spill] sm:$0xff] %v5759_v23  ;;  %v7401_v61 = vrot.slane %v5341_v14, 4  ;;  %v7400_v60 = vrot.slane %v5351_v24, 4  ;;  %v7399_v19 = vrot.slane %v5361_v29, 4  ;;  %v898_v50 = vadd.f32 %v7396_v56, %v874_v41 }
  0x88   : > { %v899_v48 = vadd.f32 %v7397_v53, %v875_v25  ;;  %v900_v35 = vadd.f32 %v7398_v62, %v876_v1  ;;  %v7598_v49 = vrot.slane %v5371_v34, 4  ;;  %v7599_v41 = vrot.slane %v5381_v39, 4 }
  0x89   : > { %v901_v23 = vadd.f32 %v7401_v61, %v877_v36  ;;  %v902_v47 = vadd.f32 %v7400_v60, %v878_v45  ;;  %v903_v54 = vadd.f32 %v7399_v19, %v879_v46  ;;  %v7402_v25 = vrot.slane %v5311_v4, 5 }
  0x8a   : > { %v904_v55 = vadd.f32 %v7598_v49, %v880_v31  ;;  %v905_v56 = vadd.f32 %v7599_v41, %v881_v5  ;;  %v7408_v53 = vrot.slane %v5321_v17, 5  ;;  %v7403_v1 = vrot.slane %v5331_v8, 5 }
  0x8b   : > { %v7407_v36 = vrot.slane %v5341_v14, 5  ;;  %v7406_v62 = vrot.slane %v5351_v24, 5  ;;  %v7405_v45 = vrot.slane %v5361_v29, 5  ;;  %v7404_v46 = vrot.slane %v5371_v34, 5 }
  0x8c   : > { %v922_v31 = vadd.f32 %v7402_v25, %v898_v50  ;;  %v923_v5 = vadd.f32 %v7408_v53, %v899_v48  ;;  %v924_v49 = vadd.f32 %v7403_v1, %v900_v35  ;;  %v7600_v50 = vrot.slane %v5381_v39, 5 }
  0x8d   : > { %v925_v41 = vadd.f32 %v7407_v36, %v901_v23  ;;  %v926_v60 = vadd.f32 %v7406_v62, %v902_v47  ;;  %v927_v61 = vadd.f32 %v7405_v45, %v903_v54  ;;  %v928_v19 = vadd.f32 %v7404_v46, %v904_v55 }
  0x8e   : > { %v929_v25 = vadd.f32 %v7600_v50, %v905_v56  ;;  %v5818_v48 = vrot.slane %v5311_v4, 6  ;;  %v5821_v35 = vrot.slane %v5321_v17, 6  ;;  %v5824_v23 = vrot.slane %v5331_v8, 6 }
  0x8f   : > { %v5827_v47 = vrot.slane %v5341_v14, 6  ;;  %v5830_v54 = vrot.slane %v5351_v24, 6  ;;  %v5833_v55 = vrot.slane %v5361_v29, 6  ;;  %v5836_v56 = vrot.slane %v5371_v34, 6 }
  0x90   : > { %7601 = vst [vmem:[#allocation65_spill] sm:$0xff] %v5818_v48  ;;  %7602 = vst [vmem:[#allocation66_spill] sm:$0xff] %v5821_v35  ;;  %v5839_v50 = vrot.slane %v5381_v39, 6  ;;  %v946_v1 = vadd.f32 %v5818_v48, %v922_v31  ;;  %v947_v46 = vadd.f32 %v5821_v35, %v923_v5  ;;  %v948_v45 = vadd.f32 %v5824_v23, %v924_v49 }
  0x91   : > { %7603 = vst [vmem:[#allocation67_spill] sm:$0xff] %v5824_v23  ;;  %7604 = vst [vmem:[#allocation68_spill] sm:$0xff] %v5827_v47  ;;  %v949_v62 = vadd.f32 %v5827_v47, %v925_v41  ;;  %v950_v36 = vadd.f32 %v5830_v54, %v926_v60  ;;  %v951_v53 = vadd.f32 %v5833_v55, %v927_v61  ;;  %v5850_v59 = vrot.slane %v5311_v4, 7 }
  0x92   : > { %7605 = vst [vmem:[#allocation69_spill] sm:$0xff] %v5830_v54  ;;  %7606 = vst [vmem:[#allocation70_spill] sm:$0xff] %v5833_v55  ;;  %v952_v63 = vadd.f32 %v5836_v56, %v928_v19  ;;  %v953_v26 = vadd.f32 %v5839_v50, %v929_v25  ;;  %v5853_v51 = vrot.slane %v5321_v17, 7  ;;  %v5856_v31 = vrot.slane %v5331_v8, 7 }
  0x93   : > { %7607 = vst [vmem:[#allocation71_spill] sm:$0xff] %v5836_v56  ;;  %7608 = vst [vmem:[#allocation72_spill] sm:$0xff] %v5839_v50  ;;  %v5859_v5 = vrot.slane %v5341_v14, 7  ;;  %v5862_v60 = vrot.slane %v5351_v24, 7  ;;  %v5865_v61 = vrot.slane %v5361_v29, 7  ;;  %v5868_v19 = vrot.slane %v5371_v34, 7 }
  0x94   : > { %7609 = vst [vmem:[#allocation73_spill] sm:$0xff] %v5850_v59  ;;  %7610 = vst [vmem:[#allocation74_spill] sm:$0xff] %v5853_v51  ;;  %v5871_v25 = vrot.slane %v5381_v39, 7  ;;  %v970_v49 = vadd.f32 %v5850_v59, %v946_v1  ;;  %v971_v41 = vadd.f32 %v5853_v51, %v947_v46  ;;  %v972_v23 = vadd.f32 %v5856_v31, %v948_v45  ;;  %v7617_v1 = vld [vmem:[#allocation14_spill] sm:$0xff]  ;;  %v7618_v46 = vld [vmem:[#allocation16_spill] sm:$0xff] }
  0x95   : > { %7611 = vst [vmem:[#allocation75_spill] sm:$0xff] %v5856_v31  ;;  %7612 = vst [vmem:[#allocation76_spill] sm:$0xff] %v5859_v5  ;;  %v973_v8 = vadd.f32 %v5859_v5, %v949_v62  ;;  %v974_v24 = vadd.f32 %v5862_v60, %v950_v36  ;;  %v975_v14 = vadd.f32 %v5865_v61, %v951_v53  ;;  %v7619_v45 = vld [vmem:[#allocation18_spill] sm:$0xff]  ;;  %v7620_v31 = vld [vmem:[#allocation20_spill] sm:$0xff] }
  0x96   : > { %7613 = vst [vmem:[#allocation77_spill] sm:$0xff] %v5862_v60  ;;  %7614 = vst [vmem:[#allocation78_spill] sm:$0xff] %v5865_v61  ;;  %v976_v29 = vadd.f32 %v5868_v19, %v952_v63  ;;  %v977_v34 = vadd.f32 %v5871_v25, %v953_v26  ;;  %v978_v39 = vadd.f32 %v970_v49, %v5313_v9  ;;  %v7621_v60 = vld [vmem:[#allocation22_spill] sm:$0xff]  ;;  %v7622_v61 = vld [vmem:[#allocation24_spill] sm:$0xff]  ;;  %v7623_v49 = vrot.slane %v5307_v2, 7 }
  0x97   : > { %7615 = vst [vmem:[#allocation79_spill] sm:$0xff] %v5868_v19  ;;  %7616 = vst [vmem:[#allocation80_spill] sm:$0xff] %v5871_v25  ;;  %v979_v17 = vadd.f32 %v971_v41, %v5323_v22  ;;  %v980_v4 = vadd.f32 %v972_v23, %v7617_v1  ;;  %v981_v51 = vadd.f32 %v973_v8, %v7618_v46 }
  0x98   : > { %v982_v62 = vadd.f32 %v974_v24, %v7619_v45  ;;  %v983_v36 = vadd.f32 %v975_v14, %v7620_v31  ;;  %v984_v53 = vadd.f32 %v976_v29, %v7621_v60  ;;  %v985_v63 = vadd.f32 %v977_v34, %v7622_v61 }
  0x99   : > { %v986_v26 = vmul.f32 0.04, %v978_v39  ;;  %v987_v25 = vmul.f32 0.04, %v979_v17  ;;  %v988_v19 = vmul.f32 0.04, %v980_v4  ;;  %v1099_v23 = vadd.f32 %v7623_v49, %v5425_v18 }
  0x9a   : > { %v989_v41 = vmul.f32 0.04, %v981_v51  ;;  %v990_v8 = vmul.f32 0.04, %v982_v62  ;;  %v991_v46 = vmul.f32 0.04, %v983_v36 }
  0x9b   : > { %v7624_v14 = vrot.slane %v5317_v15, 7  ;;  %v992_v29 = vmul.f32 0.04, %v984_v53  ;;  %v993_v60 = vmul.f32 0.04, %v985_v63  ;;  %v994_v34 = vpack.c.bf16 %v986_v26, %v986_v26 }
  0x9c   : > { %v995_v61 = vpack.c.bf16 %v987_v25, %v987_v25  ;;  %v996_v17 = vpack.c.bf16 %v988_v19, %v988_v19  ;;  %v997_v4 = vpack.c.bf16 %v989_v41, %v989_v41  ;;  %v998_v39 = vpack.c.bf16 %v990_v8, %v990_v8 }
  0x9d   : > { %v1100_v24 = vadd.f32 %v7624_v14, %v5427_v11  ;;  %v999_v31 = vpack.c.bf16 %v991_v46, %v991_v46  ;;  %v1000_v45 = vpack.c.bf16 %v992_v29, %v992_v29  ;;  %v1001_v18 = vpack.c.bf16 %v993_v60, %v993_v60 }
  0x9e   : > { %v1016_v51 = vunpack.c.l.b16 %v994_v34  ;;  %v1017_v62 = vunpack.c.l.b16 %v995_v61  ;;  %v1018_v36 = vunpack.c.l.b16 %v996_v17  ;;  %v1019_v49 = vunpack.c.l.b16 %v997_v4 }
  0x9f   : > { %v1020_v1 = vunpack.c.l.b16 %v998_v39  ;;  %v1021_v22 = vunpack.c.l.b16 %v999_v31  ;;  %v1022_v9 = vunpack.c.l.b16 %v1000_v45  ;;  %v1023_v11 = vunpack.c.l.b16 %v1001_v18 }
  0xa0   : > { %v1024_v53 = vrot.slane %v1017_v62, 7  ;;  %v7625_v25 = vrot.slane %v5327_v6, 7  ;;  %v1027_v63 = vrot.slane %v1018_v36, 6  ;;  %v1030_v26 = vrot.slane %v1019_v49, 5 }
  0xa1   : > { %v1033_v46 = vrot.slane %v1020_v1, 4  ;;  %v1036_v41 = vrot.slane %v1021_v22, 3  ;;  %v1039_v8 = vrot.slane %v1022_v9, 2  ;;  %v1042_v61 = vrot.slane %v1023_v11, 1  ;;  %v7631_v11 = vld [vmem:[#allocation25_spill] sm:$0xff] }
  0xa2   : > { %v1101_v19 = vadd.f32 %v7625_v25, %v5429_v0  ;;  %v1026_v60 = vsel %vm1025_vm1, %v1024_v53, %v1016_v51  ;;  %v7626_v14 = vrot.slane %v5337_v12, 7  ;;  %v7627_v29 = vrot.slane %v5347_v20, 7  ;;  %v7632_v53 = vld [vmem:[#allocation26_spill] sm:$0xff] }
  0xa3   : > { %v1029_v45 = vsel %vm1028_vm2, %v1027_v63, %v1026_v60  ;;  %v7628_v0 = vrot.slane %v5357_v27, 7  ;;  %v7629_v22 = vrot.slane %v5367_v32, 7  ;;  %v7630_v4 = vrot.slane %v5377_v37, 7  ;;  %v7633_v63 = vld [vmem:[#allocation27_spill] sm:$0xff] }
  0xa4   : > { %v1102_v31 = vadd.f32 %v7626_v14, %v5431_v30  ;;  %v1103_v34 = vadd.f32 %v7627_v29, %v5433_v40  ;;  %v1032_v9 = vsel %vm1031_vm3, %v1030_v26, %v1029_v45  ;;  %v1107_v39 = vadd.f32 %v1099_v23, %v5307_v2  ;;  %v7635_v14 = vld [vmem:[#allocation29_spill] sm:$0xff] }
  0xa5   : > { %v1104_v17 = vadd.f32 %v7628_v0, %v5435_v42  ;;  %v1105_v1 = vadd.f32 %v7629_v22, %v5437_v43  ;;  %v1106_v30 = vadd.f32 %v7630_v4, %v5439_v44  ;;  %v1108_v18 = vadd.f32 %v1100_v24, %v5317_v15 }
  0xa6   : > { %v1035_v40 = vsel %vm1034_vm4, %v1033_v46, %v1032_v9  ;;  %v1109_v51 = vadd.f32 %v1101_v19, %v5327_v6  ;;  %v1110_v42 = vadd.f32 %v1102_v31, %v5337_v12  ;;  %v1111_v62 = vadd.f32 %v1103_v34, %v5347_v20  ;;  %v7634_v46 = vld [vmem:[#allocation28_spill] sm:$0xff]  ;;  %v7636_v31 = vld [vmem:[#allocation30_spill] sm:$0xff]  ;;  %v7637_v34 = vld [vmem:[#allocation31_spill] sm:$0xff] }
  0xa7   : > { %v1038_v43 = vsel %vm1037_vm5, %v1036_v41, %v1035_v40  ;;  %v1112_v36 = vadd.f32 %v1104_v17, %v5357_v27  ;;  %v1113_v49 = vadd.f32 %v1105_v1, %v5367_v32  ;;  %v1114_v44 = vadd.f32 %v1106_v30, %v5377_v37  ;;  %v7638_v17 = vld [vmem:[#allocation32_spill] sm:$0xff] }
  0xa8   : > { %v1041_v23 = vsel %vm1040_vm6, %v1039_v8, %v1038_v43  ;;  %v1115_v24 = vadd.f32 %v1107_v39, %v7631_v11  ;;  %v1116_v25 = vadd.f32 %v1108_v18, %v7632_v53  ;;  %v1117_v19 = vadd.f32 %v1109_v51, %v7633_v63 }
  0xa9   : > { %v1044_v26 = vsel %vm1043_vm7, %v1042_v61, %v1041_v23  ;;  %v1118_v60 = vadd.f32 %v1110_v42, %v7634_v46  ;;  %v1119_v41 = vadd.f32 %v1111_v62, %v7635_v14  ;;  %v1120_v45 = vadd.f32 %v1112_v36, %v7636_v31 }
  0xaa   : > { %v1045_v29 = vpack.c.b16 %v1044_v26, %v1044_v26  ;;  %v1121_v0 = vadd.f32 %v1113_v49, %v7637_v34  ;;  %v1122_v22 = vadd.f32 %v1114_v44, %v7638_v17  ;;  %v7639_v8 = vrot.slane %v5307_v2, 2 }
  0xab   : > { %v7640_v9 = vrot.slane %v5317_v15, 2  ;;  %v7641_v30 = vrot.slane %v5327_v6, 2  ;;  %v7642_v39 = vrot.slane %v5337_v12, 2  ;;  %v7643_v40 = vrot.slane %v5347_v20, 2 }
  0xac   : > { %v1123_v1 = vadd.f32 %v1115_v24, %v7639_v8  ;;  %4625 = vmatmul.mubr.msk.bf16.vlgmr.msra.gmra.mxu1 %vm1052_vm8, %v1045_v29  ;;  %v7644_v42 = vrot.slane %v5357_v27, 2  ;;  %v7645_v43 = vrot.slane %v5367_v32, 2  ;;  %v7646_v49 = vrot.slane %v5377_v37, 2 }
  0xad   : > { %v1124_v4 = vadd.f32 %v1116_v25, %v7640_v9  ;;  %v1125_v61 = vadd.f32 %v1117_v19, %v7641_v30  ;;  %v1126_v18 = vadd.f32 %v1118_v60, %v7642_v39  ;;  %v1127_v51 = vadd.f32 %v1119_v41, %v7643_v40 }
  0xae   : > { %v1128_v62 = vadd.f32 %v1120_v45, %v7644_v42  ;;  %v1129_v36 = vadd.f32 %v1121_v0, %v7645_v43  ;;  %v1130_v44 = vadd.f32 %v1122_v22, %v7646_v49  ;;  %v7647_v23 = vrot.slane %v5307_v2, 3  ;;  %v5042_v0 = vld [vmem:[%s7283_s1] sm:$0xff]  }
  0xaf   : > { %v7648_v25 = vrot.slane %v5317_v15, 3  ;;  %v7649_v26 = vrot.slane %v5327_v6, 3  ;;  %v7650_v41 = vrot.slane %v5337_v12, 3  ;;  %v7651_v45 = vrot.slane %v5347_v20, 3  ;;  %4629 = vmatpush3.bf16.msra.mxu1 %v5042_v0 }
  0xb0   : > { %v1131_v24 = vadd.f32 %v1123_v1, %v7647_v23  ;;  %v7652_v22 = vrot.slane %v5357_v27, 3  ;;  %v7653_v9 = vrot.slane %v5367_v32, 3  ;;  %v7654_v30 = vrot.slane %v5377_v37, 3 }
  0xb1   : > { %v1132_v19 = vadd.f32 %v1124_v4, %v7648_v25  ;;  %v1133_v60 = vadd.f32 %v1125_v61, %v7649_v26  ;;  %v1134_v29 = vadd.f32 %v1126_v18, %v7650_v41  ;;  %v1135_v8 = vadd.f32 %v1127_v51, %v7651_v45 }
  0xb2   : > { %v1136_v1 = vadd.f32 %v1128_v62, %v7652_v22  ;;  %v1137_v4 = vadd.f32 %v1129_v36, %v7653_v9  ;;  %v1138_v61 = vadd.f32 %v1130_v44, %v7654_v30  ;;  %v7655_v39 = vrot.slane %v5309_v3, 6  ;;  %v7665_v30 = vld [vmem:[#allocation54_spill] sm:$0xff] }
  0xb3   : > { %v7656_v40 = vmov 0.0   ;;  %v7657_v51 = vrot.slane %v5319_v16, 6  ;;  %v7658_v43 = vrot.slane %v5329_v7, 6  ;;  %v7659_v62 = vrot.slane %v5339_v13, 6 }
  0xb4   : > { %v1139_v18 = vadd.f32 %v1131_v24, %v7655_v39  ;;  %4630 = vmatprep.mubr.msk.bf16.mxu1 %vm5144_vm0, %v7656_v40  ;;  %v7660_v36 = vrot.slane %v5349_v21, 6  ;;  %4634 = vmatprep.subr.bf16.mxu1 %v7656_v40  ;;  %v7661_v44 = vrot.slane %v5359_v28, 6  ;;  %v7662_v26 = vrot.slane %v5369_v33, 6  ;;  %v7674_v40 = vld [vmem:[#allocation39_spill] sm:$0xff] }
  0xb5   : > { %v1140_v42 = vadd.f32 %v1132_v19, %v7657_v51  ;;  %v1141_v49 = vadd.f32 %v1133_v60, %v7658_v43  ;;  %v1142_v23 = vadd.f32 %v1134_v29, %v7659_v62  ;;  %v7663_v45 = vrot.slane %v5379_v38, 6  ;;  %v7666_v51 = vld [vmem:[#allocation55_spill] sm:$0xff]  ;;  %v7667_v43 = vld [vmem:[#allocation56_spill] sm:$0xff] }
  0xb6   : > { %v1143_v25 = vadd.f32 %v1135_v8, %v7660_v36  ;;  %v1144_v24 = vadd.f32 %v1136_v1, %v7661_v44  ;;  %v1145_v41 = vadd.f32 %v1137_v4, %v7662_v26  ;;  %v1147_v0 = vadd.f32 %v1139_v18, %v5698_v10  ;;  %v7664_v8 = vld [vmem:[#allocation53_spill] sm:$0xff]  ;;  %v7670_v26 = vld [vmem:[#allocation34_spill] sm:$0xff] }
  0xb7   : > { %v1146_v19 = vadd.f32 %v1138_v61, %v7663_v45  ;;  %v1148_v60 = vadd.f32 %v1140_v42, %v5701_v52  ;;  %v1149_v29 = vadd.f32 %v1141_v49, %v5704_v58  ;;  %v1150_v22 = vadd.f32 %v1142_v23, %v5707_v57  ;;  %v7669_v44 = vld [vmem:[#allocation33_spill] sm:$0xff]  ;;  %v7671_v45 = vld [vmem:[#allocation36_spill] sm:$0xff] }
  0xb8   : > { %v1151_v9 = vadd.f32 %v1143_v25, %v7664_v8  ;;  %v1152_v39 = vadd.f32 %v1144_v24, %v7665_v30  ;;  %v1153_v1 = vadd.f32 %v1145_v41, %v7666_v51  ;;  %v1155_v4 = vadd.f32 %v1147_v0, %v5309_v3  ;;  %v7672_v0 = vld [vmem:[#allocation37_spill] sm:$0xff]  ;;  %v7677_v51 = vld [vmem:[#allocation42_spill] sm:$0xff] }
  0xb9   : > { %v1154_v62 = vadd.f32 %v1146_v19, %v7667_v43  ;;  %v1156_v61 = vadd.f32 %v1148_v60, %v5319_v16  ;;  %v6002_v18 = vadd.f32 %v1149_v29, %v5329_v7  ;;  %v1158_v42 = vadd.f32 %v1150_v22, %v5339_v13  ;;  %v7673_v22 = vld [vmem:[#allocation38_spill] sm:$0xff]  ;;  %v7676_v43 = vld [vmem:[#allocation41_spill] sm:$0xff] }
  0xba   : > { %v1159_v49 = vadd.f32 %v1151_v9, %v5349_v21  ;;  %v1160_v23 = vadd.f32 %v1152_v39, %v5359_v28  ;;  %v1161_v36 = vadd.f32 %v1153_v1, %v5369_v33  ;;  %v1163_v24 = vadd.f32 %v1155_v4, %v7669_v44  ;;  %v7678_v44 = vld [vmem:[#allocation44_spill] sm:$0xff] }
  0xbb   : > { %7668 = vst [vmem:[#allocation25_spill] sm:$0xff] %v6002_v18  ;;  %v1162_v25 = vadd.f32 %v1154_v62, %v5379_v38  ;;  %v1164_v41 = vadd.f32 %v1156_v61, %v7670_v26  ;;  %v1166_v19 = vadd.f32 %v1158_v42, %v7671_v45  ;;  %v6015_v29 = vadd.f32 %v7631_v11, %v5307_v2  ;;  %v7675_v18 = vld [vmem:[#allocation40_spill] sm:$0xff]  ;;  %v7679_v26 = vld [vmem:[#allocation45_spill] sm:$0xff]  ;;  %v7681_v11 = vld [vmem:[#allocation47_spill] sm:$0xff] }
  0xbc   : > { %v1167_v60 = vadd.f32 %v1159_v49, %v7672_v0  ;;  %v1168_v9 = vadd.f32 %v1160_v23, %v7673_v22  ;;  %v1169_v39 = vadd.f32 %v1161_v36, %v7674_v40  ;;  %v1171_v62 = vadd.f32 %v1163_v24, %v7676_v43  ;;  %v7680_v0 = vld [vmem:[#allocation46_spill] sm:$0xff]  ;;  %v7682_v23 = vld [vmem:[#allocation48_spill] sm:$0xff] }
  0xbd   : > { %v1170_v1 = vadd.f32 %v1162_v25, %v7675_v18  ;;  %v1172_v4 = vadd.f32 %v1164_v41, %v7677_v51  ;;  %v1174_v61 = vadd.f32 %v1166_v19, %v7678_v44  ;;  %v1393_v49 = vadd.f32 %v7632_v53, %v5317_v15 }
  0xbe   : > { %v1175_v42 = vadd.f32 %v1167_v60, %v7679_v26  ;;  %v1176_v2 = vadd.f32 %v1168_v9, %v7680_v0  ;;  %v1177_v45 = vadd.f32 %v1169_v39, %v7681_v11  ;;  %v7683_v36 = vrot.slane %v5309_v3, 5 }
  0xbf   : > { %v1178_v22 = vadd.f32 %v1170_v1, %v7682_v23  ;;  %v7684_v24 = vrot.slane %v5319_v16, 5  ;;  %v7685_v41 = vrot.slane %v5339_v13, 5  ;;  %v7686_v60 = vrot.slane %v5349_v21, 5 }
  0xc0   : > { %v1179_v25 = vadd.f32 %v1171_v62, %v7683_v36  ;;  %v1394_v15 = vadd.f32 %v7633_v63, %v5327_v6  ;;  %v7687_v53 = vrot.slane %v5359_v28, 5  ;;  %v7688_v39 = vrot.slane %v5369_v33, 5 }
  0xc1   : > { %v1180_v18 = vadd.f32 %v1172_v4, %v7684_v24  ;;  %v1182_v19 = vadd.f32 %v1174_v61, %v7685_v41  ;;  %v1183_v40 = vadd.f32 %v1175_v42, %v7686_v60  ;;  %v7689_v62 = vrot.slane %v5379_v38, 5 }
  0xc2   : > { %v1184_v9 = vadd.f32 %v1176_v2, %v7687_v53  ;;  %v1185_v1 = vadd.f32 %v1177_v45, %v7688_v39  ;;  %v1187_v4 = vadd.f32 %v1179_v25, %v5818_v48  ;;  %v1395_v6 = vadd.f32 %v7634_v46, %v5337_v12  ;;  %v7693_v12 = vld [vmem:[#allocation79_spill] sm:$0xff] }
  0xc3   : > { %v1186_v36 = vadd.f32 %v1178_v22, %v7689_v62  ;;  %v1188_v24 = vadd.f32 %v1180_v18, %v5821_v35  ;;  %v1190_v61 = vadd.f32 %v1182_v19, %v5827_v47  ;;  %v1191_v42 = vadd.f32 %v1183_v40, %v5830_v54  ;;  %v7690_v22 = vld [vmem:[#allocation74_spill] sm:$0xff]  ;;  %v7691_v18 = vld [vmem:[#allocation77_spill] sm:$0xff] }
  0xc4   : > { %v1192_v63 = vadd.f32 %v1184_v9, %v5833_v55  ;;  %v1193_v2 = vadd.f32 %v1185_v1, %v5836_v56  ;;  %v1195_v41 = vadd.f32 %v1187_v4, %v5850_v59  ;;  %v1396_v40 = vadd.f32 %v7635_v14, %v5347_v20  ;;  %v7692_v19 = vld [vmem:[#allocation78_spill] sm:$0xff]  ;;  %v7694_v9 = vld [vmem:[#allocation80_spill] sm:$0xff]  ;;  %v7695_v1 = vld [vmem:[#allocation9_spill] sm:$0xff] }
  0xc5   : > { %v1194_v45 = vadd.f32 %v1186_v36, %v5839_v50  ;;  %v1196_v60 = vadd.f32 %v1188_v24, %v7690_v22  ;;  %v1198_v25 = vadd.f32 %v1190_v61, %v5859_v5  ;;  %v1199_v53 = vadd.f32 %v1191_v42, %v7691_v18  ;;  %v7696_v36 = vld [vmem:[#allocation11_spill] sm:$0xff]  ;;  %v7698_v24 = vld [vmem:[#allocation17_spill] sm:$0xff] }
  0xc6   : > { %v1200_v39 = vadd.f32 %v1192_v63, %v7692_v19  ;;  %v1201_v46 = vadd.f32 %v1193_v2, %v7693_v12  ;;  %v1203_v56 = vadd.f32 %v1195_v41, %v7695_v1  ;;  %v7697_v4 = vld [vmem:[#allocation15_spill] sm:$0xff]  ;;  %v1397_v61 = vadd.f32 %v7636_v31, %v5357_v27  ;;  %v7700_v20 = vld [vmem:[#allocation21_spill] sm:$0xff]  ;;  %v7704_v41 = vld [vmem:[#allocation60_spill] sm:$0xff] }
  0xc7   : > { %v1202_v62 = vadd.f32 %v1194_v45, %v7694_v9  ;;  %v1204_v50 = vadd.f32 %v1196_v60, %v7696_v36  ;;  %v1206_v59 = vadd.f32 %v1198_v25, %v7697_v4  ;;  %v1207_v22 = vadd.f32 %v1199_v53, %v7698_v24  ;;  %v7699_v42 = vld [vmem:[#allocation19_spill] sm:$0xff]  ;;  %v7702_v2 = vld [vmem:[#allocation57_spill] sm:$0xff]  ;;  %v7703_v45 = vld [vmem:[#allocation58_spill] sm:$0xff] }
  0xc8   : > { %v1208_v18 = vadd.f32 %v1200_v39, %v7699_v42  ;;  %v1209_v14 = vadd.f32 %v1201_v46, %v7700_v20  ;;  %v7701_v63 = vld [vmem:[#allocation23_spill] sm:$0xff]  ;;  %v1211_v12 = vadd.f32 %v1203_v56, %v7702_v2  ;;  %v7705_v60 = vld [vmem:[#allocation61_spill] sm:$0xff]  ;;  %v1398_v25 = vadd.f32 %v7637_v34, %v5367_v32  ;;  %v7706_v53 = vld [vmem:[#allocation62_spill] sm:$0xff] }
  0xc9   : > { %v1210_v19 = vadd.f32 %v1202_v62, %v7701_v63  ;;  %v1212_v9 = vadd.f32 %v1204_v50, %v7703_v45  ;;  %v1214_v5 = vadd.f32 %v1206_v59, %v7704_v41  ;;  %v1215_v55 = vadd.f32 %v1207_v22, %v7705_v60  ;;  %v7707_v27 = vld [vmem:[#allocation63_spill] sm:$0xff]  ;;  %v7708_v39 = vld [vmem:[#allocation64_spill] sm:$0xff] }
  0xca   : > { %v1216_v54 = vadd.f32 %v1208_v18, %v7706_v53  ;;  %v1217_v31 = vadd.f32 %v1209_v14, %v7707_v27  ;;  %v7709_v46 = vrot.slane %v7695_v1, 4  ;;  %v7710_v56 = vrot.slane %v7696_v36, 4 }
  0xcb   : > { %v1218_v47 = vadd.f32 %v1210_v19, %v7708_v39  ;;  %v7711_v50 = vrot.slane %v7697_v4, 4  ;;  %v7712_v22 = vrot.slane %v7698_v24, 4  ;;  %v1399_v32 = vadd.f32 %v7638_v17, %v5377_v37 }
  0xcc   : > { %v1219_v62 = vadd.f32 %v1211_v12, %v7709_v46  ;;  %v1220_v2 = vadd.f32 %v1212_v9, %v7710_v56  ;;  %v7713_v34 = vrot.slane %v7699_v42, 4  ;;  %v7714_v19 = vrot.slane %v7700_v20, 4 }
  0xcd   : > { %v1222_v59 = vadd.f32 %v1214_v5, %v7711_v50  ;;  %v1223_v60 = vadd.f32 %v1215_v55, %v7712_v22  ;;  %v7715_v12 = vrot.slane %v7701_v63, 4  ;;  %v7716_v9 = vrot.slane %v7695_v1, 5 }
  0xce   : > { %v1224_v18 = vadd.f32 %v1216_v54, %v7713_v34  ;;  %v1225_v14 = vadd.f32 %v1217_v31, %v7714_v19  ;;  %v7718_v5 = vrot.slane %v7696_v36, 5  ;;  %v7720_v55 = vrot.slane %v7697_v4, 5 }
  0xcf   : > { %v1226_v46 = vadd.f32 %v1218_v47, %v7715_v12  ;;  %v6099_v56 = vadd.f32 %v1219_v62, %v7716_v9  ;;  %v7722_v54 = vrot.slane %v7698_v24, 5  ;;  %v1400_v31 = vadd.f32 %v6015_v29, %v7676_v43  ;;  %v7730_v12 = vld [vmem:[#allocation43_spill] sm:$0xff] }
  0xd0   : > { %v6103_v50 = vadd.f32 %v1220_v2, %v7718_v5  ;;  %v6107_v37 = vadd.f32 %v1222_v59, %v7720_v55  ;;  %v7724_v47 = vrot.slane %v7699_v42, 5  ;;  %v7726_v62 = vrot.slane %v7700_v20, 5 }
  0xd1   : > { %7717 = vst [vmem:[#allocation26_spill] sm:$0xff] %v6099_v56  ;;  %v6111_v17 = vadd.f32 %v1223_v60, %v7722_v54  ;;  %v7728_v2 = vrot.slane %v7701_v63, 5  ;;  %v1401_v59 = vadd.f32 %v1393_v49, %v7677_v51  ;;  %v1402_v60 = vadd.f32 %v1394_v15, %v7730_v12  ;;  %v7743_v56 = vld [vmem:[#allocation40_spill] sm:$0xff] }
  0xd2   : > { %7719 = vst [vmem:[#allocation27_spill] sm:$0xff] %v6103_v50  ;;  %7721 = vst [vmem:[#allocation28_spill] sm:$0xff] %v6107_v37  ;;  %v6117_v22 = vadd.f32 %v1224_v18, %v7724_v47  ;;  %v6121_v34 = vadd.f32 %v1225_v14, %v7726_v62  ;;  %v1403_v9 = vadd.f32 %v1395_v6, %v7678_v44  ;;  %v7466_v14 = vrot.slane %v5309_v3, 3  ;;  %v7741_v37 = vld [vmem:[#allocation38_spill] sm:$0xff]  ;;  %v7742_v50 = vld [vmem:[#allocation39_spill] sm:$0xff] }
  0xd3   : > { %7723 = vst [vmem:[#allocation29_spill] sm:$0xff] %v6111_v17  ;;  %v6125_v19 = vadd.f32 %v1226_v46, %v7728_v2  ;;  %v1404_v29 = vadd.f32 %v1396_v40, %v7679_v26  ;;  %v1405_v5 = vadd.f32 %v1397_v61, %v7680_v0  ;;  %v1406_v18 = vadd.f32 %v1398_v25, %v7681_v11  ;;  %v7740_v17 = vld [vmem:[#allocation37_spill] sm:$0xff]  ;;  %v7755_v11 = vld [vmem:[#allocation74_spill] sm:$0xff] }
  0xd4   : > { %7725 = vst [vmem:[#allocation30_spill] sm:$0xff] %v6117_v22  ;;  %7727 = vst [vmem:[#allocation31_spill] sm:$0xff] %v6121_v34  ;;  %v1407_v55 = vadd.f32 %v1399_v32, %v7682_v23  ;;  %v7467_v54 = vrot.slane %v5319_v16, 3  ;;  %v7471_v46 = vrot.slane %v5329_v7, 3  ;;  %v7468_v49 = vrot.slane %v5339_v13, 3  ;;  %v7738_v34 = vld [vmem:[#allocation35_spill] sm:$0xff] }
  0xd5   : > { %7729 = vst [vmem:[#allocation32_spill] sm:$0xff] %v6125_v19  ;;  %v7470_v15 = vrot.slane %v5349_v21, 3  ;;  %v7469_v6 = vrot.slane %v5359_v28, 3  ;;  %v1424_v25 = vadd.f32 %v7466_v14, %v1400_v31  ;;  %v7731_v61 = vrot.slane %v5369_v33, 3  ;;  %v7739_v22 = vld [vmem:[#allocation36_spill] sm:$0xff] }
  0xd6   : > { %v1425_v32 = vadd.f32 %v7467_v54, %v1401_v59  ;;  %v1426_v47 = vadd.f32 %v7471_v46, %v1402_v60  ;;  %v1427_v62 = vadd.f32 %v7468_v49, %v1403_v9  ;;  %v7732_v31 = vrot.slane %v5379_v38, 3 }
  0xd7   : > { %v1428_v2 = vadd.f32 %v7470_v15, %v1404_v29  ;;  %v1429_v40 = vadd.f32 %v7469_v6, %v1405_v5  ;;  %v1430_v19 = vadd.f32 %v7731_v61, %v1406_v18  ;;  %v7472_v59 = vrot.slane %v5309_v3, 4 }
  0xd8   : > { %v1431_v14 = vadd.f32 %v7732_v31, %v1407_v55  ;;  %v7473_v54 = vrot.slane %v5319_v16, 4  ;;  %v7477_v60 = vrot.slane %v5329_v7, 4  ;;  %v7474_v9 = vrot.slane %v5339_v13, 4 }
  0xd9   : > { %v7475_v49 = vrot.slane %v5349_v21, 4  ;;  %v7476_v29 = vrot.slane %v5359_v28, 4  ;;  %v7478_v5 = vrot.slane %v5369_v33, 4  ;;  %v1448_v18 = vadd.f32 %v7472_v59, %v1424_v25 }
  0xda   : > { %v1449_v55 = vadd.f32 %v7473_v54, %v1425_v32  ;;  %v1450_v61 = vadd.f32 %v7477_v60, %v1426_v47  ;;  %v1451_v31 = vadd.f32 %v7474_v9, %v1427_v62  ;;  %v7733_v25 = vrot.slane %v5379_v38, 4 }
  0xdb   : > { %v1452_v15 = vadd.f32 %v7475_v49, %v1428_v2  ;;  %v1453_v46 = vadd.f32 %v7476_v29, %v1429_v40  ;;  %v1454_v6 = vadd.f32 %v7478_v5, %v1430_v19  ;;  %v1456_v32 = vadd.f32 %v1448_v18, %v5698_v10  ;;  %v7734_v49 = vld [vmem:[#allocation55_spill] sm:$0xff]  ;;  %v7735_v29 = vld [vmem:[#allocation56_spill] sm:$0xff]  ;;  %v7737_v5 = vld [vmem:[#allocation34_spill] sm:$0xff] }
  0xdc   : > { %v1455_v59 = vadd.f32 %v7733_v25, %v1431_v14  ;;  %v1457_v54 = vadd.f32 %v1449_v55, %v5701_v52  ;;  %v1458_v47 = vadd.f32 %v1450_v61, %v5704_v58  ;;  %v1459_v62 = vadd.f32 %v1451_v31, %v5707_v57  ;;  %v7736_v25 = vld [vmem:[#allocation33_spill] sm:$0xff]  ;;  %v7749_v58 = vld [vmem:[#allocation68_spill] sm:$0xff]  ;;  %v7752_v10 = vld [vmem:[#allocation71_spill] sm:$0xff] }
  0xdd   : > { %v1460_v9 = vadd.f32 %v1452_v15, %v7664_v8  ;;  %v1461_v2 = vadd.f32 %v1453_v46, %v7665_v30  ;;  %v1462_v40 = vadd.f32 %v1454_v6, %v7734_v49  ;;  %v1464_v19 = vadd.f32 %v1456_v32, %v5309_v3 }
  0xde   : > { %v1463_v60 = vadd.f32 %v1455_v59, %v7735_v29  ;;  %v1465_v14 = vadd.f32 %v1457_v54, %v5319_v16  ;;  %v1466_v18 = vadd.f32 %v1458_v47, %v5329_v7  ;;  %v1467_v55 = vadd.f32 %v1459_v62, %v5339_v13  ;;  %v7744_v29 = vld [vmem:[#allocation13_spill] sm:$0xff] }
  0xdf   : > { %v1468_v61 = vadd.f32 %v1460_v9, %v5349_v21  ;;  %v1469_v31 = vadd.f32 %v1461_v2, %v5359_v28  ;;  %v1470_v15 = vadd.f32 %v1462_v40, %v5369_v33  ;;  %v1472_v6 = vadd.f32 %v1464_v19, %v7736_v25 }
  0xe0   : > { %v1471_v46 = vadd.f32 %v1463_v60, %v5379_v38  ;;  %v1473_v59 = vadd.f32 %v1465_v14, %v7737_v5  ;;  %v1474_v32 = vadd.f32 %v1466_v18, %v7738_v34  ;;  %v1475_v54 = vadd.f32 %v1467_v55, %v7739_v22 }
  0xe1   : > { %v1476_v47 = vadd.f32 %v1468_v61, %v7740_v17  ;;  %v1477_v62 = vadd.f32 %v1469_v31, %v7741_v37  ;;  %v1478_v9 = vadd.f32 %v1470_v15, %v7742_v50  ;;  %v7482_v40 = vrot.slane %v7695_v1, 2 }
  0xe2   : > { %v1479_v2 = vadd.f32 %v1471_v46, %v7743_v56  ;;  %v7483_v60 = vrot.slane %v7696_v36, 2  ;;  %v7487_v19 = vrot.slane %v7744_v29, 2  ;;  %v7484_v14 = vrot.slane %v7697_v4, 2 }
  0xe3   : > { %v7486_v18 = vrot.slane %v7698_v24, 2  ;;  %v7485_v55 = vrot.slane %v7699_v42, 2  ;;  %v1496_v15 = vadd.f32 %v7482_v40, %v1472_v6  ;;  %v7745_v31 = vrot.slane %v7700_v20, 2 }
  0xe4   : > { %v1497_v46 = vadd.f32 %v7483_v60, %v1473_v59  ;;  %v1498_v49 = vadd.f32 %v7487_v19, %v1474_v32  ;;  %v1499_v30 = vadd.f32 %v7484_v14, %v1475_v54  ;;  %v7746_v6 = vrot.slane %v7701_v63, 2 }
  0xe5   : > { %v1500_v8 = vadd.f32 %v7486_v18, %v1476_v47  ;;  %v1501_v61 = vadd.f32 %v7485_v55, %v1477_v62  ;;  %v1502_v57 = vadd.f32 %v7745_v31, %v1478_v9  ;;  %v7488_v59 = vrot.slane %v7695_v1, 3 }
  0xe6   : > { %v1503_v40 = vadd.f32 %v7746_v6, %v1479_v2  ;;  %v7489_v60 = vrot.slane %v7696_v36, 3  ;;  %v7490_v32 = vrot.slane %v7744_v29, 3  ;;  %v7492_v54 = vrot.slane %v7697_v4, 3 }
  0xe7   : > { %v7494_v14 = vrot.slane %v7698_v24, 3  ;;  %v7496_v47 = vrot.slane %v7699_v42, 3  ;;  %v7498_v62 = vrot.slane %v7700_v20, 3  ;;  %v1520_v9 = vadd.f32 %v7488_v59, %v1496_v15 }
  0xe8   : > { %v1521_v2 = vadd.f32 %v7489_v60, %v1497_v46  ;;  %v1522_v31 = vadd.f32 %v7490_v32, %v1498_v49  ;;  %v1523_v6 = vadd.f32 %v7492_v54, %v1499_v30  ;;  %v7747_v15 = vrot.slane %v7701_v63, 3  ;;  %v7748_v49 = vld [vmem:[#allocation67_spill] sm:$0xff]  ;;  %v7750_v54 = vld [vmem:[#allocation69_spill] sm:$0xff] }
  0xe9   : > { %v1524_v18 = vadd.f32 %v7494_v14, %v1500_v8  ;;  %v1525_v19 = vadd.f32 %v7496_v47, %v1501_v61  ;;  %v1526_v55 = vadd.f32 %v7498_v62, %v1502_v57  ;;  %v1528_v46 = vadd.f32 %v1520_v9, %v5818_v48  ;;  %v7751_v8 = vld [vmem:[#allocation70_spill] sm:$0xff]  ;;  %v7753_v47 = vld [vmem:[#allocation72_spill] sm:$0xff]  ;;  %v7754_v57 = vld [vmem:[#allocation73_spill] sm:$0xff] }
  0xea   : > { %v1527_v59 = vadd.f32 %v7747_v15, %v1503_v40  ;;  %v1529_v60 = vadd.f32 %v1521_v2, %v5821_v35  ;;  %v1530_v32 = vadd.f32 %v1522_v31, %v7748_v49  ;;  %v1531_v30 = vadd.f32 %v1523_v6, %v7749_v58  ;;  %v7756_v15 = vld [vmem:[#allocation75_spill] sm:$0xff]  ;;  %v7757_v48 = vld [vmem:[#allocation76_spill] sm:$0xff]  ;;  %v7758_v35 = vld [vmem:[#allocation77_spill] sm:$0xff] }
  0xeb   : > { %v1532_v52 = vadd.f32 %v1524_v18, %v7750_v54  ;;  %v1533_v14 = vadd.f32 %v1525_v19, %v7751_v8  ;;  %v1534_v61 = vadd.f32 %v1526_v55, %v7752_v10  ;;  %v1536_v62 = vadd.f32 %v1528_v46, %v7754_v57  ;;  %v7759_v49 = vld [vmem:[#allocation78_spill] sm:$0xff]  ;;  %v7760_v58 = vld [vmem:[#allocation79_spill] sm:$0xff]  ;;  %v7761_v54 = vld [vmem:[#allocation80_spill] sm:$0xff] }
  0xec   : > { %v1535_v23 = vadd.f32 %v1527_v59, %v7753_v47  ;;  %v1537_v40 = vadd.f32 %v1529_v60, %v7755_v11  ;;  %v1538_v9 = vadd.f32 %v1530_v32, %v7756_v15  ;;  %v1539_v2 = vadd.f32 %v1531_v30, %v7757_v48 }
  0xed   : > { %v1540_v31 = vadd.f32 %v1532_v52, %v7758_v35  ;;  %v1541_v6 = vadd.f32 %v1533_v14, %v7759_v49  ;;  %v1542_v18 = vadd.f32 %v1534_v61, %v7760_v58  ;;  %v1544_v55 = vadd.f32 %v1536_v62, %v7695_v1  ;;  %v7762_v49 = vld [vmem:[#allocation57_spill] sm:$0xff]  ;;  %v7763_v62 = vld [vmem:[#allocation59_spill] sm:$0xff] }
  0xee   : > { %v1543_v19 = vadd.f32 %v1535_v23, %v7761_v54  ;;  %v1545_v59 = vadd.f32 %v1537_v40, %v7696_v36  ;;  %v1546_v46 = vadd.f32 %v1538_v9, %v7744_v29  ;;  %v1547_v60 = vadd.f32 %v1539_v2, %v7697_v4  ;;  %v7766_v2 = vld [vmem:[#allocation61_spill] sm:$0xff] }
  0xef   : > { %v1548_v32 = vadd.f32 %v1540_v31, %v7698_v24  ;;  %v1549_v30 = vadd.f32 %v1541_v6, %v7699_v42  ;;  %v1550_v52 = vadd.f32 %v1542_v18, %v7700_v20  ;;  %v6279_v61 = vadd.f32 %v1544_v55, %v7762_v49 }
  0xf0   : > { %v1551_v14 = vadd.f32 %v1543_v19, %v7701_v63  ;;  %v6282_v23 = vadd.f32 %v1545_v59, %v7703_v45  ;;  %v6285_v40 = vadd.f32 %v1546_v46, %v7763_v62  ;;  %v6288_v9 = vadd.f32 %v1547_v60, %v7704_v41 }
  0xf1   : > { %v6291_v31 = vadd.f32 %v1548_v32, %v7766_v2  ;;  %v6294_v6 = vadd.f32 %v1549_v30, %v7706_v53  ;;  %v6297_v18 = vadd.f32 %v1550_v52, %v7707_v27  ;;  %v1861_v55 = vadd.f32 %v7736_v25, %v5309_v3 }
  0xf2   : > { %7764 = vst [vmem:[#allocation41_spill] sm:$0xff] %v6285_v40  ;;  %7765 = vst [vmem:[#allocation42_spill] sm:$0xff] %v6288_v9  ;;  %v6300_v19 = vadd.f32 %v1551_v14, %v7708_v39  ;;  %v1862_v59 = vadd.f32 %v7737_v5, %v5319_v16  ;;  %v1863_v46 = vadd.f32 %v7738_v34, %v5329_v7 }
  0xf3   : > { %7767 = vst [vmem:[#allocation44_spill] sm:$0xff] %v6291_v31  ;;  %7768 = vst [vmem:[#allocation45_spill] sm:$0xff] %v6294_v6  ;;  %v1864_v60 = vadd.f32 %v7739_v22, %v5339_v13  ;;  %v1865_v32 = vadd.f32 %v7740_v17, %v5349_v21  ;;  %v1866_v30 = vadd.f32 %v7741_v37, %v5359_v28  ;;  %v7771_v6 = vld [vmem:[#allocation47_spill] sm:$0xff]  ;;  %v7772_v31 = vld [vmem:[#allocation48_spill] sm:$0xff] }
  0xf4   : > { %7769 = vst [vmem:[#allocation46_spill] sm:$0xff] %v6297_v18  ;;  %7770 = vst [vmem:[#allocation9_spill] sm:$0xff] %v6300_v19  ;;  %v1867_v52 = vadd.f32 %v7742_v50, %v5369_v33  ;;  %v1868_v25 = vadd.f32 %v7743_v56, %v5379_v38  ;;  %v1869_v5 = vadd.f32 %v1861_v55, %v7676_v43  ;;  %v7773_v50 = vrot.slane %v5309_v3, 3 }
  0xf5   : > { %v1870_v14 = vadd.f32 %v1862_v59, %v7677_v51  ;;  %v1871_v19 = vadd.f32 %v1863_v46, %v7730_v12  ;;  %v1872_v22 = vadd.f32 %v1864_v60, %v7678_v44  ;;  %v1873_v18 = vadd.f32 %v1865_v32, %v7679_v26 }
  0xf6   : > { %v1874_v17 = vadd.f32 %v1866_v30, %v7680_v0  ;;  %v1875_v37 = vadd.f32 %v1867_v52, %v7771_v6  ;;  %v1876_v9 = vadd.f32 %v1868_v25, %v7772_v31  ;;  %v1877_v40 = vadd.f32 %v1869_v5, %v7773_v50 }
  0xf7   : > { %v7774_v56 = vrot.slane %v5319_v16, 3  ;;  %v7775_v51 = vrot.slane %v5329_v7, 3  ;;  %v7776_v59 = vrot.slane %v5339_v13, 3  ;;  %v7777_v26 = vrot.slane %v5349_v21, 3 }
  0xf8   : > { %v7778_v0 = vrot.slane %v5359_v28, 3  ;;  %v7779_v31 = vrot.slane %v5369_v33, 3  ;;  %v7780_v32 = vrot.slane %v5379_v38, 3  ;;  %v7781_v52 = vrot.slane %v5309_v3, 4 }
  0xf9   : > { %v1878_v43 = vadd.f32 %v1870_v14, %v7774_v56  ;;  %v1879_v55 = vadd.f32 %v1871_v19, %v7775_v51  ;;  %v1880_v44 = vadd.f32 %v1872_v22, %v7776_v59  ;;  %v1881_v46 = vadd.f32 %v1873_v18, %v7777_v26  ;;  %v7790_v26 = vld [vmem:[#allocation50_spill] sm:$0xff] }
  0xfa   : > { %v1882_v6 = vadd.f32 %v1874_v17, %v7778_v0  ;;  %v1883_v60 = vadd.f32 %v1875_v37, %v7779_v31  ;;  %v1884_v30 = vadd.f32 %v1876_v9, %v7780_v32  ;;  %v1885_v25 = vadd.f32 %v1877_v40, %v7781_v52  ;;  %v7793_v32 = vld [vmem:[#allocation53_spill] sm:$0xff] }
  0xfb   : > { %v7782_v19 = vrot.slane %v5319_v16, 4  ;;  %v7783_v14 = vrot.slane %v5329_v7, 4  ;;  %v7784_v18 = vrot.slane %v5339_v13, 4  ;;  %v7785_v17 = vrot.slane %v5349_v21, 4  ;;  %v7789_v16 = vld [vmem:[#allocation49_spill] sm:$0xff]  ;;  %v7792_v13 = vld [vmem:[#allocation52_spill] sm:$0xff] }
  0xfc   : > { %v7786_v37 = vrot.slane %v5359_v28, 4  ;;  %v7787_v9 = vrot.slane %v5369_v33, 4  ;;  %v7788_v3 = vrot.slane %v5379_v38, 4  ;;  %v7795_v28 = vld [vmem:[#allocation55_spill] sm:$0xff] }
  0xfd   : > { %v1886_v5 = vadd.f32 %v1878_v43, %v7782_v19  ;;  %v1887_v22 = vadd.f32 %v1879_v55, %v7783_v14  ;;  %v1888_v50 = vadd.f32 %v1880_v44, %v7784_v18  ;;  %v1889_v56 = vadd.f32 %v1881_v46, %v7785_v17  ;;  %v7791_v55 = vld [vmem:[#allocation51_spill] sm:$0xff]  ;;  %v7794_v46 = vld [vmem:[#allocation54_spill] sm:$0xff]  ;;  %v7796_v19 = vld [vmem:[#allocation56_spill] sm:$0xff] }
  0xfe   : > { %v1890_v51 = vadd.f32 %v1882_v6, %v7786_v37  ;;  %v1891_v59 = vadd.f32 %v1883_v60, %v7787_v9  ;;  %v1892_v40 = vadd.f32 %v1884_v30, %v7788_v3  ;;  %v1893_v43 = vadd.f32 %v1885_v25, %v7789_v16 }
  0xff   : > { %v1894_v0 = vadd.f32 %v1886_v5, %v7790_v26  ;;  %v1895_v31 = vadd.f32 %v1887_v22, %v7791_v55  ;;  %v1896_v44 = vadd.f32 %v1888_v50, %v7792_v13  ;;  %v1897_v21 = vadd.f32 %v1889_v56, %v7793_v32 }
 0x100   : > { %v1898_v52 = vadd.f32 %v1890_v51, %v7794_v46  ;;  %v1899_v6 = vadd.f32 %v1891_v59, %v7795_v28  ;;  %v1900_v33 = vadd.f32 %v1892_v40, %v7796_v19  ;;  %v1901_v60 = vadd.f32 %v1893_v43, %v7695_v1  ;;  %v4702_v28 = vld [vmem:[#allocation3 + $0x154] ss:$24 sps:$4 sm:$0xff]   ;;  %v4705_v19 = vld [vmem:[#allocation3 + $0x124] ss:$24 sps:$4 sm:$0xff]  }
 0x101   : > { %v1902_v38 = vadd.f32 %v1894_v0, %v7696_v36  ;;  %v1903_v30 = vadd.f32 %v1895_v31, %v7744_v29  ;;  %v1904_v25 = vadd.f32 %v1896_v44, %v7697_v4  ;;  %v1905_v5 = vadd.f32 %v1897_v21, %v7698_v24  ;;  %3330 = vmatprep.subr.bf16.mxu0 %v4702_v28  ;;  %v7827_v28 = vld [vmem:[#allocation25_spill] sm:$0xff] }
 0x102   : > { %v1906_v14 = vadd.f32 %v1898_v52, %v7699_v42  ;;  %v1907_v22 = vadd.f32 %v1899_v6, %v7700_v20  ;;  %v1908_v18 = vadd.f32 %v1900_v33, %v7701_v63  ;;  %v1909_v50 = vadd.f32 %v1901_v60, %v7762_v49  ;;  %v4704_v6 = vld [vmem:[#allocation3 + $0x150] ss:$24 sps:$4 sm:$0xff]  }
 0x103   : > { %v1910_v17 = vadd.f32 %v1902_v38, %v7703_v45  ;;  %v1911_v56 = vadd.f32 %v1903_v30, %v7763_v62  ;;  %v1912_v37 = vadd.f32 %v1904_v25, %v7704_v41  ;;  %v1913_v51 = vadd.f32 %v1905_v5, %v7766_v2  ;;  %3331 = vmatpush1.bf16.msra.mxu0 %v4704_v6 }
 0x104   : > { %v1914_v9 = vadd.f32 %v1906_v14, %v7706_v53  ;;  %v1915_v59 = vadd.f32 %v1907_v22, %v7707_v27  ;;  %v1916_v3 = vadd.f32 %v1908_v18, %v7708_v39  ;;  %v7797_v40 = vrot.slane %v7695_v1, 2  ;;  %3332 = vmatprep.subr.bf16.mxu0 %v4705_v19 }
 0x105   : > { %v7798_v43 = vrot.slane %v7696_v36, 2  ;;  %v7799_v45 = vrot.slane %v7744_v29, 2  ;;  %v7800_v0 = vrot.slane %v7697_v4, 2  ;;  %v7801_v2 = vrot.slane %v7698_v24, 2 }
 0x106   : > { %v1917_v16 = vadd.f32 %v1909_v50, %v7797_v40  ;;  %v7802_v53 = vrot.slane %v7699_v42, 2  ;;  %v7803_v39 = vrot.slane %v7700_v20, 2  ;;  %v7804_v13 = vrot.slane %v7701_v63, 2 }
 0x107   : > { %v1918_v49 = vadd.f32 %v1910_v17, %v7798_v43  ;;  %v1919_v26 = vadd.f32 %v1911_v56, %v7799_v45  ;;  %v1920_v41 = vadd.f32 %v1912_v37, %v7800_v0  ;;  %v1921_v55 = vadd.f32 %v1913_v51, %v7801_v2  ;;  %v7813_v17 = vld [vmem:[#allocation65_spill] sm:$0xff]  ;;  %v7814_v37 = vld [vmem:[#allocation66_spill] sm:$0xff] }
 0x108   : > { %v1922_v27 = vadd.f32 %v1914_v9, %v7802_v53  ;;  %v1923_v31 = vadd.f32 %v1915_v59, %v7803_v39  ;;  %v1924_v44 = vadd.f32 %v1916_v3, %v7804_v13  ;;  %v7805_v32 = vrot.slane %v7695_v1, 3  ;;  %v7815_v9 = vld [vmem:[#allocation67_spill] sm:$0xff]  ;;  %v7816_v59 = vld [vmem:[#allocation68_spill] sm:$0xff]  ;;  %v7818_v2 = vld [vmem:[#allocation78_spill] sm:$0xff] }
 0x109   : > { %v7806_v46 = vrot.slane %v7696_v36, 3  ;;  %v7807_v33 = vrot.slane %v7744_v29, 3  ;;  %v7808_v38 = vrot.slane %v7697_v4, 3  ;;  %v7809_v25 = vrot.slane %v7698_v24, 3  ;;  %v7817_v24 = vld [vmem:[#allocation69_spill] sm:$0xff]  ;;  %v7819_v53 = vld [vmem:[#allocation10_spill] sm:$0xff] }
 0x10a   : > { %v1925_v21 = vadd.f32 %v1917_v16, %v7805_v32  ;;  %v7810_v14 = vrot.slane %v7699_v42, 3  ;;  %v7811_v1 = vrot.slane %v7700_v20, 3  ;;  %v7812_v36 = vrot.slane %v7701_v63, 3  ;;  %v4707_v16 = vld [vmem:[#allocation3 + $0x120] ss:$24 sps:$4 sm:$0xff]  }
 0x10b   : > { %v1926_v52 = vadd.f32 %v1918_v49, %v7806_v46  ;;  %v1927_v60 = vadd.f32 %v1919_v26, %v7807_v33  ;;  %v1928_v30 = vadd.f32 %v1920_v41, %v7808_v38  ;;  %v1929_v5 = vadd.f32 %v1921_v55, %v7809_v25  ;;  %v4708_v45 = vld [vmem:[#allocation3 + $0xf4] ss:$24 sps:$4 sm:$0xff]   ;;  %3333 = vmatpush1.bf16.msra.mxu0 %v4707_v16  ;;  %v4711_v33 = vld [vmem:[#allocation3 + $0xc4] ss:$24 sps:$4 sm:$0xff]  }
 0x10c   : > { %v1930_v22 = vadd.f32 %v1922_v27, %v7810_v14  ;;  %v1931_v18 = vadd.f32 %v1923_v31, %v7811_v1  ;;  %v1932_v50 = vadd.f32 %v1924_v44, %v7812_v36  ;;  %v1933_v56 = vadd.f32 %v1925_v21, %v7813_v17  ;;  %v7822_v31 = vld [vmem:[#allocation16_spill] sm:$0xff]  ;;  %3334 = vmatprep.subr.bf16.mxu0 %v4708_v45  ;;  %v7828_v1 = vld [vmem:[#allocation26_spill] sm:$0xff]  ;;  %v7829_v36 = vld [vmem:[#allocation27_spill] sm:$0xff] }
 0x10d   : > { %v1934_v51 = vadd.f32 %v1926_v52, %v7814_v37  ;;  %v1935_v4 = vadd.f32 %v1927_v60, %v7815_v9  ;;  %v1936_v3 = vadd.f32 %v1928_v30, %v7816_v59  ;;  %v1937_v40 = vadd.f32 %v1929_v5, %v7817_v24  ;;  %v7824_v44 = vld [vmem:[#allocation20_spill] sm:$0xff]  ;;  %v7831_v37 = vld [vmem:[#allocation29_spill] sm:$0xff] }
 0x10e   : > { %v1938_v42 = vadd.f32 %v1930_v22, %v7751_v8  ;;  %v1939_v20 = vadd.f32 %v1931_v18, %v7752_v10  ;;  %v1940_v63 = vadd.f32 %v1932_v50, %v7753_v47  ;;  %v1941_v43 = vadd.f32 %v1933_v56, %v7754_v57  ;;  %v7820_v57 = vld [vmem:[#allocation12_spill] sm:$0xff] }
 0x10f   : > { %v1942_v49 = vadd.f32 %v1934_v51, %v7755_v11  ;;  %v1943_v26 = vadd.f32 %v1935_v4, %v7756_v15  ;;  %v1944_v0 = vadd.f32 %v1936_v3, %v7757_v48  ;;  %v1945_v41 = vadd.f32 %v1937_v40, %v7758_v35  ;;  %v7821_v11 = vld [vmem:[#allocation14_spill] sm:$0xff]  ;;  %v7826_v46 = vld [vmem:[#allocation24_spill] sm:$0xff]  ;;  %v7834_v40 = vld [vmem:[#allocation31_spill] sm:$0xff] }
 0x110   : > { %v1946_v8 = vadd.f32 %v1938_v42, %v7818_v2  ;;  %v1947_v55 = vadd.f32 %v1939_v20, %v7760_v58  ;;  %v1948_v10 = vadd.f32 %v1940_v63, %v7761_v54  ;;  %v6431_v47 = vadd.f32 %v1941_v43, %v7819_v53  ;;  %v7823_v48 = vld [vmem:[#allocation18_spill] sm:$0xff]  ;;  %v4710_v58 = vld [vmem:[#allocation3 + $0xf0] ss:$24 sps:$4 sm:$0xff]   ;;  %v4714_v63 = vld [vmem:[#allocation3 + $0x94] ss:$24 sps:$4 sm:$0xff]  }
 0x111   : > { %v6434_v27 = vadd.f32 %v1942_v49, %v7820_v57  ;;  %v6437_v39 = vadd.f32 %v1943_v26, %v7821_v11  ;;  %v6440_v13 = vadd.f32 %v1944_v0, %v7822_v31  ;;  %v6443_v35 = vadd.f32 %v1945_v41, %v7823_v48  ;;  %v7825_v54 = vld [vmem:[#allocation22_spill] sm:$0xff]  ;;  %v7830_v17 = vld [vmem:[#allocation28_spill] sm:$0xff]  ;;  %3335 = vmatpush1.bf16.msra.mxu0 %v4710_v58 }
 0x112   : > { %v6446_v32 = vadd.f32 %v1946_v8, %v7824_v44  ;;  %v6449_v21 = vadd.f32 %v1947_v55, %v7825_v54  ;;  %v6452_v52 = vadd.f32 %v1948_v10, %v7826_v46  ;;  %v1165_v6 = vadd.f32 %v7827_v28, %v7738_v34  ;;  %v4713_v51 = vld [vmem:[#allocation3 + $0xc0] ss:$24 sps:$4 sm:$0xff]   ;;  %v7835_v16 = vld [vmem:[#allocation32_spill] sm:$0xff]  ;;  %3336 = vmatprep.subr.bf16.mxu0 %v4711_v33 }
 0x113   : > { %v6457_v19 = vrot.slane %v7819_v53, 6  ;;  %v6460_v60 = vrot.slane %v7820_v57, 6  ;;  %v6463_v38 = vrot.slane %v7821_v11, 6  ;;  %v6466_v30 = vrot.slane %v7822_v31, 6  ;;  %v7833_v3 = vld [vmem:[#allocation30_spill] sm:$0xff] }
 0x114   : > { %v6469_v25 = vrot.slane %v7823_v48, 6  ;;  %v1173_v5 = vadd.f32 %v1165_v6, %v7730_v12  ;;  %v6473_v34 = vrot.slane %v7824_v44, 6  ;;  %v6476_v14 = vrot.slane %v7825_v54, 6 }
 0x115   : > { %v6479_v22 = vrot.slane %v7826_v46, 6  ;;  %v1259_v18 = vadd.f32 %v6457_v19, %v7828_v1  ;;  %v1260_v50 = vadd.f32 %v6460_v60, %v7829_v36  ;;  %v1262_v56 = vadd.f32 %v6466_v30, %v7830_v17  ;;  %3337 = vmatpush1.bf16.msra.mxu0 %v4713_v51  ;;  %v4720_v1 = vld [vmem:[#allocation3 + $0x64] ss:$24 sps:$4 sm:$0xff]   ;;  %v4725_v51 = vld [vmem:[#allocation3 + $0x60] ss:$24 sps:$4 sm:$0xff]  }
 0x116   : > { %v1263_v12 = vadd.f32 %v6469_v25, %v7831_v37  ;;  %v7832_v4 = vrot.slane %v5329_v7, 5  ;;  %v1264_v24 = vadd.f32 %v6473_v34, %v7833_v3  ;;  %v1265_v42 = vadd.f32 %v6476_v14, %v7834_v40  ;;  %3338 = vmatprep.subr.bf16.mxu0 %v4714_v63 }
 0x117   : > { %v1266_v20 = vadd.f32 %v6479_v22, %v7835_v16  ;;  %v6498_v43 = vrot.slane %v7819_v53, 7  ;;  %v6501_v49 = vrot.slane %v7820_v57, 7  ;;  %v6504_v7 = vrot.slane %v7821_v11, 7 }
 0x118   : > { %v1181_v59 = vadd.f32 %v1173_v5, %v7832_v4  ;;  %v6507_v45 = vrot.slane %v7822_v31, 7  ;;  %v6511_v0 = vrot.slane %v7823_v48, 7  ;;  %v6514_v41 = vrot.slane %v7824_v44, 7  ;;  %v4726_v4 = vld [vmem:[#allocation3 + $0x34] ss:$24 sps:$4 sm:$0xff]  }
 0x119   : > { %v6517_v2 = vrot.slane %v7825_v54, 7  ;;  %v6520_v8 = vrot.slane %v7826_v46, 7  ;;  %v1283_v55 = vadd.f32 %v6498_v43, %v1259_v18  ;;  %v1284_v10 = vadd.f32 %v6501_v49, %v1260_v50 }
 0x11a   : > { %v1189_v26 = vadd.f32 %v1181_v59, %v7815_v9  ;;  %v1286_v58 = vadd.f32 %v6507_v45, %v1262_v56  ;;  %v4719_v9 = vld [vmem:[#allocation3 + $0x90] ss:$24 sps:$4 sm:$0xff]   ;;  %v1287_v6 = vadd.f32 %v6511_v0, %v1263_v12  ;;  %v1288_v33 = vadd.f32 %v6514_v41, %v1264_v24 }
 0x11b   : > { %v1289_v5 = vadd.f32 %v6517_v2, %v1265_v42  ;;  %v1290_v36 = vadd.f32 %v6520_v8, %v1266_v20  ;;  %v1291_v18 = vadd.f32 %v1283_v55, %v7819_v53  ;;  %v1292_v50 = vadd.f32 %v1284_v10, %v7820_v57  ;;  %3339 = vmatpush1.bf16.msra.mxu0 %v4719_v9 }
 0x11c   : > { %v1197_v28 = vadd.f32 %v1189_v26, %v7756_v15  ;;  %v1294_v17 = vadd.f32 %v1286_v58, %v7822_v31  ;;  %v1295_v15 = vadd.f32 %v1287_v6, %v7823_v48  ;;  %v1296_v37 = vadd.f32 %v1288_v33, %v7824_v44  ;;  %3340 = vmatprep.subr.bf16.mxu0 %v4720_v1 }
 0x11d   : > { %v1297_v12 = vadd.f32 %v1289_v5, %v7825_v54  ;;  %v1298_v59 = vadd.f32 %v1290_v36, %v7826_v46  ;;  %v1299_v3 = vmul.f32 0.04, %v1291_v18  ;;  %v1300_v24 = vmul.f32 0.04, %v1292_v50 }
 0x11e   : > { %v1205_v56 = vadd.f32 %v1197_v28, %v7744_v29  ;;  %v1302_v40 = vmul.f32 0.04, %v1294_v17  ;;  %v1303_v16 = vmul.f32 0.04, %v1295_v15  ;;  %v1304_v20 = vmul.f32 0.04, %v1296_v37 }
 0x11f   : > { %v1305_v63 = vmul.f32 0.04, %v1297_v12  ;;  %v1306_v26 = vmul.f32 0.04, %v1298_v59  ;;  %v1307_v55 = vpack.c.bf16 %v1299_v3, %v1299_v3  ;;  %v1308_v10 = vpack.c.bf16 %v1300_v24, %v1300_v24  ;;  %3341 = vmatpush1.bf16.msra.mxu0 %v4725_v51  ;;  %v4732_v59 = vld [vmem:[#allocation3 + $0x4] ss:$24 sps:$4 sm:$0xff]  }
 0x120   : > { %v1213_v42 = vadd.f32 %v1205_v56, %v7763_v62  ;;  %v1310_v58 = vpack.c.bf16 %v1302_v40, %v1302_v40  ;;  %v7836_v28 = vrot.slane %v7744_v29, 4  ;;  %v1311_v33 = vpack.c.bf16 %v1303_v16, %v1303_v16  ;;  %v4731_v62 = vld [vmem:[#allocation3 + $0x30] ss:$24 sps:$4 sm:$0xff]   ;;  %3342 = vmatprep.subr.bf16.mxu0 %v4726_v4 }
 0x121   : > { %v1312_v5 = vpack.c.bf16 %v1304_v20, %v1304_v20  ;;  %v1313_v36 = vpack.c.bf16 %v1305_v63, %v1305_v63  ;;  %v1314_v18 = vpack.c.bf16 %v1306_v26, %v1306_v26  ;;  %v1323_v50 = vunpack.c.l.b16 %v1307_v55  ;;  %v7841_v20 = vld [vmem:[#allocation45_spill] sm:$0xff] }
 0x122   : > { %v1221_v6 = vadd.f32 %v1213_v42, %v7836_v28  ;;  %v1324_v17 = vunpack.c.l.b16 %v1308_v10  ;;  %v6541_v9 = vunpack.c.l.b16 %v1310_v58  ;;  %v7837_v56 = vrot.slane %v7744_v29, 5  ;;  %v4737_v10 = vld [vmem:[#allocation3] ss:$24 sps:$4 sm:$0xff]  }
 0x123   : > { %v6545_v15 = vunpack.c.l.b16 %v1311_v33  ;;  %v6547_v37 = vunpack.c.l.b16 %v1312_v5  ;;  %v6549_v12 = vunpack.c.l.b16 %v1313_v36  ;;  %v6551_v3 = vunpack.c.l.b16 %v1314_v18  ;;  %3343 = vmatpush1.bf16.msra.mxu0 %v4731_v62  ;;  %v4738_v5 = vld [vmem:[#allocation3 + $0x2d4] ss:$24 sps:$4 sm:$0xff]   ;;  %v4749_v42 = vld [vmem:[#allocation3 + $0x2a0] ss:$24 sps:$4 sm:$0xff]  }
 0x124   : > { %v1229_v1 = vadd.f32 %v1221_v6, %v7837_v56  ;;  %v1331_v24 = vrot.slane %v1323_v50, 2  ;;  %v1332_v40 = vrot.slane %v1324_v17, 1  ;;  %v7504_v4 = vrot.slane %v7819_v53, 2  ;;  %3344 = vmatprep.subr.bf16.mxu0 %v4732_v59 }
 0x125   : > { %v7502_v55 = vrot.slane %v7820_v57, 2  ;;  %v7503_v28 = vrot.slane %v7821_v11, 2  ;;  %v7505_v6 = vrot.slane %v7822_v31, 2  ;;  %v7506_v33 = vrot.slane %v7823_v48, 2 }
 0x126   : > { %v1261_v51 = vadd.f32 %v6463_v38, %v1229_v1  ;;  %v1333_v63 = vsel %vm1025_vm1, %v1332_v40, %v1331_v24  ;;  %v7507_v36 = vrot.slane %v7824_v44, 2  ;;  %v7508_v18 = vrot.slane %v7825_v54, 2  ;;  %v7838_v1 = vld [vmem:[#allocation41_spill] sm:$0xff]  ;;  %v7839_v24 = vld [vmem:[#allocation42_spill] sm:$0xff] }
 0x127   : > { %v7509_v50 = vrot.slane %v7826_v46, 2  ;;  %v1576_v17 = vadd.f32 %v7504_v4, %v6279_v61  ;;  %v1577_v56 = vadd.f32 %v7502_v55, %v6282_v23  ;;  %v1578_v59 = vadd.f32 %v7503_v28, %v7838_v1  ;;  %v7843_v55 = vld [vmem:[#allocation9_spill] sm:$0xff]  ;;  %3345 = vmatpush1.bf16.msra.mxu0 %v4737_v10  ;;  %v4744_v4 = vld [vmem:[#allocation3 + $0x2a4] ss:$24 sps:$4 sm:$0xff]  }
 0x128   : > { %v1285_v58 = vadd.f32 %v6504_v7, %v1261_v51  ;;  %v1579_v40 = vadd.f32 %v7505_v6, %v7839_v24  ;;  %v7840_v51 = vld [vmem:[#allocation44_spill] sm:$0xff]  ;;  %v1581_v61 = vadd.f32 %v7507_v36, %v7841_v20  ;;  %v1584_v6 = vrot.slane %v7819_v53, 5  ;;  %3346 = vmatprep.subr.bf16.mxu0 %v4738_v5 }
 0x129   : > { %v1580_v26 = vadd.f32 %v7506_v33, %v7840_v51  ;;  %v1583_v1 = vadd.f32 %v7509_v50, %v7843_v55  ;;  %v4743_v28 = vld [vmem:[#allocation3 + $0x2d0] ss:$24 sps:$4 sm:$0xff]   ;;  %v7510_v51 = vrot.slane %v7820_v57, 5  ;;  %v7511_v33 = vrot.slane %v7821_v11, 5 }
 0x12a   : > { %v1293_v62 = vadd.f32 %v1285_v58, %v7821_v11  ;;  %v7842_v58 = vld [vmem:[#allocation46_spill] sm:$0xff]  ;;  %v1587_v20 = vrot.slane %v7822_v31, 5  ;;  %v7512_v36 = vrot.slane %v7823_v48, 5 }
 0x12b   : > { %v1582_v23 = vadd.f32 %v7508_v18, %v7842_v58  ;;  %v1589_v58 = vrot.slane %v7824_v44, 5  ;;  %v1590_v18 = vrot.slane %v7825_v54, 5  ;;  %v1601_v50 = vadd.f32 %v7510_v51, %v1577_v56  ;;  %3347 = vmatpush2.bf16.msra.mxu0 %v4743_v28 }
 0x12c   : > { %v1301_v24 = vmul.f32 0.04, %v1293_v62  ;;  %v1600_v62 = vadd.f32 %v1584_v6, %v1576_v17  ;;  %v1602_v5 = vadd.f32 %v7511_v33, %v1578_v59  ;;  %v1603_v29 = vadd.f32 %v1587_v20, %v1579_v40  ;;  %3348 = vmatprep.subr.bf16.mxu0 %v4744_v4  ;;  %v4750_v33 = vld [vmem:[#allocation3 + $0x274] ss:$24 sps:$4 sm:$0xff]  }
 0x12d   : > { %v1604_v16 = vadd.f32 %v7512_v36, %v1580_v26  ;;  %v1606_v17 = vadd.f32 %v1590_v18, %v1582_v23  ;;  %v7844_v56 = vrot.slane %v7826_v46, 5  ;;  %v1609_v40 = vadd.f32 %v1601_v50, %v6460_v60 }
 0x12e   : > { %v1309_v55 = vpack.c.bf16 %v1301_v24, %v1301_v24  ;;  %v1605_v24 = vadd.f32 %v1589_v58, %v1581_v61  ;;  %v1608_v59 = vadd.f32 %v1600_v62, %v6457_v19  ;;  %v1610_v26 = vadd.f32 %v1602_v5, %v6463_v38 }
 0x12f   : > { %v1607_v51 = vadd.f32 %v7844_v56, %v1583_v1  ;;  %v1611_v36 = vadd.f32 %v1603_v29, %v6466_v30  ;;  %v1612_v28 = vadd.f32 %v1604_v16, %v6469_v25  ;;  %v1614_v23 = vadd.f32 %v1606_v17, %v6476_v14  ;;  %3349 = vmatpush2.bf16.msra.mxu0 %v4749_v42  ;;  %v4755_v29 = vld [vmem:[#allocation3 + $0x270] ss:$24 sps:$4 sm:$0xff]   ;;  %v4756_v17 = vld [vmem:[#allocation3 + $0x244] ss:$24 sps:$4 sm:$0xff]  }
 0x130   : > { %v1325_v10 = vunpack.c.l.b16 %v1309_v55  ;;  %v1613_v55 = vadd.f32 %v1605_v24, %v6473_v34  ;;  %v7845_v62 = vrot.slane %v6541_v9, 7  ;;  %v6631_v50 = vadd.f32 %v1608_v59, %v6498_v43  ;;  %3350 = vmatprep.subr.bf16.mxu0 %v4750_v33 }
 0x131   : > { %v1615_v1 = vadd.f32 %v1607_v51, %v6479_v22  ;;  %v6634_v5 = vadd.f32 %v1609_v40, %v6501_v49  ;;  %v6637_v16 = vadd.f32 %v1610_v26, %v6504_v7  ;;  %v6643_v51 = vadd.f32 %v1611_v36, %v6507_v45 }
 0x132   : > { %v1334_v61 = vsel %vm1028_vm2, %v1325_v10, %v1333_v63  ;;  %v7846_v63 = vrot.slane %v6545_v15, 6  ;;  %v6646_v9 = vadd.f32 %v1612_v28, %v6511_v0  ;;  %v6649_v24 = vadd.f32 %v1613_v55, %v6514_v41 }
 0x133   : > { %v1336_v4 = vsel %vm1031_vm3, %v7845_v62, %v1334_v61  ;;  %v7847_v56 = vrot.slane %v6547_v37, 5  ;;  %v6655_v59 = vadd.f32 %v1614_v23, %v6517_v2  ;;  %v6658_v15 = vadd.f32 %v1615_v1, %v6520_v8  ;;  %3351 = vmatpush2.bf16.msra.mxu0 %v4755_v29 }
 0x134   : > { %v1338_v10 = vsel %vm1034_vm4, %v7846_v63, %v1336_v4  ;;  %v1632_v36 = vrot.slane %v7819_v53, 1  ;;  %v7848_v40 = vrot.slane %v6549_v12, 4  ;;  %v1633_v28 = vrot.slane %v7820_v57, 1  ;;  %3352 = vmatprep.subr.bf16.mxu0 %v4756_v17 }
 0x135   : > { %v1340_v42 = vsel %vm1037_vm5, %v7847_v56, %v1338_v10  ;;  %v1634_v33 = vrot.slane %v7821_v11, 1  ;;  %v1635_v37 = vrot.slane %v7822_v31, 1  ;;  %v7849_v61 = vrot.slane %v6551_v3, 3 }
 0x136   : > { %v1342_v26 = vsel %vm1040_vm6, %v7848_v40, %v1340_v42  ;;  %v1636_v23 = vrot.slane %v7823_v48, 1  ;;  %v7514_v1 = vrot.slane %v7824_v44, 1  ;;  %v7513_v62 = vrot.slane %v7825_v54, 1  ;;  %v4761_v40 = vld [vmem:[#allocation3 + $0x240] ss:$24 sps:$4 sm:$0xff]  }
 0x137   : > { %v1344_v55 = vsel %vm1043_vm7, %v7849_v61, %v1342_v26  ;;  %v1639_v4 = vrot.slane %v7826_v46, 1  ;;  %v1957_v63 = vadd.f32 %v6431_v47, %v1632_v36  ;;  %v1958_v3 = vadd.f32 %v6434_v27, %v1633_v28  ;;  %3353 = vmatpush2.bf16.msra.mxu0 %v4761_v40  ;;  %v5044_v40 = vld [vmem:[%s5257_s29 + $0x10] sm:$0xff]  }
 0x138   : > { %v1345_v12 = vpack.c.b16 %v1344_v55, %v1344_v55  ;;  %v1959_v10 = vadd.f32 %v6437_v39, %v1634_v33  ;;  %v1960_v29 = vadd.f32 %v6440_v13, %v1635_v37  ;;  %v1961_v56 = vadd.f32 %v6443_v35, %v1636_v23 }
 0x139   : > { %v1962_v47 = vadd.f32 %v6446_v32, %v7514_v1  ;;  %v1963_v27 = vadd.f32 %v6449_v21, %v7513_v62  ;;  %v1964_v39 = vadd.f32 %v6452_v52, %v1639_v4  ;;  %v7850_v13 = vrot.slane %v7819_v53, 2  ;;  %v6714_v52 = vld [vmem:[%s7283_s1] sm:$0xff]  }
 0x13a   : > { %4631 = vmatmul.mubr.msk.bf16.vlgmr.msra.gmra.mxu1 %vm1052_vm8, %v1345_v12  ;;  %v7851_v42 = vrot.slane %v7820_v57, 2  ;;  %v7852_v26 = vrot.slane %v7821_v11, 2  ;;  %v7853_v61 = vrot.slane %v7822_v31, 2  ;;  %v7854_v12 = vrot.slane %v7823_v48, 2 }
 0x13b   : > { %v1965_v17 = vadd.f32 %v1957_v63, %v7850_v13  ;;  %v7855_v62 = vrot.slane %v7824_v44, 2  ;;  %4635 = vmatpush3.bf16.msra.mxu1 %v6714_v52  ;;  %v7856_v63 = vrot.slane %v7825_v54, 2 }
 0x13c   : > { %v1966_v35 = vadd.f32 %v1958_v3, %v7851_v42  ;;  %v1967_v32 = vadd.f32 %v1959_v10, %v7852_v26  ;;  %v1968_v55 = vadd.f32 %v1960_v29, %v7853_v61  ;;  %v1969_v21 = vadd.f32 %v1961_v56, %v7854_v12 }
 0x13d   : > { %v1970_v1 = vadd.f32 %v1962_v47, %v7855_v62  ;;  %v1971_v3 = vadd.f32 %v1963_v27, %v7856_v63  ;;  %v7857_v10 = vrot.slane %v7826_v46, 2  ;;  %v1973_v29 = vadd.f32 %v1965_v17, %v1584_v6 }
 0x13e   : > { %v7858_v56 = vrot.slane %v7820_v57, 5  ;;  %v7859_v62 = vmov 0.0   ;;  %v7860_v47 = vrot.slane %v7821_v11, 5  ;;  %v1976_v61 = vadd.f32 %v1968_v55, %v1587_v20 }
 0x13f   : > { %v1972_v13 = vadd.f32 %v1964_v39, %v7857_v10  ;;  %4636 = vmatprep.mubr.msk.bf16.mxu1 %vm5144_vm0, %v7859_v62  ;;  %v7861_v27 = vrot.slane %v7823_v48, 5  ;;  %v1978_v39 = vadd.f32 %v1970_v1, %v1589_v58  ;;  %4640 = vmatprep.subr.bf16.mxu1 %v7859_v62  ;;  %v1979_v6 = vadd.f32 %v1971_v3, %v1590_v18 }
 0x140   : > { %v1974_v42 = vadd.f32 %v1966_v35, %v7858_v56  ;;  %v1975_v26 = vadd.f32 %v1967_v32, %v7860_v47  ;;  %v7862_v17 = vrot.slane %v7826_v46, 5  ;;  %v1981_v32 = vadd.f32 %v1973_v29, %v6457_v19  ;;  %v5047_v29 = vld [vmem:[%s5257_s29 + $0xb8] sm:$0xff]  }
 0x141   : > { %v1977_v12 = vadd.f32 %v1969_v21, %v7861_v27  ;;  %v1984_v21 = vadd.f32 %v1976_v61, %v6466_v30  ;;  %v1986_v1 = vadd.f32 %v1978_v39, %v6473_v34  ;;  %v1987_v18 = vadd.f32 %v1979_v6, %v6476_v14 }
 0x142   : > { %v1980_v35 = vadd.f32 %v1972_v13, %v7862_v17  ;;  %v1982_v20 = vadd.f32 %v1974_v42, %v6460_v60  ;;  %v1983_v55 = vadd.f32 %v1975_v26, %v6463_v38  ;;  %v6749_v19 = vadd.f32 %v1981_v32, %v6498_v43  ;;  %v283_v38 = vld [vmem:[%s5257_s29 + $0x30] ss:$56 sps:$4 sm:$0xff]   ;;  %v5046_v13 = vld [vmem:[%s5257_s29 + $0x80] sm:$0xff]  }
 0x143   : > { %v1985_v58 = vadd.f32 %v1977_v12, %v6469_v25  ;;  %v6759_v25 = vadd.f32 %v1984_v21, %v6507_v45  ;;  %v6765_v14 = vadd.f32 %v1986_v1, %v6514_v41  ;;  %v6769_v43 = vadd.f32 %v1987_v18, %v6517_v2 }
 0x144   : > { %v1988_v63 = vadd.f32 %v1980_v35, %v6479_v22  ;;  %v6752_v60 = vadd.f32 %v1982_v20, %v6501_v49  ;;  %v6756_v30 = vadd.f32 %v1983_v55, %v6504_v7  ;;  %v311_v22 = vld [vmem:[%s5257_s29 + $0xa0] ss:$56 sps:$4 sm:$0xff]   ;;  %v4460_v3 = vunpack.c.h.bf16 %v5044_v40  ;;  %v5045_v7 = vld [vmem:[%s5257_s29 + $0x48] sm:$0xff]  }
 0x145   : > { %v6762_v34 = vadd.f32 %v1985_v58, %v6511_v0  ;;  %v4480_v10 = vunpack.c.h.bf16 %v5045_v7  ;;  %v4500_v45 = vunpack.c.h.bf16 %v5046_v13  ;;  %v4520_v56 = vunpack.c.h.bf16 %v5047_v29 }
 0x146   : > { %v6772_v49 = vadd.f32 %v1988_v63, %v6520_v8  ;;  %v339_v0 = vunpack.c.l.bf16 %v283_v38  ;;  %v353_v42 = vunpack.c.h.bf16 %v283_v38  ;;  %v367_v47 = vunpack.c.l.bf16 %v311_v22 }
 0x147   : > { %v381_v41 = vunpack.c.h.bf16 %v311_v22  ;;  %v6778_v26 = vmax.f32 %v4460_v3, 0.0  ;;  %v6780_v61 = vmax.f32 %v4480_v10, 0.0  ;;  %v6786_v27 = vmax.f32 %v4500_v45, 0.0 }
 0x148   : > { %v6782_v2 = vmax.f32 %v339_v0, 0.0  ;;  %v6784_v8 = vmax.f32 %v353_v42, 0.0  ;;  %v6788_v12 = vmax.f32 %v4520_v56, 0.0  ;;  %v6790_v39 = vmax.f32 %v367_v47, 0.0 }
 0x149   : > { %v6792_v6 = vmax.f32 %v381_v41, 0.0  ;;  %v1624_v17 = vadd.f32 %v6631_v50, %v7819_v53  ;;  %v1625_v35 = vadd.f32 %v6634_v5, %v7820_v57  ;;  %v1626_v32 = vadd.f32 %v6637_v16, %v7821_v11 }
 0x14a   : > { %v1627_v20 = vadd.f32 %v6643_v51, %v7822_v31  ;;  %v1628_v55 = vadd.f32 %v6646_v9, %v7823_v48  ;;  %v1629_v21 = vadd.f32 %v6649_v24, %v7824_v44  ;;  %v1630_v58 = vadd.f32 %v6655_v59, %v7825_v54 }
 0x14b   : > { %v1631_v50 = vadd.f32 %v6658_v15, %v7826_v46  ;;  %v1648_v5 = vadd.f32 %v1632_v36, %v1624_v17  ;;  %v1649_v16 = vadd.f32 %v1633_v28, %v1625_v35  ;;  %v1650_v51 = vadd.f32 %v1634_v33, %v1626_v32 }
 0x14c   : > { %v1651_v9 = vadd.f32 %v1635_v37, %v1627_v20  ;;  %v1652_v24 = vadd.f32 %v1636_v23, %v1628_v55  ;;  %v7863_v59 = vrot.slane %v7824_v44, 1  ;;  %v7864_v15 = vrot.slane %v7825_v54, 1 }
 0x14d   : > { %v1655_v53 = vadd.f32 %v1639_v4, %v1631_v50  ;;  %v1664_v57 = vrot.slane %v6778_v26, 4  ;;  %v1665_v11 = vrot.slane %v6782_v2, 4  ;;  %v1666_v36 = vrot.slane %v6780_v61, 4 }
 0x14e   : > { %v1653_v1 = vadd.f32 %v7863_v59, %v1629_v21  ;;  %v1654_v18 = vadd.f32 %v7864_v15, %v1630_v58  ;;  %v1667_v31 = vrot.slane %v6784_v8, 4  ;;  %v1668_v48 = vrot.slane %v6786_v27, 4 }
 0x14f   : > { %v1669_v28 = vrot.slane %v6790_v39, 4  ;;  %v1670_v44 = vrot.slane %v6788_v12, 4  ;;  %v1671_v54 = vrot.slane %v6792_v6, 4  ;;  %v1680_v46 = vadd.f32 %v1664_v57, %v1648_v5 }
 0x150   : > { %v1681_v33 = vadd.f32 %v1665_v11, %v1649_v16  ;;  %v1682_v37 = vadd.f32 %v1666_v36, %v1650_v51  ;;  %v1683_v23 = vadd.f32 %v1667_v31, %v1651_v9  ;;  %v1684_v4 = vadd.f32 %v1668_v48, %v1652_v24 }
 0x151   : > { %v1685_v63 = vadd.f32 %v1669_v28, %v1653_v1  ;;  %v1686_v38 = vadd.f32 %v1670_v44, %v1654_v18  ;;  %v1687_v22 = vadd.f32 %v1671_v54, %v1655_v53  ;;  %v1688_v40 = vrot.slane %v6778_v26, 5 }
 0x152   : > { %v1689_v3 = vrot.slane %v6782_v2, 5  ;;  %v1690_v7 = vrot.slane %v6780_v61, 5  ;;  %v1691_v10 = vrot.slane %v6784_v8, 5  ;;  %v1692_v13 = vrot.slane %v6786_v27, 5 }
 0x153   : > { %v7533_v45 = vrot.slane %v6790_v39, 5  ;;  %v7532_v29 = vrot.slane %v6788_v12, 5  ;;  %v7531_v56 = vrot.slane %v6792_v6, 5  ;;  %v1704_v0 = vadd.f32 %v1688_v40, %v1680_v46 }
 0x154   : > { %v1705_v42 = vadd.f32 %v1689_v3, %v1681_v33  ;;  %v1706_v47 = vadd.f32 %v1690_v7, %v1682_v37  ;;  %v1707_v41 = vadd.f32 %v1691_v10, %v1683_v23  ;;  %v1708_v17 = vadd.f32 %v1692_v13, %v1684_v4 }
 0x155   : > { %v1709_v35 = vadd.f32 %v7533_v45, %v1685_v63  ;;  %v1710_v32 = vadd.f32 %v7532_v29, %v1686_v38  ;;  %v1711_v20 = vadd.f32 %v7531_v56, %v1687_v22  ;;  %v7530_v55 = vrot.slane %v6778_v26, 6 }
 0x156   : > { %v7529_v21 = vrot.slane %v6782_v2, 6  ;;  %v7528_v58 = vrot.slane %v6780_v61, 6  ;;  %v7527_v50 = vrot.slane %v6784_v8, 6  ;;  %v7526_v5 = vrot.slane %v6786_v27, 6 }
 0x157   : > { %v7525_v16 = vrot.slane %v6790_v39, 6  ;;  %v7524_v51 = vrot.slane %v6788_v12, 6  ;;  %v7515_v9 = vrot.slane %v6792_v6, 6  ;;  %v1728_v24 = vadd.f32 %v7530_v55, %v1704_v0 }
 0x158   : > { %v1729_v59 = vadd.f32 %v7529_v21, %v1705_v42  ;;  %v1730_v1 = vadd.f32 %v7528_v58, %v1706_v47  ;;  %v1731_v15 = vadd.f32 %v7527_v50, %v1707_v41  ;;  %v1732_v18 = vadd.f32 %v7526_v5, %v1708_v17  ;;  %v319_v5 = vld [vmem:[%s5257_s29 + $0xc0] sm:$0x1] }
 0x159   : > { %v1733_v53 = vadd.f32 %v7525_v16, %v1709_v35  ;;  %v1734_v46 = vadd.f32 %v7524_v51, %v1710_v32  ;;  %v1735_v33 = vadd.f32 %v7515_v9, %v1711_v20  ;;  %v7523_v37 = vrot.slane %v6778_v26, 7  ;;  %v298_v51 = vld [vmem:[%s5257_s29 + $0x6c] sm:$0x1] }
 0x15a   : > { %v7516_v23 = vrot.slane %v6782_v2, 7  ;;  %v7522_v4 = vrot.slane %v6780_v61, 7  ;;  %v7517_v63 = vrot.slane %v6784_v8, 7  ;;  %v7521_v38 = vrot.slane %v6786_v27, 7 }
 0x15b   : > { %v7519_v22 = vrot.slane %v6790_v39, 7  ;;  %v7518_v0 = vrot.slane %v6788_v12, 7  ;;  %v7520_v42 = vrot.slane %v6792_v6, 7  ;;  %v1752_v47 = vadd.f32 %v7523_v37, %v1728_v24 }
 0x15c   : > { %v1753_v41 = vadd.f32 %v7516_v23, %v1729_v59  ;;  %v1754_v17 = vadd.f32 %v7522_v4, %v1730_v1  ;;  %v1755_v35 = vadd.f32 %v7517_v63, %v1731_v15  ;;  %v1756_v32 = vadd.f32 %v7521_v38, %v1732_v18 }
 0x15d   : > { %v1757_v20 = vadd.f32 %v7519_v22, %v1733_v53  ;;  %v1758_v9 = vadd.f32 %v7518_v0, %v1734_v46  ;;  %v1759_v24 = vadd.f32 %v7520_v42, %v1735_v33  ;;  %v1760_v59 = vadd.f32 %v1752_v47, %v6778_v26 }
 0x15e   : > { %v1761_v23 = vadd.f32 %v1753_v41, %v6782_v2  ;;  %v1762_v1 = vadd.f32 %v1754_v17, %v6780_v61  ;;  %v1763_v15 = vadd.f32 %v1755_v35, %v6784_v8  ;;  %v1764_v63 = vadd.f32 %v1756_v32, %v6786_v27 }
 0x15f   : > { %v1765_v18 = vadd.f32 %v1757_v20, %v6790_v39  ;;  %v1766_v53 = vadd.f32 %v1758_v9, %v6788_v12  ;;  %v1767_v46 = vadd.f32 %v1759_v24, %v6792_v6  ;;  %v1768_v0 = vmul.f32 0.04, %v1760_v59  ;;  %v277_v9 = vld [vmem:[%s5257_s29 + $0x18] sm:$0x1] }
 0x160   : > { %v1769_v22 = vmul.f32 0.04, %v1761_v23  ;;  %v1770_v33 = vmul.f32 0.04, %v1762_v1  ;;  %v1771_v47 = vmul.f32 0.04, %v1763_v15  ;;  %v333_v50 = vunpack.c.l.bf16 %v277_v9 }
 0x161   : > { %v1772_v42 = vmul.f32 0.04, %v1764_v63  ;;  %v1773_v41 = vmul.f32 0.04, %v1765_v18  ;;  %v1774_v38 = vmul.f32 0.04, %v1766_v53  ;;  %v1776_v35 = vpack.c.bf16 %v1768_v0, %v1768_v0 }
 0x162   : > { %v1775_v17 = vmul.f32 0.04, %v1767_v46  ;;  %v1777_v32 = vpack.c.bf16 %v1769_v22, %v1769_v22  ;;  %v1778_v20 = vpack.c.bf16 %v1770_v33, %v1770_v33  ;;  %v1779_v4 = vpack.c.bf16 %v1771_v47, %v1771_v47  ;;  %v284_v15 = vld [vmem:[%s5257_s29 + $0x34] sm:$0x1]  ;;  %v291_v0 = vld [vmem:[%s5257_s29 + $0x50] sm:$0x1] }
 0x163   : > { %v1780_v37 = vpack.c.bf16 %v1772_v42, %v1772_v42  ;;  %v1781_v24 = vpack.c.bf16 %v1773_v41, %v1773_v41  ;;  %v1782_v23 = vpack.c.bf16 %v1774_v38, %v1774_v38  ;;  %v1792_v1 = vunpack.c.l.b16 %v1776_v35  ;;  %v305_v22 = vld [vmem:[%s5257_s29 + $0x88] sm:$0x1]  ;;  %v312_v42 = vld [vmem:[%s5257_s29 + $0xa4] sm:$0x1]  ;;  %v326_v35 = vld [vmem:[%s5257_s29 + $0xdc] sm:$0x1] }
 0x164   : > { %v1783_v59 = vpack.c.bf16 %v1775_v17, %v1775_v17  ;;  %v1793_v63 = vunpack.c.l.b16 %v1777_v32  ;;  %v1794_v18 = vunpack.c.l.b16 %v1778_v20  ;;  %v1795_v53 = vunpack.c.l.b16 %v1779_v4  ;;  %s260_s29 = sand.u32 1, %s5130_s22  }
 0x165   : > { %v1796_v46 = vunpack.c.l.b16 %v1780_v37  ;;  %v1797_v16 = vunpack.c.l.b16 %v1781_v24  ;;  %v1800_v47 = vrot.slane %v1792_v1, 6  ;;  %v1798_v41 = vunpack.c.l.b16 %v1782_v23  ;;  %s4191_s9 = sshll.u32 %s260_s29, 3  ;;  %s4101_s16 = scalar_lea.sflag [#allocation5], %s260_s29 }
 0x166   : > { %v1799_v33 = vunpack.c.l.b16 %v1783_v59  ;;  %v1801_v58 = vrot.slane %v1793_v63, 5  ;;  %v1803_v38 = vrot.slane %v1794_v18, 4  ;;  %v1805_v17 = vrot.slane %v1795_v53, 3  ;;  %s262_s11 = scalar_lea.vmem [#allocation6], %s4191_s9 }
 0x167   : > { %v1807_v21 = vrot.slane %v1796_v46, 2  ;;  %v1809_v32 = vrot.slane %v1797_v16, 1  ;;  %v340_v20 = vunpack.c.l.bf16 %v284_v15  ;;  %v347_v55 = vunpack.c.l.bf16 %v291_v0  ;;  %s4114_s12 = sshll.u32 %s262_s11, 4  ;;  %s4115_s12 = int_to_ptr.vmem [resolvable:$true] %s4114_s12 }
 0x168   : > { %v1802_v37 = vsel %vm1025_vm1, %v1801_v58, %v1800_v47  ;;  %v354_v4 = vunpack.c.l.bf16 %v298_v51  ;;  %v361_v56 = vunpack.c.l.bf16 %v305_v22  ;;  %v368_v29 = vunpack.c.l.bf16 %v312_v42  ;;  %v4718_v42 = vld [vmem:[#allocation3 + $0x454] ss:$24 sps:$4 sm:$0xff]   ;;  %s5074_s17 = scalar_lea.vmem %s4115_s12, 128  ;;  %p5081_p11 = scmp.lt.s32.totalorder %s4115_s12, %s5079_s18 }
 0x169   : > { %v1804_v24 = vsel %vm1028_vm2, %v1803_v38, %v1802_v37  ;;  %v1812_v59 = vrot.slane %v1799_v33, 7  ;;  %v375_v1 = vunpack.c.l.bf16 %v319_v5  ;;  %v382_v45 = vunpack.c.l.bf16 %v326_v35  ;;  %p5075_p8 = scmp.ne.s32.totalorder %s4115_s12, %s5074_s17  ;;  %p5082_p12 = scmp.lt.s32.totalorder %s5080_s19, %s5074_s17 }
 0x16a   : > { %v1806_v9 = vsel %vm1031_vm3, %v1805_v17, %v1804_v24  ;;  %v6941_v23 = vmax.f32 %v333_v50, 0.0  ;;  %v6943_v63 = vmax.f32 %v340_v20, 0.0  ;;  %v6945_v18 = vmax.f32 %v347_v55, 0.0 }
 0x16b   : > { %v1808_v16 = vsel %vm1034_vm4, %v1807_v21, %v1806_v9  ;;  %v6948_v15 = vmax.f32 %v354_v4, 0.0  ;;  %v6950_v58 = vmax.f32 %v361_v56, 0.0  ;;  %v6952_v51 = vmax.f32 %v368_v29, 0.0  ;;  %p5076_p9 = pnand %p5075_p8, %p5219_p5  ;;  %p5083_p13 = por %p5082_p12, %p5081_p11 }
 0x16c   : > { %v1810_v53 = vsel %vm1037_vm5, %v1809_v32, %v1808_v16  ;;  %v6955_v5 = vmax.f32 %v375_v1, 0.0  ;;  %v1997_v50 = vadd.f32 %v6749_v19, %v6778_v26  ;;  %v1998_v46 = vadd.f32 %v6752_v60, %v6782_v2 }
 0x16d   : > { %v1811_v55 = vsel %vm1040_vm6, %v1798_v41, %v1810_v53  ;;  %v1999_v21 = vadd.f32 %v6756_v30, %v6780_v61  ;;  %v2000_v56 = vadd.f32 %v6759_v25, %v6784_v8  ;;  %v2001_v29 = vadd.f32 %v6762_v34, %v6786_v27  ;;  %p5077_p10 = pneg %p5076_p9 }
 0x16e   : > { %v1813_v0 = vsel %vm1043_vm7, %v1812_v59, %v1811_v55  ;;  %v2002_v22 = vadd.f32 %v6765_v14, %v6790_v39  ;;  %v2003_v19 = vadd.f32 %v6769_v43, %v6788_v12  ;;  %v2004_v60 = vadd.f32 %v6772_v49, %v6792_v6 }
 0x16f   : > { %v1814_v33 = vpack.c.b16 %v1813_v0, %v1813_v0  ;;  %v2005_v30 = vrot.slane %v6778_v26, 1  ;;  %v2006_v47 = vrot.slane %v6782_v2, 1  ;;  %v2007_v25 = vrot.slane %v6780_v61, 1  ;;  %p5084_p0 = pnand %p5083_p13, %p5077_p10 }
 0x170   : > { %v2008_v34 = vrot.slane %v6784_v8, 1  ;;  %v2009_v41 = vrot.slane %v6786_v27, 1  ;;  %v2010_v14 = vrot.slane %v6790_v39, 1  ;;  %v2011_v38 = vrot.slane %v6788_v12, 1 }
 0x171   : > { %4637 = vmatmul.mubr.msk.bf16.vlgmr.msra.gmra.mxu1 %vm1052_vm8, %v1814_v33  ;;  %v2012_v43 = vrot.slane %v6792_v6, 1  ;;  %v2021_v49 = vadd.f32 %v2005_v30, %v1997_v50  ;;  %v2022_v17 = vadd.f32 %v2006_v47, %v1998_v46  ;;  %v2023_v35 = vadd.f32 %v2007_v25, %v1999_v21 }
 0x172   : > { %4641 = vmatpush3.bf16.msra.mxu1 %v6714_v52  ;;  %4642 = vmatprep.mubr.msk.bf16.mxu1 %vm5144_vm0, %v7859_v62  ;;  %v438_v32 = vmax.f32 %v382_v45, 0.0  ;;  %v2024_v20 = vadd.f32 %v2008_v34, %v2000_v56  ;;  %v2025_v37 = vadd.f32 %v2009_v41, %v2001_v29  ;;  %v2026_v4 = vadd.f32 %v2010_v14, %v2002_v22 }
 0x173   : > { %v2027_v24 = vadd.f32 %v2011_v38, %v2003_v19  ;;  %v2028_v59 = vadd.f32 %v2012_v43, %v2004_v60  ;;  %v2029_v1 = vadd.f32 %v2021_v49, %v1664_v57  ;;  %v2030_v9 = vadd.f32 %v2022_v17, %v1665_v11  ;;  %3371 = vmatprep.subr.bf16.mxu1 %v4718_v42 }
 0x174   : > { %v2031_v16 = vadd.f32 %v2023_v35, %v1666_v36  ;;  %v2032_v52 = vadd.f32 %v2024_v20, %v1667_v31  ;;  %v2033_v62 = vadd.f32 %v2025_v37, %v1668_v48  ;;  %v2034_v45 = vadd.f32 %v2026_v4, %v1669_v28 }
 0x175   : > { %v2035_v53 = vadd.f32 %v2027_v24, %v1670_v44  ;;  %v2036_v57 = vadd.f32 %v2028_v59, %v1671_v54  ;;  %v2037_v11 = vadd.f32 %v2029_v1, %v1688_v40  ;;  %v2038_v36 = vadd.f32 %v2030_v9, %v1689_v3 }
 0x176   : > { %v2039_v31 = vadd.f32 %v2031_v16, %v1690_v7  ;;  %v2040_v48 = vadd.f32 %v2032_v52, %v1691_v10  ;;  %v2041_v28 = vadd.f32 %v2033_v62, %v1692_v13  ;;  %v7865_v44 = vrot.slane %v6790_v39, 5 }
 0x177   : > { %v7866_v54 = vrot.slane %v6788_v12, 5  ;;  %v7867_v40 = vrot.slane %v6792_v6, 5  ;;  %v7868_v3 = vrot.slane %v6778_v26, 6  ;;  %v7869_v7 = vrot.slane %v6782_v2, 6 }
 0x178   : > { %v2042_v50 = vadd.f32 %v2034_v45, %v7865_v44  ;;  %v7870_v10 = vrot.slane %v6780_v61, 6  ;;  %v7871_v13 = vrot.slane %v6784_v8, 6  ;;  %v7872_v22 = vrot.slane %v6786_v27, 6 }
 0x179   : > { %v2043_v46 = vadd.f32 %v2035_v53, %v7866_v54  ;;  %v2044_v55 = vadd.f32 %v2036_v57, %v7867_v40  ;;  %v2045_v21 = vadd.f32 %v2037_v11, %v7868_v3  ;;  %v2046_v56 = vadd.f32 %v2038_v36, %v7869_v7 }
 0x17a   : > { %v2047_v29 = vadd.f32 %v2039_v31, %v7870_v10  ;;  %v2048_v0 = vadd.f32 %v2040_v48, %v7871_v13  ;;  %v2049_v19 = vadd.f32 %v2041_v28, %v7872_v22  ;;  %v7873_v60 = vrot.slane %v6790_v39, 6  ;;  %v4762_v10 = vld [vmem:[#allocation3 + $0x214] ss:$24 sps:$4 sm:$0xff]   ;;  %v1090_v13 = vpop.f32.mrf.mxu1 }
 0x17b   : > { %v7874_v30 = vrot.slane %v6788_v12, 6  ;;  %v7875_v25 = vrot.slane %v6792_v6, 6  ;;  %v7876_v34 = vrot.slane %v6778_v26, 7  ;;  %v7877_v14 = vrot.slane %v6782_v2, 7  ;;  %3354 = vmatprep.subr.bf16.mxu0 %v4762_v10 }
 0x17c   : > { %v2050_v33 = vadd.f32 %v2042_v50, %v7873_v60  ;;  %v7878_v43 = vrot.slane %v6780_v61, 7  ;;  %v7879_v17 = vrot.slane %v6784_v8, 7  ;;  %v7880_v20 = vrot.slane %v6786_v27, 7  ;;  %v4767_v60 = vld [vmem:[#allocation3 + $0x210] ss:$24 sps:$4 sm:$0xff]  }
 0x17d   : > { %v2051_v47 = vadd.f32 %v2043_v46, %v7874_v30  ;;  %v2052_v42 = vadd.f32 %v2044_v55, %v7875_v25  ;;  %v2053_v41 = vadd.f32 %v2045_v21, %v7876_v34  ;;  %v2054_v38 = vadd.f32 %v2046_v56, %v7877_v14  ;;  %v7061_v55 = vld [vmem:[%s7284_s2] ss:$0 sm:$0xff]  ;;  %v4626_v25 = vpop.f32.mrf.mxu1  ;;  %3355 = vmatpush2.bf16.msra.mxu0 %v4767_v60  ;;  %v4773_v14 = vld [vmem:[#allocation3 + $0x1e0] ss:$24 sps:$4 sm:$0xff]  }
 0x17e   : > { %v2055_v49 = vadd.f32 %v2047_v29, %v7878_v43  ;;  %v2056_v35 = vadd.f32 %v2048_v0, %v7879_v17  ;;  %v2057_v37 = vadd.f32 %v2049_v19, %v7880_v20  ;;  %v7881_v4 = vrot.slane %v6790_v39, 7  ;;  %v4790_v60 = vld [vmem:[#allocation3 + $0x158] ss:$24 sps:$4 sm:$0xff]   ;;  %v4805_v25 = vld [vmem:[#allocation3 + $0xfc] ss:$24 sps:$4 sm:$0xff]  }
 0x17f   : > { %v7882_v59 = vrot.slane %v6788_v12, 7  ;;  %v7883_v26 = vrot.slane %v6792_v6, 7  ;;  %v2061_v2 = vadd.f32 %v2053_v41, %v6941_v23  ;;  %v2062_v61 = vadd.f32 %v2054_v38, %v6943_v63  ;;  %v1093_v43 = vpop.f32.mrf.mxu1 }
 0x180   : > { %v2058_v24 = vadd.f32 %v2050_v33, %v7881_v4  ;;  %v2063_v16 = vadd.f32 %v2055_v49, %v6945_v18  ;;  %v2064_v8 = vadd.f32 %v2056_v35, %v6948_v15  ;;  %v2065_v27 = vadd.f32 %v2057_v37, %v6950_v58  ;;  %v4768_v33 = vld [vmem:[#allocation3 + $0x1e4] ss:$24 sps:$4 sm:$0xff]   ;;  %v4716_v4 = vld [vmem:[#allocation3 + $0x450] ss:$24 sps:$4 sm:$0xff]  }
 0x181   : > { %v2059_v1 = vadd.f32 %v2051_v47, %v7882_v59  ;;  %v2060_v9 = vadd.f32 %v2052_v42, %v7883_v26  ;;  %v2069_v12 = vmul.f32 0.04, %v2061_v2  ;;  %v2070_v45 = vmul.f32 0.04, %v2062_v61  ;;  %3356 = vmatprep.subr.bf16.mxu0 %v4768_v33  ;;  %v4627_v20 = vpop.f32.mrf.mxu1  ;;  %v4724_v59 = vld [vmem:[#allocation3 + $0x424] ss:$24 sps:$4 sm:$0xff]  }
 0x182   : > { %v2066_v52 = vadd.f32 %v2058_v24, %v6952_v51  ;;  %v2071_v53 = vmul.f32 0.04, %v2063_v16  ;;  %v2072_v6 = vmul.f32 0.04, %v2064_v8  ;;  %v2073_v57 = vmul.f32 0.04, %v2065_v27  ;;  %3357 = vmatpush2.bf16.msra.mxu0 %v4773_v14 }
 0x183   : > { %v2067_v39 = vadd.f32 %v2059_v1, %v6955_v5  ;;  %v2068_v62 = vadd.f32 %v2060_v9, %v438_v32  ;;  %v2077_v63 = vpack.c.bf16 %v2069_v12, %v2069_v12  ;;  %v2078_v31 = vpack.c.bf16 %v2070_v45, %v2070_v45  ;;  %v4722_v1 = vld [vmem:[#allocation3 + $0x420] ss:$24 sps:$4 sm:$0xff]   ;;  %v4730_v26 = vld [vmem:[#allocation3 + $0x3f4] ss:$24 sps:$4 sm:$0xff]   ;;  %v4728_v9 = vld [vmem:[#allocation3 + $0x3f0] ss:$24 sps:$4 sm:$0xff]  }
 0x184   : > { %v2074_v11 = vmul.f32 0.04, %v2066_v52  ;;  %v2079_v18 = vpack.c.bf16 %v2071_v53, %v2071_v53  ;;  %v2080_v48 = vpack.c.bf16 %v2072_v6, %v2072_v6  ;;  %v2081_v15 = vpack.c.bf16 %v2073_v57, %v2073_v57  ;;  %v4736_v2 = vld [vmem:[#allocation3 + $0x3c4] ss:$24 sps:$4 sm:$0xff]   ;;  %v4734_v61 = vld [vmem:[#allocation3 + $0x3c0] ss:$24 sps:$4 sm:$0xff]  }
 0x185   : > { %v2075_v23 = vmul.f32 0.04, %v2067_v39  ;;  %v2076_v36 = vmul.f32 0.04, %v2068_v62  ;;  %v2093_v51 = vunpack.c.l.b16 %v2077_v63  ;;  %v2094_v50 = vunpack.c.l.b16 %v2078_v31  ;;  %v4742_v16 = vld [vmem:[#allocation3 + $0x394] ss:$24 sps:$4 sm:$0xff]  }
 0x186   : > { %v2082_v28 = vpack.c.bf16 %v2074_v11, %v2074_v11  ;;  %v2095_v5 = vunpack.c.l.b16 %v2079_v18  ;;  %v2096_v32 = vunpack.c.l.b16 %v2080_v48  ;;  %v2097_v54 = vunpack.c.l.b16 %v2081_v15  ;;  %v4740_v8 = vld [vmem:[#allocation3 + $0x390] ss:$24 sps:$4 sm:$0xff]   ;;  %v4748_v27 = vld [vmem:[#allocation3 + $0x364] ss:$24 sps:$4 sm:$0xff]   ;;  %v4746_v52 = vld [vmem:[#allocation3 + $0x360] ss:$24 sps:$4 sm:$0xff]  }
 0x187   : > { %v2083_v58 = vpack.c.bf16 %v2075_v23, %v2075_v23  ;;  %v2084_v44 = vpack.c.bf16 %v2076_v36, %v2076_v36  ;;  %v2101_v21 = vrot.slane %v2094_v50, 7  ;;  %v1091_v19 = vadd.f32 %v7061_v55, %v1090_v13  ;;  %v4754_v39 = vld [vmem:[#allocation3 + $0x334] ss:$24 sps:$4 sm:$0xff]   ;;  %v4752_v62 = vld [vmem:[#allocation3 + $0x330] ss:$24 sps:$4 sm:$0xff]  }
 0x188   : > { %v2098_v46 = vunpack.c.l.b16 %v2082_v28  ;;  %v2103_v7 = vrot.slane %v2095_v5, 6  ;;  %v2105_v56 = vrot.slane %v2096_v32, 5  ;;  %v2107_v29 = vrot.slane %v2097_v54, 4  ;;  %v4760_v12 = vld [vmem:[#allocation3 + $0x304] ss:$24 sps:$4 sm:$0xff]  }
 0x189   : > { %v2099_v40 = vunpack.c.l.b16 %v2083_v58  ;;  %v2100_v3 = vunpack.c.l.b16 %v2084_v44  ;;  %v2102_v0 = vsel %vm1025_vm1, %v2101_v21, %v2093_v51  ;;  %v1096_v41 = vmax.f32 %v1091_v19, 0.0  ;;  %v4758_v45 = vld [vmem:[#allocation3 + $0x300] ss:$24 sps:$4 sm:$0xff]   ;;  %v4766_v53 = vld [vmem:[#allocation3 + $0x5d4] ss:$24 sps:$4 sm:$0xff]  }
 0x18a   : > { %v2109_v22 = vrot.slane %v2098_v46, 3  ;;  %v2104_v30 = vsel %vm1028_vm2, %v2103_v7, %v2102_v0  ;;  %v4764_v6 = vld [vmem:[#allocation3 + $0x5d0] ss:$24 sps:$4 sm:$0xff]   ;;  %v4772_v57 = vld [vmem:[#allocation3 + $0x5a4] ss:$24 sps:$4 sm:$0xff]  }
 0x18b   : > { %v2111_v47 = vrot.slane %v2099_v40, 2  ;;  %v2106_v42 = vsel %vm1031_vm3, %v2105_v56, %v2104_v30  ;;  %v2113_v34 = vrot.slane %v2100_v3, 1  ;;  %v1097_v17 = vpack.c.bf16 %v1096_v41, %v1096_v41  ;;  %v4770_v11 = vld [vmem:[#allocation3 + $0x5a0] ss:$24 sps:$4 sm:$0xff]   ;;  %v4774_v23 = vld [vmem:[#allocation3 + $0x1b4] ss:$24 sps:$4 sm:$0xff]  }
 0x18c   : > { %v2108_v38 = vsel %vm1034_vm4, %v2107_v29, %v2106_v42  ;;  %v4776_v36 = vld [vmem:[#allocation3 + $0x570] ss:$24 sps:$4 sm:$0xff]   ;;  %v4778_v63 = vld [vmem:[#allocation3 + $0x574] ss:$24 sps:$4 sm:$0xff]   ;;  %v4780_v18 = vld [vmem:[#allocation3 + $0x184] ss:$24 sps:$4 sm:$0xff]   ;;  %3358 = vmatprep.subr.bf16.mxu0 %v4774_v23 }
 0x18d   : > { %v2110_v49 = vsel %vm1037_vm5, %v2109_v22, %v2108_v38  ;;  %1098 = vst [vmem:[#allocation2] sm:$0xf] %v1097_v17  ;;  %v4779_v31 = vld [vmem:[#allocation3 + $0x1b0] ss:$24 sps:$4 sm:$0xff]   ;;  %v4784_v48 = vld [vmem:[#allocation3 + $0x544] ss:$24 sps:$4 sm:$0xff]  }
 0x18e   : > { %v2112_v35 = vsel %vm1040_vm6, %v2111_v47, %v2110_v49  ;;  %3359 = vmatpush2.bf16.msra.mxu0 %v4779_v31  ;;  %v4782_v15 = vld [vmem:[#allocation3 + $0x540] ss:$24 sps:$4 sm:$0xff]   ;;  %v4789_v58 = vld [vmem:[#allocation3 + $0x514] ss:$24 sps:$4 sm:$0xff]   ;;  %v4787_v51 = vld [vmem:[#allocation3 + $0x510] ss:$24 sps:$4 sm:$0xff]  }
 0x18f   : > { %v2114_v37 = vsel %vm1043_vm7, %v2113_v34, %v2112_v35  ;;  %v4785_v28 = vld [vmem:[#allocation3 + $0x180] ss:$24 sps:$4 sm:$0xff]   ;;  %3360 = vmatprep.subr.bf16.mxu0 %v4780_v18  ;;  %v4792_v44 = vld [vmem:[#allocation3 + $0x15c] ss:$24 sps:$4 sm:$0xff]   ;;  %v4800_v32 = vld [vmem:[#allocation3 + $0x4b0] ss:$24 sps:$4 sm:$0xff]  }
 0x190   : > { %v2115_v24 = vpack.c.b16 %v2114_v37, %v2114_v37  ;;  %v4796_v50 = vld [vmem:[#allocation3 + $0x4e4] ss:$24 sps:$4 sm:$0xff]   ;;  %v4794_v5 = vld [vmem:[#allocation3 + $0x4e0] ss:$24 sps:$4 sm:$0xff]   ;;  %v4802_v54 = vld [vmem:[#allocation3 + $0x4b4] ss:$24 sps:$4 sm:$0xff]  }
 0x191   : > { %v4808_v46 = vld [vmem:[#allocation3 + $0x484] ss:$24 sps:$4 sm:$0xff]   ;;  %v4806_v40 = vld [vmem:[#allocation3 + $0x480] ss:$24 sps:$4 sm:$0xff]  }
 0x192   : > { %4643 = vmatmul.mubr.msk.bf16.vlgmr.msra.gmra.mxu1 %vm1052_vm8, %v2115_v24  ;;  %3361 = vmatpush2.bf16.msra.mxu0 %v4785_v28  ;;  %v4819_v3 = vld [vmem:[#allocation3 + $0x45c] ss:$24 sps:$4 sm:$0xff]   ;;  %v4799_v30 = vld [vmem:[#allocation3 + $0x12c] ss:$24 sps:$4 sm:$0xff]   ;;  %v4797_v47 = vld [vmem:[#allocation3 + $0x128] ss:$24 sps:$4 sm:$0xff]  }
 0x193   : > { %3372 = vmatpush1.bf16.msra.mxu1 %v4716_v4  ;;  %3412 = vmatprep.subr.bf16.mxu0 %v4792_v44  ;;  %v4803_v42 = vld [vmem:[#allocation3 + $0xf8] ss:$24 sps:$4 sm:$0xff]   ;;  %v4811_v34 = vld [vmem:[#allocation3 + $0xcc] ss:$24 sps:$4 sm:$0xff]   ;;  %v4809_v41 = vld [vmem:[#allocation3 + $0xc8] ss:$24 sps:$4 sm:$0xff]  }
 0x194   : > { %3373 = vmatprep.subr.bf16.mxu1 %v4724_v59  ;;  %v4816_v14 = vld [vmem:[#allocation3 + $0x9c] ss:$24 sps:$4 sm:$0xff]   ;;  %v4814_v38 = vld [vmem:[#allocation3 + $0x98] ss:$24 sps:$4 sm:$0xff]   ;;  %v4822_v43 = vld [vmem:[#allocation3 + $0x6c] ss:$24 sps:$4 sm:$0xff]  }
 0x195   : > { %v4820_v49 = vld [vmem:[#allocation3 + $0x68] ss:$24 sps:$4 sm:$0xff]   ;;  %v4828_v17 = vld [vmem:[#allocation3 + $0x3c] ss:$24 sps:$4 sm:$0xff]   ;;  %v4826_v35 = vld [vmem:[#allocation3 + $0x38] ss:$24 sps:$4 sm:$0xff]  }
 0x196   : > { %v4834_v20 = vld [vmem:[#allocation3 + $0xc] ss:$24 sps:$4 sm:$0xff]   ;;  %v4832_v37 = vld [vmem:[#allocation3 + $0x8] ss:$24 sps:$4 sm:$0xff]   ;;  %v4840_v4 = vld [vmem:[#allocation3 + $0x2dc] ss:$24 sps:$4 sm:$0xff]  }
 0x197   : > { %3374 = vmatpush1.bf16.msra.mxu1 %v4722_v1  ;;  %v4838_v24 = vld [vmem:[#allocation3 + $0x2d8] ss:$24 sps:$4 sm:$0xff]   ;;  %v4846_v59 = vld [vmem:[#allocation3 + $0x2ac] ss:$24 sps:$4 sm:$0xff]   ;;  %v4844_v1 = vld [vmem:[#allocation3 + $0x2a8] ss:$24 sps:$4 sm:$0xff]  }
 0x198   : > { %3375 = vmatprep.subr.bf16.mxu1 %v4730_v26  ;;  %v4874_v23 = vld [vmem:[#allocation3 + $0x1b8] ss:$24 sps:$4 sm:$0xff]   ;;  %v4891_v31 = vld [vmem:[#allocation3 + $0x164] ss:$24 sps:$4 sm:$0xff]  }
 0x199   : > { %v4889_v18 = vld [vmem:[#allocation3 + $0x160] ss:$24 sps:$4 sm:$0xff]  }
 0x19b   : > { %3376 = vmatpush1.bf16.msra.mxu1 %v4728_v9  ;;  %v4852_v9 = vld [vmem:[#allocation3 + $0x27c] ss:$24 sps:$4 sm:$0xff]  }
 0x19c   : > { %3377 = vmatprep.subr.bf16.mxu1 %v4736_v2 }
 0x19f   : > { %3378 = vmatpush1.bf16.msra.mxu1 %v4734_v61 }
 0x1a0   : > { %3379 = vmatprep.subr.bf16.mxu1 %v4742_v16 }
 0x1a3   : > { %3380 = vmatpush1.bf16.msra.mxu1 %v4740_v8  ;;  %v4850_v8 = vld [vmem:[#allocation3 + $0x278] ss:$24 sps:$4 sm:$0xff]  }
 0x1a4   : > { %3381 = vmatprep.subr.bf16.mxu1 %v4748_v27 }
 0x1a7   : > { %3382 = vmatpush1.bf16.msra.mxu1 %v4746_v52  ;;  %v4858_v52 = vld [vmem:[#allocation3 + $0x24c] ss:$24 sps:$4 sm:$0xff]  }
 0x1a8   : > { %3383 = vmatprep.subr.bf16.mxu1 %v4754_v39 }
 0x1ab   : > { %3384 = vmatpush1.bf16.msra.mxu1 %v4752_v62 }
 0x1ac   : > { %3385 = vmatprep.subr.bf16.mxu1 %v4760_v12  ;;  %v4856_v12 = vld [vmem:[#allocation3 + $0x248] ss:$24 sps:$4 sm:$0xff]  }
 0x1af   : > { %3386 = vmatpush1.bf16.msra.mxu1 %v4758_v45  ;;  %v4864_v45 = vld [vmem:[#allocation3 + $0x21c] ss:$24 sps:$4 sm:$0xff]  }
 0x1b0   : > { %3387 = vmatprep.subr.bf16.mxu1 %v4766_v53  ;;  %v4862_v53 = vld [vmem:[#allocation3 + $0x218] ss:$24 sps:$4 sm:$0xff]  }
 0x1b3   : > { %3388 = vmatpush2.bf16.msra.mxu1 %v4764_v6  ;;  %v4870_v6 = vld [vmem:[#allocation3 + $0x1ec] ss:$24 sps:$4 sm:$0xff]  }
 0x1b4   : > { %3389 = vmatprep.subr.bf16.mxu1 %v4772_v57  ;;  %v4868_v57 = vld [vmem:[#allocation3 + $0x1e8] ss:$24 sps:$4 sm:$0xff]  }
 0x1b7   : > { %3390 = vmatpush2.bf16.msra.mxu1 %v4770_v11  ;;  %v4876_v11 = vld [vmem:[#allocation3 + $0x1bc] ss:$24 sps:$4 sm:$0xff]  }
 0x1b8   : > { %3391 = vmatprep.subr.bf16.mxu1 %v4778_v63  ;;  %v4880_v63 = vld [vmem:[#allocation3 + $0x188] ss:$24 sps:$4 sm:$0xff]  }
 0x1bb   : > { %3392 = vmatpush2.bf16.msra.mxu1 %v4776_v36  ;;  %v4882_v36 = vld [vmem:[#allocation3 + $0x18c] ss:$24 sps:$4 sm:$0xff]  }
 0x1bc   : > { %3393 = vmatprep.subr.bf16.mxu1 %v4784_v48  ;;  %v4897_v48 = vld [vmem:[#allocation3 + $0x134] ss:$24 sps:$4 sm:$0xff]  }
 0x1bf   : > { %3394 = vmatpush2.bf16.msra.mxu1 %v4782_v15 }
 0x1c0   : > { %3395 = vmatprep.subr.bf16.mxu1 %v4789_v58  ;;  %v4895_v58 = vld [vmem:[#allocation3 + $0x130] ss:$24 sps:$4 sm:$0xff]  }
 0x1c3   : > { %3396 = vmatpush2.bf16.msra.mxu1 %v4787_v51  ;;  %v4903_v51 = vld [vmem:[#allocation3 + $0x104] ss:$24 sps:$4 sm:$0xff]  }
 0x1c4   : > { %3397 = vmatprep.subr.bf16.mxu1 %v4796_v50 }
 0x1c7   : > { %3398 = vmatpush2.bf16.msra.mxu1 %v4794_v5 }
 0x1c8   : > { %3399 = vmatprep.subr.bf16.mxu1 %v4802_v54  ;;  %v4901_v54 = vld [vmem:[#allocation3 + $0x100] ss:$24 sps:$4 sm:$0xff]  }
 0x1cb   : > { %3400 = vmatpush2.bf16.msra.mxu1 %v4800_v32 }
 0x1cc   : > { %3401 = vmatprep.subr.bf16.mxu1 %v4808_v46 }
 0x1cf   : > { %3402 = vmatpush2.bf16.msra.mxu1 %v4806_v40  ;;  %v4909_v40 = vld [vmem:[#allocation3 + $0xd4] ss:$24 sps:$4 sm:$0xff]  }
 0x1d0   : > { %3453 = vmatprep.subr.bf16.mxu1 %v4819_v3  ;;  %v4907_v3 = vld [vmem:[#allocation3 + $0xd0] ss:$24 sps:$4 sm:$0xff]  }
 0x1fa   : > { %v1383_v21 = vpop.f32.mrf.mxu1 }
 0x1fb   : > { %v1384_v7 = vadd.f32 %v7061_v55, %v1383_v21  ;;  %v4910_v21 = vld [vmem:[#allocation3 + $0xa0] ss:$24 sps:$4 sm:$0xff]  }
 0x1fc   : > { %v4632_v56 = vpop.f32.mrf.mxu1 }
 0x1fd   : > { %v1389_v10 = vmax.f32 %v1384_v7, 0.0  ;;  %v4918_v56 = vld [vmem:[#allocation3 + $0x74] ss:$24 sps:$4 sm:$0xff]  }
 0x1fe   : > { %v1386_v29 = vpop.f32.mrf.mxu1 }
 0x1ff   : > { %v1390_v13 = vpack.c.bf16 %v1389_v10, %v1389_v10 }
 0x200   : > { %v4633_v0 = vpop.f32.mrf.mxu1 }
 0x201   : > { %1391 = vst [vmem:[#allocation2 + $0x4] sm:$0xf] %v1390_v13  ;;  %v4817_v13 = vld [vmem:[#allocation3 + $0x458] ss:$24 sps:$4 sm:$0xff]   ;;  %v4825_v0 = vld [vmem:[#allocation3 + $0x42c] ss:$24 sps:$4 sm:$0xff]  }
 0x208   : > { %v2162_v22 = vld [vmem:[#allocation2] sm:$0xff] }
 0x209   : > { %v7073_v19 = vcombine.high %v2162_v22, %v2162_v22  ;;  %v7075_v33 = vcombine.low %v2162_v22, %v2162_v22  ;;  %v4916_v22 = vld [vmem:[#allocation3 + $0x70] ss:$24 sps:$4 sm:$0xff]  }
 0x20b   : > { %3362 = vmatprep.mubr.bf16.mxu0 %v7073_v19 }
 0x20c   : > { %3363 = vmatmul.mubr.bf16.vlgmr.msra.gmra.mxu0 %v7075_v33 }
 0x20d   : > { %3413 = vmatpush1.bf16.msra.mxu0 %v4790_v60  ;;  %3444 = vmatprep.mubr.bf16.mxu0 %v7073_v19  ;;  %v4823_v60 = vld [vmem:[#allocation3 + $0x428] ss:$24 sps:$4 sm:$0xff]  }
 0x20e   : > { %3414 = vmatprep.subr.bf16.mxu0 %v4799_v30  ;;  %v4831_v30 = vld [vmem:[#allocation3 + $0x3fc] ss:$24 sps:$4 sm:$0xff]  }
 0x211   : > { %3415 = vmatpush1.bf16.msra.mxu0 %v4797_v47  ;;  %v4922_v47 = vld [vmem:[#allocation3 + $0x40] ss:$24 sps:$4 sm:$0xff]  }
 0x212   : > { %3416 = vmatprep.subr.bf16.mxu0 %v4805_v25  ;;  %v4930_v25 = vld [vmem:[#allocation3 + $0x14] ss:$24 sps:$4 sm:$0xff]  }
 0x215   : > { %3417 = vmatpush1.bf16.msra.mxu0 %v4803_v42  ;;  %v4829_v42 = vld [vmem:[#allocation3 + $0x3f8] ss:$24 sps:$4 sm:$0xff]  }
 0x216   : > { %3418 = vmatprep.subr.bf16.mxu0 %v4811_v34  ;;  %v4837_v34 = vld [vmem:[#allocation3 + $0x3cc] ss:$24 sps:$4 sm:$0xff]  }
 0x219   : > { %3419 = vmatpush1.bf16.msra.mxu0 %v4809_v41  ;;  %v4928_v41 = vld [vmem:[#allocation3 + $0x10] ss:$24 sps:$4 sm:$0xff]  }
 0x21a   : > { %3420 = vmatprep.subr.bf16.mxu0 %v4816_v14  ;;  %v4936_v14 = vld [vmem:[#allocation3 + $0x2e4] ss:$24 sps:$4 sm:$0xff]  }
 0x21d   : > { %3421 = vmatpush1.bf16.msra.mxu0 %v4814_v38  ;;  %v4835_v38 = vld [vmem:[#allocation3 + $0x3c8] ss:$24 sps:$4 sm:$0xff]  }
 0x21e   : > { %3422 = vmatprep.subr.bf16.mxu0 %v4822_v43  ;;  %v4843_v43 = vld [vmem:[#allocation3 + $0x39c] ss:$24 sps:$4 sm:$0xff]  }
 0x221   : > { %3423 = vmatpush1.bf16.msra.mxu0 %v4820_v49  ;;  %v4934_v49 = vld [vmem:[#allocation3 + $0x2e0] ss:$24 sps:$4 sm:$0xff]  }
 0x222   : > { %3424 = vmatprep.subr.bf16.mxu0 %v4828_v17  ;;  %v4942_v17 = vld [vmem:[#allocation3 + $0x2b4] ss:$24 sps:$4 sm:$0xff]  }
 0x225   : > { %3425 = vmatpush1.bf16.msra.mxu0 %v4826_v35  ;;  %v4841_v35 = vld [vmem:[#allocation3 + $0x398] ss:$24 sps:$4 sm:$0xff]  }
 0x226   : > { %3426 = vmatprep.subr.bf16.mxu0 %v4834_v20  ;;  %v4849_v20 = vld [vmem:[#allocation3 + $0x36c] ss:$24 sps:$4 sm:$0xff]  }
 0x229   : > { %3427 = vmatpush1.bf16.msra.mxu0 %v4832_v37  ;;  %v4940_v37 = vld [vmem:[#allocation3 + $0x2b0] ss:$24 sps:$4 sm:$0xff]  }
 0x22a   : > { %3428 = vmatprep.subr.bf16.mxu0 %v4840_v4  ;;  %v4948_v4 = vld [vmem:[#allocation3 + $0x284] ss:$24 sps:$4 sm:$0xff]  }
 0x22d   : > { %3429 = vmatpush2.bf16.msra.mxu0 %v4838_v24  ;;  %v4847_v24 = vld [vmem:[#allocation3 + $0x368] ss:$24 sps:$4 sm:$0xff]  }
 0x22e   : > { %3430 = vmatprep.subr.bf16.mxu0 %v4846_v59  ;;  %v4855_v59 = vld [vmem:[#allocation3 + $0x33c] ss:$24 sps:$4 sm:$0xff]  }
 0x231   : > { %v1852_v26 = vpop.f32.mrf.mxu1  ;;  %3431 = vmatpush2.bf16.msra.mxu0 %v4844_v1  ;;  %v4946_v1 = vld [vmem:[#allocation3 + $0x280] ss:$24 sps:$4 sm:$0xff]  }
 0x232   : > { %v1853_v2 = vadd.f32 %v7061_v55, %v1852_v26  ;;  %3432 = vmatprep.subr.bf16.mxu0 %v4852_v9  ;;  %v4954_v26 = vld [vmem:[#allocation3 + $0x254] ss:$24 sps:$4 sm:$0xff]   ;;  %v4853_v9 = vld [vmem:[#allocation3 + $0x338] ss:$24 sps:$4 sm:$0xff]  }
 0x233   : > { %v4638_v61 = vpop.f32.mrf.mxu1 }
 0x234   : > { %v1858_v16 = vmax.f32 %v1853_v2, 0.0  ;;  %v4861_v2 = vld [vmem:[#allocation3 + $0x30c] ss:$24 sps:$4 sm:$0xff]   ;;  %v4952_v61 = vld [vmem:[#allocation3 + $0x250] ss:$24 sps:$4 sm:$0xff]  }
 0x235   : > { %v1855_v27 = vpop.f32.mrf.mxu1  ;;  %3433 = vmatpush2.bf16.msra.mxu0 %v4850_v8  ;;  %v4859_v8 = vld [vmem:[#allocation3 + $0x308] ss:$24 sps:$4 sm:$0xff]  }
 0x236   : > { %v1859_v39 = vpack.c.bf16 %v1858_v16, %v1858_v16  ;;  %3434 = vmatprep.subr.bf16.mxu0 %v4858_v52  ;;  %v4960_v16 = vld [vmem:[#allocation3 + $0x224] ss:$24 sps:$4 sm:$0xff]   ;;  %v4958_v52 = vld [vmem:[#allocation3 + $0x220] ss:$24 sps:$4 sm:$0xff]  }
 0x237   : > { %v4639_v62 = vpop.f32.mrf.mxu1  ;;  %v4867_v27 = vld [vmem:[#allocation3 + $0x5dc] ss:$24 sps:$4 sm:$0xff]  }
 0x238   : > { %1860 = vst [vmem:[#allocation2 + $0x8] sm:$0xf] %v1859_v39  ;;  %v4966_v39 = vld [vmem:[#allocation3 + $0x1f4] ss:$24 sps:$4 sm:$0xff]   ;;  %v4865_v62 = vld [vmem:[#allocation3 + $0x5d8] ss:$24 sps:$4 sm:$0xff]  }
 0x239   : > { %3435 = vmatpush2.bf16.msra.mxu0 %v4856_v12  ;;  %v4873_v12 = vld [vmem:[#allocation3 + $0x5ac] ss:$24 sps:$4 sm:$0xff]  }
 0x23a   : > { %3436 = vmatprep.subr.bf16.mxu0 %v4864_v45  ;;  %v4964_v45 = vld [vmem:[#allocation3 + $0x1f0] ss:$24 sps:$4 sm:$0xff]  }
 0x23d   : > { %3437 = vmatpush2.bf16.msra.mxu0 %v4862_v53  ;;  %v4972_v53 = vld [vmem:[#allocation3 + $0x1c4] ss:$24 sps:$4 sm:$0xff]  }
 0x23e   : > { %3438 = vmatprep.subr.bf16.mxu0 %v4870_v6  ;;  %v4871_v6 = vld [vmem:[#allocation3 + $0x5a8] ss:$24 sps:$4 sm:$0xff]  }
 0x241   : > { %3439 = vmatpush2.bf16.msra.mxu0 %v4868_v57  ;;  %v4879_v57 = vld [vmem:[#allocation3 + $0x57c] ss:$24 sps:$4 sm:$0xff]  }
 0x242   : > { %3440 = vmatprep.subr.bf16.mxu0 %v4876_v11  ;;  %v4970_v11 = vld [vmem:[#allocation3 + $0x1c0] ss:$24 sps:$4 sm:$0xff]  }
 0x245   : > { %3441 = vmatpush2.bf16.msra.mxu0 %v4874_v23  ;;  %v4978_v23 = vld [vmem:[#allocation3 + $0x194] ss:$24 sps:$4 sm:$0xff]  }
 0x246   : > { %3442 = vmatprep.subr.bf16.mxu0 %v4882_v36  ;;  %v4877_v36 = vld [vmem:[#allocation3 + $0x578] ss:$24 sps:$4 sm:$0xff]  }
 0x249   : > { %3443 = vmatpush2.bf16.msra.mxu0 %v4880_v63  ;;  %v4885_v63 = vld [vmem:[#allocation3 + $0x54c] ss:$24 sps:$4 sm:$0xff]  }
 0x24a   : > { %3494 = vmatprep.subr.bf16.mxu0 %v4891_v31  ;;  %v4976_v31 = vld [vmem:[#allocation3 + $0x190] ss:$24 sps:$4 sm:$0xff]  }
 0x24c   : > { %3445 = vmatmul.mubr.bf16.vlgmr.msra.gmra.mxu0 %v7075_v33 }
 0x24d   : > { %3495 = vmatpush1.bf16.msra.mxu0 %v4889_v18  ;;  %3526 = vmatprep.mubr.bf16.mxu0 %v7073_v19  ;;  %v4924_v19 = vld [vmem:[#allocation3 + $0x44] ss:$24 sps:$4 sm:$0xff]   ;;  %v4994_v18 = vld [vmem:[%s7286_s4 + $0x78] sm:$0xff]  }
 0x24e   : > { %3496 = vmatprep.subr.bf16.mxu0 %v4897_v48  ;;  %v4883_v48 = vld [vmem:[#allocation3 + $0x548] ss:$24 sps:$4 sm:$0xff]  }
 0x251   : > { %3497 = vmatpush1.bf16.msra.mxu0 %v4895_v58  ;;  %v4996_v58 = vld [vmem:[%s7286_s4 + $0x70] sm:$0xff]  }
 0x252   : > { %v2153_v15 = vpop.f32.mrf.mxu1  ;;  %3498 = vmatprep.subr.bf16.mxu0 %v4903_v51  ;;  %v4894_v51 = vld [vmem:[#allocation3 + $0x4ec] ss:$24 sps:$4 sm:$0xff]  }
 0x253   : > { %v2154_v28 = vadd.f32 %v7061_v55, %v2153_v15  ;;  %v4912_v55 = vld [vmem:[#allocation3 + $0xa4] ss:$24 sps:$4 sm:$0xff]  }
 0x254   : > { %v4644_v44 = vpop.f32.mrf.mxu1  ;;  %v4888_v15 = vld [vmem:[#allocation3 + $0x51c] ss:$24 sps:$4 sm:$0xff]  }
 0x255   : > { %v2159_v50 = vmax.f32 %v2154_v28, 0.0  ;;  %3499 = vmatpush1.bf16.msra.mxu0 %v4901_v54  ;;  %v4995_v28 = vld [vmem:[%s7286_s4 + $0x38] sm:$0xff]   ;;  %v4886_v44 = vld [vmem:[#allocation3 + $0x518] ss:$24 sps:$4 sm:$0xff]   ;;  %v4900_v54 = vld [vmem:[#allocation3 + $0x4bc] ss:$24 sps:$4 sm:$0xff]  }
 0x256   : > { %v2156_v5 = vpop.f32.mrf.mxu1  ;;  %3500 = vmatprep.subr.bf16.mxu0 %v4909_v40  ;;  %v4898_v40 = vld [vmem:[#allocation3 + $0x4b8] ss:$24 sps:$4 sm:$0xff]  }
 0x257   : > { %v2160_v32 = vpack.c.bf16 %v2159_v50, %v2159_v50  ;;  %v4997_v50 = vld [vmem:[%s7286_s4 + $0x30] sm:$0xff]   ;;  %v4998_v5 = vld [vmem:[%s7286_s4 + $0x68] sm:$0xff]  }
 0x258   : > { %v4645_v46 = vpop.f32.mrf.mxu1 }
 0x259   : > { %2161 = vst [vmem:[#allocation2 + $0xc] sm:$0xf] %v2160_v32  ;;  %3501 = vmatpush1.bf16.msra.mxu0 %v4907_v3  ;;  %v4892_v32 = vld [vmem:[#allocation3 + $0x4e8] ss:$24 sps:$4 sm:$0xff]   ;;  %v4999_v46 = vld [vmem:[%s7286_s4 + $0x28] sm:$0xff]  }
 0x25a   : > { %3502 = vmatprep.subr.bf16.mxu0 %v4912_v55  ;;  %v4906_v3 = vld [vmem:[#allocation3 + $0x48c] ss:$24 sps:$4 sm:$0xff]   ;;  %v5001_v55 = vld [vmem:[%s7286_s4 + $0x20] sm:$0xff]  }
 0x25d   : > { %3503 = vmatpush1.bf16.msra.mxu0 %v4910_v21  ;;  %v5002_v21 = vld [vmem:[%s7286_s4 + $0x58] sm:$0xff]  }
 0x25e   : > { %3504 = vmatprep.subr.bf16.mxu0 %v4918_v56  ;;  %v4915_v56 = vld [vmem:[#allocation3 + $0x464] ss:$24 sps:$4 sm:$0xff]  }
 0x260   : > { %v2163_v7 = vld [vmem:[#allocation2 + $0x8] sm:$0xff] }
 0x261   : > { %v7084_v10 = vcombine.low %v2163_v7, %v2163_v7  ;;  %v7086_v29 = vcombine.high %v2163_v7, %v2163_v7  ;;  %3505 = vmatpush1.bf16.msra.mxu0 %v4916_v22  ;;  %v4904_v7 = vld [vmem:[#allocation3 + $0x488] ss:$24 sps:$4 sm:$0xff]  }
 0x262   : > { %3506 = vmatprep.subr.bf16.mxu0 %v4924_v19  ;;  %v4913_v22 = vld [vmem:[#allocation3 + $0x460] ss:$24 sps:$4 sm:$0xff]   ;;  %v4921_v19 = vld [vmem:[#allocation3 + $0x434] ss:$24 sps:$4 sm:$0xff]  }
 0x263   : > { %3403 = vmatprep.mubr.bf16.mxu1 %v7086_v29 }
 0x264   : > { %3404 = vmatmul.mubr.bf16.vlgmr.msra.gmra.mxu1 %v7084_v10 }
 0x265   : > { %3454 = vmatpush1.bf16.msra.mxu1 %v4817_v13  ;;  %3485 = vmatprep.mubr.bf16.mxu1 %v7086_v29  ;;  %v5003_v13 = vld [vmem:[%s7286_s4 + $0x18] sm:$0xff]  }
 0x266   : > { %3455 = vmatprep.subr.bf16.mxu1 %v4825_v0  ;;  %3507 = vmatpush1.bf16.msra.mxu0 %v4922_v47  ;;  %v5004_v0 = vld [vmem:[%s7286_s4 + $0x50] sm:$0xff]   ;;  %v5006_v47 = vld [vmem:[%s7286_s4 + $0x48] sm:$0xff]  }
 0x267   : > { %3508 = vmatprep.subr.bf16.mxu0 %v4930_v25  ;;  %v4927_v25 = vld [vmem:[#allocation3 + $0x404] ss:$24 sps:$4 sm:$0xff]  }
 0x269   : > { %3456 = vmatpush1.bf16.msra.mxu1 %v4823_v60  ;;  %v5005_v60 = vld [vmem:[%s7286_s4 + $0x10] sm:$0xff]  }
 0x26a   : > { %3457 = vmatprep.subr.bf16.mxu1 %v4831_v30  ;;  %3509 = vmatpush1.bf16.msra.mxu0 %v4928_v41  ;;  %v4919_v30 = vld [vmem:[#allocation3 + $0x430] ss:$24 sps:$4 sm:$0xff]  }
 0x26b   : > { %3510 = vmatprep.subr.bf16.mxu0 %v4936_v14  ;;  %v5008_v41 = vld [vmem:[%s7286_s4 + $0x40] sm:$0xff]  }
 0x26c   : > { %v5009_v14 = vld [vmem:[%s7286_s4] sm:$0xff]  }
 0x26d   : > { %3458 = vmatpush1.bf16.msra.mxu1 %v4829_v42  ;;  %v5007_v42 = vld [vmem:[%s7286_s4 + $0x8] sm:$0xff]  }
 0x26e   : > { %3459 = vmatprep.subr.bf16.mxu1 %v4837_v34  ;;  %3511 = vmatpush2.bf16.msra.mxu0 %v4934_v49  ;;  %v4925_v34 = vld [vmem:[#allocation3 + $0x400] ss:$24 sps:$4 sm:$0xff]  }
 0x26f   : > { %3512 = vmatprep.subr.bf16.mxu0 %v4942_v17  ;;  %v4937_v49 = vld [vmem:[#allocation3 + $0x3a0] ss:$24 sps:$4 sm:$0xff]   ;;  %v4945_v17 = vld [vmem:[#allocation3 + $0x374] ss:$24 sps:$4 sm:$0xff]  }
 0x271   : > { %3460 = vmatpush1.bf16.msra.mxu1 %v4835_v38  ;;  %v4931_v38 = vld [vmem:[#allocation3 + $0x3d0] ss:$24 sps:$4 sm:$0xff]  }
 0x272   : > { %3461 = vmatprep.subr.bf16.mxu1 %v4843_v43  ;;  %3513 = vmatpush2.bf16.msra.mxu0 %v4940_v37  ;;  %v4939_v43 = vld [vmem:[#allocation3 + $0x3a4] ss:$24 sps:$4 sm:$0xff]   ;;  %v4949_v37 = vld [vmem:[#allocation3 + $0x340] ss:$24 sps:$4 sm:$0xff]  }
 0x273   : > { %3514 = vmatprep.subr.bf16.mxu0 %v4948_v4  ;;  %v4957_v4 = vld [vmem:[#allocation3 + $0x314] ss:$24 sps:$4 sm:$0xff]  }
 0x275   : > { %3462 = vmatpush1.bf16.msra.mxu1 %v4841_v35  ;;  %v4943_v35 = vld [vmem:[#allocation3 + $0x370] ss:$24 sps:$4 sm:$0xff]  }
 0x276   : > { %3463 = vmatprep.subr.bf16.mxu1 %v4849_v20  ;;  %3515 = vmatpush2.bf16.msra.mxu0 %v4946_v1  ;;  %v4951_v20 = vld [vmem:[#allocation3 + $0x344] ss:$24 sps:$4 sm:$0xff]   ;;  %v4961_v1 = vld [vmem:[#allocation3 + $0x5e0] ss:$24 sps:$4 sm:$0xff]  }
 0x277   : > { %3516 = vmatprep.subr.bf16.mxu0 %v4954_v26  ;;  %v4969_v26 = vld [vmem:[#allocation3 + $0x5b4] ss:$24 sps:$4 sm:$0xff]  }
 0x279   : > { %3464 = vmatpush1.bf16.msra.mxu1 %v4847_v24  ;;  %v4955_v24 = vld [vmem:[#allocation3 + $0x310] ss:$24 sps:$4 sm:$0xff]  }
 0x27a   : > { %3465 = vmatprep.subr.bf16.mxu1 %v4855_v59  ;;  %3517 = vmatpush2.bf16.msra.mxu0 %v4952_v61  ;;  %v4963_v59 = vld [vmem:[#allocation3 + $0x5e4] ss:$24 sps:$4 sm:$0xff]   ;;  %v4973_v61 = vld [vmem:[#allocation3 + $0x580] ss:$24 sps:$4 sm:$0xff]  }
 0x27b   : > { %3518 = vmatprep.subr.bf16.mxu0 %v4960_v16  ;;  %v4981_v16 = vld [vmem:[#allocation3 + $0x554] ss:$24 sps:$4 sm:$0xff]  }
 0x27d   : > { %3466 = vmatpush1.bf16.msra.mxu1 %v4853_v9  ;;  %v4967_v9 = vld [vmem:[#allocation3 + $0x5b0] ss:$24 sps:$4 sm:$0xff]  }
 0x27e   : > { %3467 = vmatprep.subr.bf16.mxu1 %v4861_v2  ;;  %3519 = vmatpush2.bf16.msra.mxu0 %v4958_v52  ;;  %v4975_v2 = vld [vmem:[#allocation3 + $0x584] ss:$24 sps:$4 sm:$0xff]   ;;  %v4982_v52 = vld [vmem:[#allocation3 + $0x520] ss:$24 sps:$4 sm:$0xff]  }
 0x27f   : > { %3520 = vmatprep.subr.bf16.mxu0 %v4966_v39  ;;  %v4987_v39 = vld [vmem:[#allocation3 + $0x4f4] ss:$24 sps:$4 sm:$0xff]  }
 0x281   : > { %3468 = vmatpush1.bf16.msra.mxu1 %v4859_v8  ;;  %v4979_v8 = vld [vmem:[#allocation3 + $0x550] ss:$24 sps:$4 sm:$0xff]  }
 0x282   : > { %3469 = vmatprep.subr.bf16.mxu1 %v4867_v27  ;;  %3521 = vmatpush2.bf16.msra.mxu0 %v4964_v45  ;;  %v4984_v27 = vld [vmem:[#allocation3 + $0x524] ss:$24 sps:$4 sm:$0xff]   ;;  %v4985_v45 = vld [vmem:[#allocation3 + $0x4f0] ss:$24 sps:$4 sm:$0xff]  }
 0x283   : > { %3522 = vmatprep.subr.bf16.mxu0 %v4972_v53  ;;  %v4990_v53 = vld [vmem:[#allocation3 + $0x4c4] ss:$24 sps:$4 sm:$0xff]  }
 0x285   : > { %3470 = vmatpush2.bf16.msra.mxu1 %v4865_v62 }
 0x286   : > { %3471 = vmatprep.subr.bf16.mxu1 %v4873_v12  ;;  %3523 = vmatpush2.bf16.msra.mxu0 %v4970_v11  ;;  %v4988_v11 = vld [vmem:[#allocation3 + $0x4c0] ss:$24 sps:$4 sm:$0xff]  }
 0x287   : > { %3524 = vmatprep.subr.bf16.mxu0 %v4978_v23  ;;  %v4993_v23 = vld [vmem:[#allocation3 + $0x494] ss:$24 sps:$4 sm:$0xff]  }
 0x289   : > { %3472 = vmatpush2.bf16.msra.mxu1 %v4871_v6 }
 0x28a   : > { %3473 = vmatprep.subr.bf16.mxu1 %v4879_v57  ;;  %3525 = vmatpush2.bf16.msra.mxu0 %v4976_v31  ;;  %v5011_v31 = vld [vmem:[%s7286_s4 + $0xb8] sm:$0xff]  }
 0x28b   : > { %4556 = vmatprep.subr.bf16.mxu0 %v4994_v18  ;;  %v5012_v18 = vld [vmem:[%s7286_s4 + $0xf0] sm:$0xff]  }
 0x28d   : > { %3474 = vmatpush2.bf16.msra.mxu1 %v4877_v36  ;;  %3527 = vmatmul.mubr.bf16.vlgmr.msra.gmra.mxu0 %v7075_v33  ;;  %v5000_v33 = vld [vmem:[%s7286_s4 + $0x60] sm:$0xff]  }
 0x28e   : > { %3475 = vmatprep.subr.bf16.mxu1 %v4885_v63  ;;  %4557 = vmatpush3.bf16.msra.mxu0 %v4995_v28  ;;  %v4991_v36 = vld [vmem:[#allocation3 + $0x490] ss:$24 sps:$4 sm:$0xff]   ;;  %v5015_v28 = vld [vmem:[%s7286_s4 + $0xa8] sm:$0xff]  }
 0x28f   : > { %4558 = vmatprep.subr.bf16.mxu0 %v4996_v58  ;;  %v5010_v63 = vld [vmem:[%s7286_s4 + $0xf8] sm:$0xff]   ;;  %v5017_v58 = vld [vmem:[%s7286_s4 + $0xa0] sm:$0xff]  }
 0x291   : > { %3476 = vmatpush2.bf16.msra.mxu1 %v4883_v48  ;;  %v5013_v48 = vld [vmem:[%s7286_s4 + $0xb0] sm:$0xff]  }
 0x292   : > { %3477 = vmatprep.subr.bf16.mxu1 %v4888_v15  ;;  %4559 = vmatpush3.bf16.msra.mxu0 %v4997_v50  ;;  %v5014_v15 = vld [vmem:[%s7286_s4 + $0xe8] sm:$0xff]   ;;  %v5019_v50 = vld [vmem:[%s7286_s4 + $0x98] sm:$0xff]  }
 0x293   : > { %4560 = vmatprep.subr.bf16.mxu0 %v4998_v5  ;;  %v5020_v5 = vld [vmem:[%s7286_s4 + $0xd0] sm:$0xff]  }
 0x295   : > { %3478 = vmatpush2.bf16.msra.mxu1 %v4886_v44  ;;  %v5018_v44 = vld [vmem:[%s7286_s4 + $0xd8] sm:$0xff]  }
 0x296   : > { %3479 = vmatprep.subr.bf16.mxu1 %v4894_v51  ;;  %4561 = vmatpush3.bf16.msra.mxu0 %v4999_v46  ;;  %v5026_v51 = vld [vmem:[%s7286_s4 + $0x178] sm:$0xff]   ;;  %v5023_v46 = vld [vmem:[%s7286_s4 + $0x88] sm:$0xff]  }
 0x297   : > { %4562 = vmatprep.subr.bf16.mxu0 %v5000_v33  ;;  %v5024_v33 = vld [vmem:[%s7286_s4 + $0xc0] sm:$0xff]  }
 0x299   : > { %3480 = vmatpush2.bf16.msra.mxu1 %v4892_v32  ;;  %v5021_v32 = vld [vmem:[%s7286_s4 + $0x90] sm:$0xff]  }
 0x29a   : > { %3481 = vmatprep.subr.bf16.mxu1 %v4900_v54  ;;  %4563 = vmatpush3.bf16.msra.mxu0 %v5001_v55  ;;  %v5022_v54 = vld [vmem:[%s7286_s4 + $0xc8] sm:$0xff]  }
 0x29b   : > { %4564 = vmatprep.subr.bf16.mxu0 %v5002_v21 }
 0x29d   : > { %3482 = vmatpush2.bf16.msra.mxu1 %v4898_v40  ;;  %v5025_v40 = vld [vmem:[%s7286_s4 + $0x80] sm:$0xff]  }
 0x29e   : > { %3483 = vmatprep.subr.bf16.mxu1 %v4906_v3  ;;  %4565 = vmatpush3.bf16.msra.mxu0 %v5003_v13 }
 0x29f   : > { %4566 = vmatprep.subr.bf16.mxu0 %v5004_v0 }
 0x2a1   : > { %3484 = vmatpush2.bf16.msra.mxu1 %v4904_v7 }
 0x2a2   : > { %3535 = vmatprep.subr.bf16.mxu1 %v4915_v56  ;;  %4567 = vmatpush3.bf16.msra.mxu0 %v5005_v60 }
 0x2a3   : > { %4568 = vmatprep.subr.bf16.mxu0 %v5006_v47 }
 0x2a4   : > { %3486 = vmatmul.mubr.bf16.vlgmr.msra.gmra.mxu1 %v7084_v10 }
 0x2a5   : > { %3536 = vmatpush1.bf16.msra.mxu1 %v4913_v22  ;;  %3567 = vmatprep.mubr.bf16.mxu1 %v7086_v29  ;;  %v4933_v29 = vld [vmem:[#allocation3 + $0x3d4] ss:$24 sps:$4 sm:$0xff]  }
 0x2a6   : > { %3537 = vmatprep.subr.bf16.mxu1 %v4921_v19  ;;  %4569 = vmatpush3.bf16.msra.mxu0 %v5007_v42  ;;  %v5027_v42 = vld [vmem:[%s7286_s4 + $0x138] sm:$0xff]  }
 0x2a7   : > { %4570 = vmatprep.subr.bf16.mxu0 %v5008_v41  ;;  %v5028_v41 = vld [vmem:[%s7286_s4 + $0x170] sm:$0xff]  }
 0x2a9   : > { %3538 = vmatpush1.bf16.msra.mxu1 %v4919_v30 }
 0x2aa   : > { %3539 = vmatprep.subr.bf16.mxu1 %v4927_v25  ;;  %4571 = vmatpush3.bf16.msra.mxu0 %v5009_v14  ;;  %v5030_v14 = vld [vmem:[%s7286_s4 + $0x168] sm:$0xff]  }
 0x2ab   : > { %4600 = vmatprep.subr.bf16.mxu0 %v5026_v51 }
 0x2ad   : > { %3540 = vmatpush1.bf16.msra.mxu1 %v4925_v34 }
 0x2ae   : > { %3541 = vmatprep.subr.bf16.mxu1 %v4933_v29  ;;  %v5029_v29 = vld [vmem:[%s7286_s4 + $0x130] sm:$0xff]  }
 0x2b1   : > { %3542 = vmatpush1.bf16.msra.mxu1 %v4931_v38  ;;  %v5031_v38 = vld [vmem:[%s7286_s4 + $0x128] sm:$0xff]  }
 0x2b2   : > { %3543 = vmatprep.subr.bf16.mxu1 %v4939_v43  ;;  %v5032_v43 = vld [vmem:[%s7286_s4 + $0x160] sm:$0xff]  }
 0x2b5   : > { %3544 = vmatpush1.bf16.msra.mxu1 %v4937_v49  ;;  %v5033_v49 = vld [vmem:[%s7286_s4 + $0x120] sm:$0xff]  }
 0x2b6   : > { %3545 = vmatprep.subr.bf16.mxu1 %v4945_v17  ;;  %v5034_v17 = vld [vmem:[%s7286_s4 + $0x158] sm:$0xff]  }
 0x2b9   : > { %3546 = vmatpush1.bf16.msra.mxu1 %v4943_v35  ;;  %v5035_v35 = vld [vmem:[%s7286_s4 + $0x118] sm:$0xff]  }
 0x2ba   : > { %3547 = vmatprep.subr.bf16.mxu1 %v4951_v20  ;;  %v5036_v20 = vld [vmem:[%s7286_s4 + $0x150] sm:$0xff]  }
 0x2bd   : > { %3548 = vmatpush1.bf16.msra.mxu1 %v4949_v37  ;;  %v5037_v37 = vld [vmem:[%s7286_s4 + $0x110] sm:$0xff]  }
 0x2be   : > { %3549 = vmatprep.subr.bf16.mxu1 %v4957_v4  ;;  %v5038_v4 = vld [vmem:[%s7286_s4 + $0x148] sm:$0xff]  }
 0x2c1   : > { %3550 = vmatpush1.bf16.msra.mxu1 %v4955_v24  ;;  %v5039_v24 = vld [vmem:[%s7286_s4 + $0x108] sm:$0xff]  }
 0x2c2   : > { %3551 = vmatprep.subr.bf16.mxu1 %v4963_v59  ;;  %v5040_v59 = vld [vmem:[%s7286_s4 + $0x140] sm:$0xff]  }
 0x2c5   : > { %3552 = vmatpush2.bf16.msra.mxu1 %v4961_v1  ;;  %v5041_v1 = vld [vmem:[%s7286_s4 + $0x100] sm:$0xff]  }
 0x2c6   : > { %3553 = vmatprep.subr.bf16.mxu1 %v4969_v26 }
 0x2c9   : > { %3554 = vmatpush2.bf16.msra.mxu1 %v4967_v9 }
 0x2ca   : > { %3555 = vmatprep.subr.bf16.mxu1 %v4975_v2 }
 0x2cc   : > { %v3364_v62 = vpop.f32.mrf.mxu0 }
 0x2cd   : > { %3556 = vmatpush2.bf16.msra.mxu1 %v4973_v61 }
 0x2ce   : > { %3557 = vmatprep.subr.bf16.mxu1 %v4981_v16  ;;  %v3366_v12 = vpop.f32.mrf.mxu0 }
 0x2d0   : > { %v3368_v6 = vpop.f32.mrf.mxu0 }
 0x2d1   : > { %3558 = vmatpush2.bf16.msra.mxu1 %v4979_v8 }
 0x2d2   : > { %3559 = vmatprep.subr.bf16.mxu1 %v4984_v27  ;;  %v3369_v57 = vpop.f32.mrf.mxu0 }
 0x2d5   : > { %3560 = vmatpush2.bf16.msra.mxu1 %v4982_v52 }
 0x2d6   : > { %3561 = vmatprep.subr.bf16.mxu1 %v4987_v39 }
 0x2d9   : > { %3562 = vmatpush2.bf16.msra.mxu1 %v4985_v45 }
 0x2da   : > { %3563 = vmatprep.subr.bf16.mxu1 %v4990_v53 }
 0x2dd   : > { %3564 = vmatpush2.bf16.msra.mxu1 %v4988_v11 }
 0x2de   : > { %3565 = vmatprep.subr.bf16.mxu1 %v4993_v23 }
 0x2e1   : > { %3566 = vmatpush2.bf16.msra.mxu1 %v4991_v36 }
 0x2e2   : > { %4578 = vmatprep.subr.bf16.mxu1 %v5010_v63 }
 0x2e4   : > { %3568 = vmatmul.mubr.bf16.vlgmr.msra.gmra.mxu1 %v7084_v10  ;;  %v5016_v10 = vld [vmem:[%s7286_s4 + $0xe0] sm:$0xff]  }
 0x2e5   : > { %4579 = vmatpush3.bf16.msra.mxu1 %v5011_v31 }
 0x2e6   : > { %4580 = vmatprep.subr.bf16.mxu1 %v5012_v18 }
 0x2e9   : > { %4581 = vmatpush3.bf16.msra.mxu1 %v5013_v48 }
 0x2ea   : > { %4582 = vmatprep.subr.bf16.mxu1 %v5014_v15 }
 0x2ed   : > { %4583 = vmatpush3.bf16.msra.mxu1 %v5015_v28 }
 0x2ee   : > { %4584 = vmatprep.subr.bf16.mxu1 %v5016_v10 }
 0x2f1   : > { %4585 = vmatpush3.bf16.msra.mxu1 %v5017_v58 }
 0x2f2   : > { %4586 = vmatprep.subr.bf16.mxu1 %v5018_v44 }
 0x2f5   : > { %4587 = vmatpush3.bf16.msra.mxu1 %v5019_v50 }
 0x2f6   : > { %4588 = vmatprep.subr.bf16.mxu1 %v5020_v5  ;;  %v4396_v5 = vld [vmem:[%s7287_s5] ss:$0 sm:$0xff] }
 0x2f9   : > { %4589 = vmatpush3.bf16.msra.mxu1 %v5021_v32 }
 0x2fa   : > { %4590 = vmatprep.subr.bf16.mxu1 %v5022_v54 }
 0x2fd   : > { %4591 = vmatpush3.bf16.msra.mxu1 %v5023_v46 }
 0x2fe   : > { %4592 = vmatprep.subr.bf16.mxu1 %v5024_v33 }
 0x301   : > { %4593 = vmatpush3.bf16.msra.mxu1 %v5025_v40 }
 0x30c   : > { %v3446_v3 = vpop.f32.mrf.mxu0 }
 0x30e   : > { %v3448_v55 = vpop.f32.mrf.mxu0 }
 0x310   : > { %v3450_v21 = vpop.f32.mrf.mxu0 }
 0x312   : > { %v3451_v7 = vpop.f32.mrf.mxu0 }
 0x324   : > { %v3405_v56 = vpop.f32.mrf.mxu1 }
 0x325   : > { %v3406_v13 = vadd.f32 %v3405_v56, %v3364_v62 }
 0x326   : > { %v3407_v0 = vpop.f32.mrf.mxu1 }
 0x327   : > { %v3408_v22 = vadd.f32 %v3407_v0, %v3366_v12  ;;  %v3576_v19 = vmax.f32 %v3406_v13, 0.0 }
 0x328   : > { %v3409_v60 = vpop.f32.mrf.mxu1 }
 0x329   : > { %v3577_v30 = vmax.f32 %v3408_v22, 0.0  ;;  %v3582_v34 = vpack.c.bf16 %v3576_v19, %v3576_v19 }
 0x32a   : > { %v3410_v47 = vpop.f32.mrf.mxu1 }
 0x32b   : > { %v3583_v25 = vpack.c.bf16 %v3577_v30, %v3577_v30 }
 0x32d   : > { %4011 = vmatprep.mubr.bf16.mxu0 %v3583_v25 }
 0x32e   : > { %4012 = vmatmul.mubr.bf16.vlgmr.msra.gmra.mxu0 %v3582_v34 }
 0x32f   : > { %4601 = vmatpush3.bf16.msra.mxu0 %v5027_v42 }
 0x330   : > { %4602 = vmatprep.subr.bf16.mxu0 %v5028_v41 }
 0x333   : > { %4603 = vmatpush3.bf16.msra.mxu0 %v5029_v29 }
 0x334   : > { %4604 = vmatprep.subr.bf16.mxu0 %v5030_v14 }
 0x337   : > { %4605 = vmatpush3.bf16.msra.mxu0 %v5031_v38 }
 0x338   : > { %4606 = vmatprep.subr.bf16.mxu0 %v5032_v43 }
 0x33b   : > { %4607 = vmatpush3.bf16.msra.mxu0 %v5033_v49 }
 0x33c   : > { %4608 = vmatprep.subr.bf16.mxu0 %v5034_v17 }
 0x33f   : > { %4609 = vmatpush3.bf16.msra.mxu0 %v5035_v35 }
 0x340   : > { %4610 = vmatprep.subr.bf16.mxu0 %v5036_v20 }
 0x343   : > { %4611 = vmatpush3.bf16.msra.mxu0 %v5037_v37 }
 0x344   : > { %4612 = vmatprep.subr.bf16.mxu0 %v5038_v4 }
 0x347   : > { %4613 = vmatpush3.bf16.msra.mxu0 %v5039_v24 }
 0x348   : > { %4614 = vmatprep.subr.bf16.mxu0 %v5040_v59 }
 0x34b   : > { %4615 = vmatpush3.bf16.msra.mxu0 %v5041_v1 }
 0x34d   : > { %v3528_v26 = vpop.f32.mrf.mxu0 }
 0x34f   : > { %v3530_v9 = vpop.f32.mrf.mxu0 }
 0x351   : > { %v3532_v2 = vpop.f32.mrf.mxu0 }
 0x353   : > { %v3533_v61 = vpop.f32.mrf.mxu0 }
 0x364   : > { %v3487_v16 = vpop.f32.mrf.mxu1 }
 0x365   : > { %v3488_v8 = vadd.f32 %v3487_v16, %v3446_v3 }
 0x366   : > { %v3489_v27 = vpop.f32.mrf.mxu1 }
 0x367   : > { %v3490_v52 = vadd.f32 %v3489_v27, %v3448_v55  ;;  %v3578_v39 = vmax.f32 %v3488_v8, 0.0 }
 0x368   : > { %v3491_v62 = vpop.f32.mrf.mxu1 }
 0x369   : > { %v3579_v12 = vmax.f32 %v3490_v52, 0.0  ;;  %v3584_v6 = vpack.c.bf16 %v3578_v39, %v3578_v39 }
 0x36a   : > { %v3492_v45 = vpop.f32.mrf.mxu1 }
 0x36b   : > { %v3585_v53 = vpack.c.bf16 %v3579_v12, %v3579_v12 }
 0x36d   : > { %4051 = vmatprep.mubr.bf16.mxu1 %v3585_v53 }
 0x36e   : > { %4052 = vmatmul.mubr.bf16.vlgmr.msra.gmra.mxu1 %v3584_v6 }
 0x3a4   : > { %v3569_v57 = vpop.f32.mrf.mxu1 }
 0x3a5   : > { %v3570_v11 = vadd.f32 %v3569_v57, %v3528_v26 }
 0x3a6   : > { %v3571_v23 = vpop.f32.mrf.mxu1 }
 0x3a7   : > { %v3572_v36 = vadd.f32 %v3571_v23, %v3530_v9  ;;  %v3580_v63 = vmax.f32 %v3570_v11, 0.0 }
 0x3a8   : > { %v3573_v31 = vpop.f32.mrf.mxu1 }
 0x3a9   : > { %v3581_v18 = vmax.f32 %v3572_v36, 0.0  ;;  %v3586_v28 = vpack.c.bf16 %v3580_v63, %v3580_v63 }
 0x3aa   : > { %v3574_v48 = vpop.f32.mrf.mxu1 }
 0x3ab   : > { %v3587_v15 = vpack.c.bf16 %v3581_v18, %v3581_v18 }
 0x3ad   : > { %4091 = vmatprep.mubr.bf16.mxu0 %v3587_v15 }
 0x3ae   : > { %4092 = vmatmul.mubr.bf16.vlgmr.msra.gmra.mxu0 %v3586_v28 }
 0x3ee   : > { %v4572_v10 = vpop.f32.mrf.mxu0 }
 0x3f0   : > { %v4573_v58 = vpop.f32.mrf.mxu0 }
 0x3f1   : > { %v4574_v44 = vadd.f32 %v4573_v58, %v4572_v10 }
 0x3f2   : > { %v4575_v51 = vpop.f32.mrf.mxu0 }
 0x3f3   : > { %v4014_v46 = vadd.f32 %v4574_v44, %v4396_v5 }
 0x3f4   : > { %v4576_v50 = vpop.f32.mrf.mxu0 }
 0x42e   : > { %v4594_v32 = vpop.f32.mrf.mxu1 }
 0x430   : > { %v4595_v54 = vpop.f32.mrf.mxu1 }
 0x431   : > { %v4596_v33 = vadd.f32 %v4595_v54, %v4594_v32 }
 0x432   : > { %v4597_v40 = vpop.f32.mrf.mxu1 }
 0x433   : > { %v4054_v3 = vadd.f32 %v4596_v33, %v4014_v46 }
 0x434   : > { %v4598_v55 = vpop.f32.mrf.mxu1 }
 0x46e   : > { %v4616_v21 = vpop.f32.mrf.mxu0 }
 0x470   : > { %v4617_v7 = vpop.f32.mrf.mxu0 }
 0x471   : > { %v4618_v56 = vadd.f32 %v4617_v7, %v4616_v21 }
 0x472   : > { %v4619_v13 = vpop.f32.mrf.mxu0 }
 0x473   : > { %v4094_v0 = vadd.f32 %v4618_v56, %v4054_v3 }
 0x474   : > { %v4620_v22 = vpop.f32.mrf.mxu0 }
 0x475   : > { %4099 = vst [vmem:[%s262_s11] sm:$0xff] %v4094_v0 }
 0x476   : > { %5087 = shalt.err (!%p5084_p0)
}
 0x477   : > { %s5088_s20 = scalar_lea.hbm %s7247_s15, 128  ;;  %s5092_s29 = scalar_lea.hbm %s7288_s6, 512 }
 0x478   : > { %p5089_p1 = scmp.ne.s32.totalorder %s7247_s15, %s5088_s20  ;;  %p5093_p4 = scmp.lt.s32.totalorder %s7247_s15, %s7288_s6 }
 0x479   : > { %p5094_p7 = scmp.lt.s32.totalorder %s5092_s29, %s5088_s20 }
 0x47a   : > { %p5090_p2 = pnand %p5089_p1, %p5219_p5 }
 0x47b   : > { %p5095_p6 = por %p5094_p7, %p5093_p4 }
 0x47c   : > { %p5091_p3 = pneg %p5090_p2 }
 0x47e   : > { %p5096_p8 = pnand %p5095_p6, %p5091_p3 }
 0x480   : > { %5099 = shalt.err (!%p5096_p8)
}
 0x481   : > { %4651 = dma.vmem_to_hbm [thread:$0]  (%p5219_p5), %s4115_s12, 128, %s7247_s15, %s4101_s16  }
 0x482 PF: > { %p4663_p9 = scmp.ge.s32.totalorder %s5138_s24, 2  ;;  %s4126_s11 = sand.u32 1, %s5126_s21  }
 0x483   : > { %p7884_p10 = scmp.ne.s32.totalorder %s7535_s8, 0  ;;  %s4127_s13 = scalar_lea.sflag [#allocation5], %s4126_s11 }
 0x485   : > { %p4658_p11 = pnand %p4663_p9, %p7884_p10 }
 0x487   : > { %p4659_p12 = pneg %p4658_p11 }
 0x489   : > { %5121 = dma.done.wait (%p4659_p12), %s4127_s13, 128  }
 0x48a   : > { %5123 = vsyncadd (%p4659_p12), %s4127_s13, 4294967168  ;;  %p17_p13 = scmp.ge.s32.totalorder %s5206_s27, 6   ;;  %s7885_s21 = smov %s5130_s22 }
 0x48b   : > { %s7886_s22 = smov %s5134_s23  ;;  %s7887_s23 = smov %s5217_s30 }
 0x48c   : > { %s7888_s24 = smov %s5206_s27  ;;  %19 = sbr.rel (!%p17_p13) target bundleno = 4 (0x4), region = 84 }
 0x491   :  { %4132 = vsyncpa [#allocation4], 1 }
 0x492   :  { %4134 = vsyncpa [#allocation4 + $0x1], 1 }
 0x493   :  { %4135 = vsyncpa [#allocation5], 1 }
 0x494   :  { %4137 = vsyncpa [#allocation5 + $0x1], 1 }

</bundles_post_ra>
